<compile_context>
chip_gen: v7x
topology: tpu7x:2x2x1
jax: 0.10.0
libtpu: 0.0.40
codegen_flags: <defaults>
</compile_context>

<pallas_src>
import functools

import jax
import jax.numpy as jnp
import numpy as np
from jax.experimental import pallas as pl
from jax.experimental.pallas import tpu as pltpu

LANE = 128  # pad channel dim to a lane-dense width


# ------------------------------ Pallas kernel ---------------------------------

def _basic_block_kernel(x_ref, w1_ref, b1_ref, w2_ref, b2_ref, o_ref, mid_ref, *, kh, kw, pad):
    # x_ref  : (1, H+2p, W+2p, Cp)  spatially pre-padded, channel-padded input
    # w1/w2  : (kh*kw, Cp, Cp)      conv weights with BN scale folded in (one matrix per tap)
    # b1/b2  : (1, Cp)              folded BN bias
    # o_ref  : (1, H, W, Cp)
    # mid_ref: (H+2p, W+2p, Cp)     VMEM scratch: conv1 output with zero halo (= conv2's padding)
    H, W, C = o_ref.shape[1], o_ref.shape[2], o_ref.shape[3]
    M = H * W

    # ---- conv1 (kh*kw shifted matmuls) + bn1 + relu ----
    acc = jnp.zeros((M, C), jnp.float32)
    for t in range(kh * kw):
        i, j = t // kw, t % kw
        xs = x_ref[0, i:i + H, j:j + W, :].reshape(M, C)
        acc = acc + jnp.dot(xs, w1_ref[t], preferred_element_type=jnp.float32)
    y1 = jnp.maximum(acc + b1_ref[...], 0.0)

    # stage conv1 output into padded VMEM scratch (halo stays zero)
    mid_ref[...] = jnp.zeros_like(mid_ref)
    mid_ref[pad:pad + H, pad:pad + W, :] = y1.reshape(H, W, C)

    # ---- conv2 + bn2 + residual + relu ----
    acc2 = jnp.zeros((M, C), jnp.float32)
    for t in range(kh * kw):
        i, j = t // kw, t % kw
        ms = mid_ref[i:i + H, j:j + W, :].reshape(M, C)
        acc2 = acc2 + jnp.dot(ms, w2_ref[t], preferred_element_type=jnp.float32)

    res = x_ref[0, pad:pad + H, pad:pad + W, :].reshape(M, C)  # identity residual (stride==1)
    y2 = jnp.maximum(acc2 + b2_ref[...] + res, 0.0)
    o_ref[0] = y2.reshape(H, W, C).astype(o_ref.dtype)


# ------------------------------ glue (plain JAX) -------------------------------

def _fold_bn(gamma, beta, mean, var, eps=1e-5):
    scale = gamma / jnp.sqrt(var + eps)
    bias = beta - mean * scale
    return scale.astype(jnp.float32), bias.astype(jnp.float32)


def _fold_weight(w_oihw, scale, c_pad):
    """(Cout, Cin, kh, kw) -> (kh*kw, Cpad, Cpad) with BN scale folded into output columns."""
    Cout, Cin, kh, kw = w_oihw.shape
    w = jnp.transpose(w_oihw, (2, 3, 1, 0)).reshape(kh * kw, Cin, Cout)
    w = w * scale.reshape(1, 1, Cout)
    return jnp.pad(w, ((0, 0), (0, c_pad - Cin), (0, c_pad - Cout))).astype(jnp.float32)


def basic_block_forward(x_nchw, params, *, kernel_size, stride, padding, eps=1e-5):
    """BasicBlock forward (inference). x_nchw: (N, Cin, H, W) f32 -> (N, Cout, H, W)."""
    assert stride == 1, "stride > 1 (downsample path) not implemented"
    N, Cin, H, W = x_nchw.shape
    Cout = params["conv1_w"].shape[0]
    assert Cin == Cout, "identity residual requires Cin == Cout when stride == 1"
    kh = kw = kernel_size
    assert padding == (kernel_size - 1) // 2, "kernel assumes 'same' spatial convolution"

    Cp = ((max(Cout, 1) + LANE - 1) // LANE) * LANE  # lane-dense channel width

    # NCHW -> NHWC, zero-pad channels to Cp, zero spatial halo of `padding`
    x_nhwc = jnp.transpose(x_nchw, (0, 2, 3, 1)).astype(jnp.float32)
    x_pad = jnp.pad(x_nhwc, ((0, 0), (padding, padding), (padding, padding), (0, Cp - Cin)))

    s1, b1 = _fold_bn(params["bn1_gamma"], params["bn1_beta"], params["bn1_mean"], params["bn1_var"], eps)
    s2, b2 = _fold_bn(params["bn2_gamma"], params["bn2_beta"], params["bn2_mean"], params["bn2_var"], eps)
    w1 = _fold_weight(params["conv1_w"], s1, Cp)
    w2 = _fold_weight(params["conv2_w"], s2, Cp)
    b1 = jnp.pad(b1, (0, Cp - Cout)).reshape(1, Cp)
    b2 = jnp.pad(b2, (0, Cp - Cout)).reshape(1, Cp)

    Hp, Wp = H + 2 * padding, W + 2 * padding
    kernel = functools.partial(_basic_block_kernel, kh=kh, kw=kw, pad=padding)

    flops = 2 * 2 * N * H * W * kh * kw * Cp * Cp  # two convs
    bytes_accessed = 4 * (x_pad.size + w1.size + w2.size + b1.size + b2.size + N * H * W * Cp)

    out = pl.pallas_call(
        kernel,
        out_shape=jax.ShapeDtypeStruct((N, H, W, Cp), jnp.float32),
        grid=(N,),
        in_specs=[
            pl.BlockSpec((1, Hp, Wp, Cp), lambda n: (n, 0, 0, 0)),
            pl.BlockSpec((kh * kw, Cp, Cp), lambda n: (0, 0, 0)),
            pl.BlockSpec((1, Cp), lambda n: (0, 0)),
            pl.BlockSpec((kh * kw, Cp, Cp), lambda n: (0, 0, 0)),
            pl.BlockSpec((1, Cp), lambda n: (0, 0)),
        ],
        out_specs=pl.BlockSpec((1, H, W, Cp), lambda n: (n, 0, 0, 0)),
        scratch_shapes=[pltpu.VMEM((Hp, Wp, Cp), jnp.float32)],
        compiler_params=pltpu.CompilerParams(
            dimension_semantics=("parallel",),
            vmem_limit_bytes=32 * 1024 * 1024,
        ),
        cost_estimate=pl.CostEstimate(flops=flops, transcendentals=0,
                                      bytes_accessed=bytes_accessed),
    )(x_pad, w1, b1, w2, b2)

    out = out[..., :Cout]                     # drop channel padding
    return jnp.transpose(out, (0, 3, 1, 2))   # back to NCHW


# ------------------------------ reference (JAX) --------------------------------

def _reference_forward(x_nchw, params, *, kernel_size, stride, padding, eps=1e-5):
    def conv(x, w, s):
        return jax.lax.conv_general_dilated(
            x, w, window_strides=(s, s), padding=[(padding, padding)] * 2,
            dimension_numbers=("NCHW", "OIHW", "NCHW"))

    def bn(x, g, b, m, v):
        g = g.reshape(1, -1, 1, 1); b = b.reshape(1, -1, 1, 1)
        m = m.reshape(1, -1, 1, 1); v = v.reshape(1, -1, 1, 1)
        return (x - m) / jnp.sqrt(v + eps) * g + b

    out = conv(x_nchw, params["conv1_w"], stride)
    out = bn(out, params["bn1_gamma"], params["bn1_beta"], params["bn1_mean"], params["bn1_var"])
    out = jnp.maximum(out, 0.0)
    out = conv(out, params["conv2_w"], 1)
    out = bn(out, params["bn2_gamma"], params["bn2_beta"], params["bn2_mean"], params["bn2_var"])
    out = out + x_nchw
    return jnp.maximum(out, 0.0)


# ----------------------------------- main --------------------------------------

if __name__ == "__main__":
    # BasicBlock(in_channels=4, out_channels=4, kernel_size=3, stride=1, padding=1)
    N, C, H, W = 2, 4, 16, 16
    K = 3
    STRIDE = 1
    PAD = 1

    key = jax.random.PRNGKey(0)
    (k_x, k_w1, k_w2, k_g1, k_b1, k_g2, k_b2,
     k_m1, k_v1, k_m2, k_v2) = jax.random.split(key, 11)

    x = jax.random.normal(k_x, (N, C, H, W), dtype=jnp.float32)

    params = {
        "conv1_w": 0.1 * jax.random.normal(k_w1, (C, C, K, K), dtype=jnp.float32),
        "conv2_w": 0.1 * jax.random.normal(k_w2, (C, C, K, K), dtype=jnp.float32),
        "bn1_gamma": 1.0 + 0.1 * jax.random.normal(k_g1, (C,), dtype=jnp.float32),
        "bn1_beta": 0.1 * jax.random.normal(k_b1, (C,), dtype=jnp.float32),
        "bn1_mean": 0.05 * jax.random.normal(k_m1, (C,), dtype=jnp.float32),
        "bn1_var": jnp.abs(1.0 + 0.1 * jax.random.normal(k_v1, (C,), dtype=jnp.float32)),
        "bn2_gamma": 1.0 + 0.1 * jax.random.normal(k_g2, (C,), dtype=jnp.float32),
        "bn2_beta": 0.1 * jax.random.normal(k_b2, (C,), dtype=jnp.float32),
        "bn2_mean": 0.05 * jax.random.normal(k_m2, (C,), dtype=jnp.float32),
        "bn2_var": jnp.abs(1.0 + 0.1 * jax.random.normal(k_v2, (C,), dtype=jnp.float32)),
    }

    fwd = jax.jit(functools.partial(basic_block_forward,
                                    kernel_size=K, stride=STRIDE, padding=PAD))
    out = jax.block_until_ready(fwd(x, params))

    ref = jax.block_until_ready(
        _reference_forward(x, params, kernel_size=K, stride=STRIDE, padding=PAD))

    assert out.shape == (N, C, H, W), out.shape
    np.testing.assert_allclose(np.asarray(out), np.asarray(ref), rtol=1e-4, atol=1e-4)

    print("KERNEL_OK")
</pallas_src>

<mosaic_0001>
module attributes {stable_mosaic.version = 11 : i64} {
  func.func @_basic_block_kernel(%arg0: i32, %arg1: memref<1x18x18x128xf32, #tpu.memory_space<vmem>>, %arg2: memref<9x128x128xf32, #tpu.memory_space<vmem>>, %arg3: memref<1x128xf32, #tpu.memory_space<vmem>>, %arg4: memref<9x128x128xf32, #tpu.memory_space<vmem>>, %arg5: memref<1x128xf32, #tpu.memory_space<vmem>>, %arg6: memref<1x16x16x128xf32, #tpu.memory_space<vmem>>, %arg7: memref<18x18x128xf32, #tpu.memory_space<vmem>>) attributes {dimension_semantics = [#tpu.dimension_semantics<parallel>], iteration_bounds = array<i64: 2>, scalar_prefetch = 0 : i64, scratch_operands = 1 : i64, tpu.core_type = #tpu.core_type<tc>, window_params = [{transform_indices = @transform_0, window_bounds = array<i64: 1, 18, 18, 128>}, {pipeline_mode = #tpu.pipeline_mode<synchronous>, transform_indices = @transform_1, window_bounds = array<i64: 9, 128, 128>}, {pipeline_mode = #tpu.pipeline_mode<synchronous>, transform_indices = @transform_2, window_bounds = array<i64: 1, 128>}, {pipeline_mode = #tpu.pipeline_mode<synchronous>, transform_indices = @transform_3, window_bounds = array<i64: 9, 128, 128>}, {pipeline_mode = #tpu.pipeline_mode<synchronous>, transform_indices = @transform_4, window_bounds = array<i64: 1, 128>}, {transform_indices = @transform_5, window_bounds = array<i64: 1, 16, 16, 128>}]} {
    %cst = arith.constant 0.000000e+00 : f32
    %0 = vector.broadcast %cst : f32 to vector<256x128xf32>
    %c0 = arith.constant 0 : index
    %c0_0 = arith.constant 0 : index
    %c0_1 = arith.constant 0 : index
    %c0_2 = arith.constant 0 : index
    %1 = vector.load %arg1[%c0, %c0_0, %c0_1, %c0_2] : memref<1x18x18x128xf32, #tpu.memory_space<vmem>>, vector<1x16x16x128xf32>
    %2 = vector.shape_cast %1 : vector<1x16x16x128xf32> to vector<16x16x128xf32>
    %3 = vector.shape_cast %2 : vector<16x16x128xf32> to vector<256x128xf32>
    %c0_3 = arith.constant 0 : index
    %c0_4 = arith.constant 0 : index
    %c0_5 = arith.constant 0 : index
    %4 = vector.load %arg2[%c0_3, %c0_4, %c0_5] : memref<9x128x128xf32, #tpu.memory_space<vmem>>, vector<1x128x128xf32>
    %5 = vector.shape_cast %4 : vector<1x128x128xf32> to vector<128x128xf32>
    %cst_6 = arith.constant dense<0.000000e+00> : vector<256x128xf32>
    %6 = tpu.matmul %3, %5, %cst_6 {dimension_numbers = #tpu.dot_dimension_numbers<[1], [0], [0], [1], [0, 0, 1, 1], [], []>} : vector<256x128xf32>, vector<128x128xf32>, vector<256x128xf32> -> vector<256x128xf32>
    %7 = arith.addf %0, %6 : vector<256x128xf32>
    %c0_7 = arith.constant 0 : index
    %c0_8 = arith.constant 0 : index
    %c1 = arith.constant 1 : index
    %c0_9 = arith.constant 0 : index
    %8 = vector.load %arg1[%c0_7, %c0_8, %c1, %c0_9] : memref<1x18x18x128xf32, #tpu.memory_space<vmem>>, vector<1x16x16x128xf32>
    %9 = vector.shape_cast %8 : vector<1x16x16x128xf32> to vector<16x16x128xf32>
    %10 = vector.shape_cast %9 : vector<16x16x128xf32> to vector<256x128xf32>
    %c1_10 = arith.constant 1 : index
    %c0_11 = arith.constant 0 : index
    %c0_12 = arith.constant 0 : index
    %11 = vector.load %arg2[%c1_10, %c0_11, %c0_12] : memref<9x128x128xf32, #tpu.memory_space<vmem>>, vector<1x128x128xf32>
    %12 = vector.shape_cast %11 : vector<1x128x128xf32> to vector<128x128xf32>
    %cst_13 = arith.constant dense<0.000000e+00> : vector<256x128xf32>
    %13 = tpu.matmul %10, %12, %cst_13 {dimension_numbers = #tpu.dot_dimension_numbers<[1], [0], [0], [1], [0, 0, 1, 1], [], []>} : vector<256x128xf32>, vector<128x128xf32>, vector<256x128xf32> -> vector<256x128xf32>
    %14 = arith.addf %7, %13 : vector<256x128xf32>
    %c0_14 = arith.constant 0 : index
    %c0_15 = arith.constant 0 : index
    %c2 = arith.constant 2 : index
    %c0_16 = arith.constant 0 : index
    %15 = vector.load %arg1[%c0_14, %c0_15, %c2, %c0_16] : memref<1x18x18x128xf32, #tpu.memory_space<vmem>>, vector<1x16x16x128xf32>
    %16 = vector.shape_cast %15 : vector<1x16x16x128xf32> to vector<16x16x128xf32>
    %17 = vector.shape_cast %16 : vector<16x16x128xf32> to vector<256x128xf32>
    %c2_17 = arith.constant 2 : index
    %c0_18 = arith.constant 0 : index
    %c0_19 = arith.constant 0 : index
    %18 = vector.load %arg2[%c2_17, %c0_18, %c0_19] : memref<9x128x128xf32, #tpu.memory_space<vmem>>, vector<1x128x128xf32>
    %19 = vector.shape_cast %18 : vector<1x128x128xf32> to vector<128x128xf32>
    %cst_20 = arith.constant dense<0.000000e+00> : vector<256x128xf32>
    %20 = tpu.matmul %17, %19, %cst_20 {dimension_numbers = #tpu.dot_dimension_numbers<[1], [0], [0], [1], [0, 0, 1, 1], [], []>} : vector<256x128xf32>, vector<128x128xf32>, vector<256x128xf32> -> vector<256x128xf32>
    %21 = arith.addf %14, %20 : vector<256x128xf32>
    %c0_21 = arith.constant 0 : index
    %c1_22 = arith.constant 1 : index
    %c0_23 = arith.constant 0 : index
    %c0_24 = arith.constant 0 : index
    %22 = vector.load %arg1[%c0_21, %c1_22, %c0_23, %c0_24] : memref<1x18x18x128xf32, #tpu.memory_space<vmem>>, vector<1x16x16x128xf32>
    %23 = vector.shape_cast %22 : vector<1x16x16x128xf32> to vector<16x16x128xf32>
    %24 = vector.shape_cast %23 : vector<16x16x128xf32> to vector<256x128xf32>
    %c3 = arith.constant 3 : index
    %c0_25 = arith.constant 0 : index
    %c0_26 = arith.constant 0 : index
    %25 = vector.load %arg2[%c3, %c0_25, %c0_26] : memref<9x128x128xf32, #tpu.memory_space<vmem>>, vector<1x128x128xf32>
    %26 = vector.shape_cast %25 : vector<1x128x128xf32> to vector<128x128xf32>
    %cst_27 = arith.constant dense<0.000000e+00> : vector<256x128xf32>
    %27 = tpu.matmul %24, %26, %cst_27 {dimension_numbers = #tpu.dot_dimension_numbers<[1], [0], [0], [1], [0, 0, 1, 1], [], []>} : vector<256x128xf32>, vector<128x128xf32>, vector<256x128xf32> -> vector<256x128xf32>
    %28 = arith.addf %21, %27 : vector<256x128xf32>
    %c0_28 = arith.constant 0 : index
    %c1_29 = arith.constant 1 : index
    %c1_30 = arith.constant 1 : index
    %c0_31 = arith.constant 0 : index
    %29 = vector.load %arg1[%c0_28, %c1_29, %c1_30, %c0_31] : memref<1x18x18x128xf32, #tpu.memory_space<vmem>>, vector<1x16x16x128xf32>
    %30 = vector.shape_cast %29 : vector<1x16x16x128xf32> to vector<16x16x128xf32>
    %31 = vector.shape_cast %30 : vector<16x16x128xf32> to vector<256x128xf32>
    %c4 = arith.constant 4 : index
    %c0_32 = arith.constant 0 : index
    %c0_33 = arith.constant 0 : index
    %32 = vector.load %arg2[%c4, %c0_32, %c0_33] : memref<9x128x128xf32, #tpu.memory_space<vmem>>, vector<1x128x128xf32>
    %33 = vector.shape_cast %32 : vector<1x128x128xf32> to vector<128x128xf32>
    %cst_34 = arith.constant dense<0.000000e+00> : vector<256x128xf32>
    %34 = tpu.matmul %31, %33, %cst_34 {dimension_numbers = #tpu.dot_dimension_numbers<[1], [0], [0], [1], [0, 0, 1, 1], [], []>} : vector<256x128xf32>, vector<128x128xf32>, vector<256x128xf32> -> vector<256x128xf32>
    %35 = arith.addf %28, %34 : vector<256x128xf32>
    %c0_35 = arith.constant 0 : index
    %c1_36 = arith.constant 1 : index
    %c2_37 = arith.constant 2 : index
    %c0_38 = arith.constant 0 : index
    %36 = vector.load %arg1[%c0_35, %c1_36, %c2_37, %c0_38] : memref<1x18x18x128xf32, #tpu.memory_space<vmem>>, vector<1x16x16x128xf32>
    %37 = vector.shape_cast %36 : vector<1x16x16x128xf32> to vector<16x16x128xf32>
    %38 = vector.shape_cast %37 : vector<16x16x128xf32> to vector<256x128xf32>
    %c5 = arith.constant 5 : index
    %c0_39 = arith.constant 0 : index
    %c0_40 = arith.constant 0 : index
    %39 = vector.load %arg2[%c5, %c0_39, %c0_40] : memref<9x128x128xf32, #tpu.memory_space<vmem>>, vector<1x128x128xf32>
    %40 = vector.shape_cast %39 : vector<1x128x128xf32> to vector<128x128xf32>
    %cst_41 = arith.constant dense<0.000000e+00> : vector<256x128xf32>
    %41 = tpu.matmul %38, %40, %cst_41 {dimension_numbers = #tpu.dot_dimension_numbers<[1], [0], [0], [1], [0, 0, 1, 1], [], []>} : vector<256x128xf32>, vector<128x128xf32>, vector<256x128xf32> -> vector<256x128xf32>
    %42 = arith.addf %35, %41 : vector<256x128xf32>
    %c0_42 = arith.constant 0 : index
    %c2_43 = arith.constant 2 : index
    %c0_44 = arith.constant 0 : index
    %c0_45 = arith.constant 0 : index
    %43 = vector.load %arg1[%c0_42, %c2_43, %c0_44, %c0_45] : memref<1x18x18x128xf32, #tpu.memory_space<vmem>>, vector<1x16x16x128xf32>
    %44 = vector.shape_cast %43 : vector<1x16x16x128xf32> to vector<16x16x128xf32>
    %45 = vector.shape_cast %44 : vector<16x16x128xf32> to vector<256x128xf32>
    %c6 = arith.constant 6 : index
    %c0_46 = arith.constant 0 : index
    %c0_47 = arith.constant 0 : index
    %46 = vector.load %arg2[%c6, %c0_46, %c0_47] : memref<9x128x128xf32, #tpu.memory_space<vmem>>, vector<1x128x128xf32>
    %47 = vector.shape_cast %46 : vector<1x128x128xf32> to vector<128x128xf32>
    %cst_48 = arith.constant dense<0.000000e+00> : vector<256x128xf32>
    %48 = tpu.matmul %45, %47, %cst_48 {dimension_numbers = #tpu.dot_dimension_numbers<[1], [0], [0], [1], [0, 0, 1, 1], [], []>} : vector<256x128xf32>, vector<128x128xf32>, vector<256x128xf32> -> vector<256x128xf32>
    %49 = arith.addf %42, %48 : vector<256x128xf32>
    %c0_49 = arith.constant 0 : index
    %c2_50 = arith.constant 2 : index
    %c1_51 = arith.constant 1 : index
    %c0_52 = arith.constant 0 : index
    %50 = vector.load %arg1[%c0_49, %c2_50, %c1_51, %c0_52] : memref<1x18x18x128xf32, #tpu.memory_space<vmem>>, vector<1x16x16x128xf32>
    %51 = vector.shape_cast %50 : vector<1x16x16x128xf32> to vector<16x16x128xf32>
    %52 = vector.shape_cast %51 : vector<16x16x128xf32> to vector<256x128xf32>
    %c7 = arith.constant 7 : index
    %c0_53 = arith.constant 0 : index
    %c0_54 = arith.constant 0 : index
    %53 = vector.load %arg2[%c7, %c0_53, %c0_54] : memref<9x128x128xf32, #tpu.memory_space<vmem>>, vector<1x128x128xf32>
    %54 = vector.shape_cast %53 : vector<1x128x128xf32> to vector<128x128xf32>
    %cst_55 = arith.constant dense<0.000000e+00> : vector<256x128xf32>
    %55 = tpu.matmul %52, %54, %cst_55 {dimension_numbers = #tpu.dot_dimension_numbers<[1], [0], [0], [1], [0, 0, 1, 1], [], []>} : vector<256x128xf32>, vector<128x128xf32>, vector<256x128xf32> -> vector<256x128xf32>
    %56 = arith.addf %49, %55 : vector<256x128xf32>
    %c0_56 = arith.constant 0 : index
    %c2_57 = arith.constant 2 : index
    %c2_58 = arith.constant 2 : index
    %c0_59 = arith.constant 0 : index
    %57 = vector.load %arg1[%c0_56, %c2_57, %c2_58, %c0_59] : memref<1x18x18x128xf32, #tpu.memory_space<vmem>>, vector<1x16x16x128xf32>
    %58 = vector.shape_cast %57 : vector<1x16x16x128xf32> to vector<16x16x128xf32>
    %59 = vector.shape_cast %58 : vector<16x16x128xf32> to vector<256x128xf32>
    %c8 = arith.constant 8 : index
    %c0_60 = arith.constant 0 : index
    %c0_61 = arith.constant 0 : index
    %60 = vector.load %arg2[%c8, %c0_60, %c0_61] : memref<9x128x128xf32, #tpu.memory_space<vmem>>, vector<1x128x128xf32>
    %61 = vector.shape_cast %60 : vector<1x128x128xf32> to vector<128x128xf32>
    %cst_62 = arith.constant dense<0.000000e+00> : vector<256x128xf32>
    %62 = tpu.matmul %59, %61, %cst_62 {dimension_numbers = #tpu.dot_dimension_numbers<[1], [0], [0], [1], [0, 0, 1, 1], [], []>} : vector<256x128xf32>, vector<128x128xf32>, vector<256x128xf32> -> vector<256x128xf32>
    %63 = arith.addf %56, %62 : vector<256x128xf32>
    %c0_63 = arith.constant 0 : index
    %c0_64 = arith.constant 0 : index
    %64 = vector.load %arg3[%c0_63, %c0_64] : memref<1x128xf32, #tpu.memory_space<vmem>>, vector<1x128xf32>
    %65 = vector.broadcast %64 : vector<1x128xf32> to vector<256x128xf32>
    %66 = arith.addf %63, %65 : vector<256x128xf32>
    %cst_65 = arith.constant 0.000000e+00 : f32
    %67 = vector.broadcast %cst_65 : f32 to vector<256x128xf32>
    %68 = arith.maximumf %66, %67 : vector<256x128xf32>
    %cst_66 = arith.constant 0.000000e+00 : f32
    %69 = vector.broadcast %cst_66 : f32 to vector<18x18x128xf32>
    %c0_67 = arith.constant 0 : index
    %c0_68 = arith.constant 0 : index
    %c0_69 = arith.constant 0 : index
    %70 = vector.load %arg7[%c0_67, %c0_68, %c0_69] : memref<18x18x128xf32, #tpu.memory_space<vmem>>, vector<18x18x128xf32>
    tpu.vector_store %arg7[%c0_67, %c0_68, %c0_69], %69 {strides = array<i32>} : memref<18x18x128xf32, #tpu.memory_space<vmem>>, vector<18x18x128xf32>,
    %71 = vector.shape_cast %68 : vector<256x128xf32> to vector<16x16x128xf32>
    %c1_70 = arith.constant 1 : index
    %c1_71 = arith.constant 1 : index
    %c0_72 = arith.constant 0 : index
    %72 = vector.load %arg7[%c1_70, %c1_71, %c0_72] : memref<18x18x128xf32, #tpu.memory_space<vmem>>, vector<16x16x128xf32>
    tpu.vector_store %arg7[%c1_70, %c1_71, %c0_72], %71 {strides = array<i32>} : memref<18x18x128xf32, #tpu.memory_space<vmem>>, vector<16x16x128xf32>,
    %cst_73 = arith.constant 0.000000e+00 : f32
    %73 = vector.broadcast %cst_73 : f32 to vector<256x128xf32>
    %c0_74 = arith.constant 0 : index
    %c0_75 = arith.constant 0 : index
    %c0_76 = arith.constant 0 : index
    %74 = vector.load %arg7[%c0_74, %c0_75, %c0_76] : memref<18x18x128xf32, #tpu.memory_space<vmem>>, vector<16x16x128xf32>
    %75 = vector.shape_cast %74 : vector<16x16x128xf32> to vector<256x128xf32>
    %c0_77 = arith.constant 0 : index
    %c0_78 = arith.constant 0 : index
    %c0_79 = arith.constant 0 : index
    %76 = vector.load %arg4[%c0_77, %c0_78, %c0_79] : memref<9x128x128xf32, #tpu.memory_space<vmem>>, vector<1x128x128xf32>
    %77 = vector.shape_cast %76 : vector<1x128x128xf32> to vector<128x128xf32>
    %cst_80 = arith.constant dense<0.000000e+00> : vector<256x128xf32>
    %78 = tpu.matmul %75, %77, %cst_80 {dimension_numbers = #tpu.dot_dimension_numbers<[1], [0], [0], [1], [0, 0, 1, 1], [], []>} : vector<256x128xf32>, vector<128x128xf32>, vector<256x128xf32> -> vector<256x128xf32>
    %79 = arith.addf %73, %78 : vector<256x128xf32>
    %c0_81 = arith.constant 0 : index
    %c1_82 = arith.constant 1 : index
    %c0_83 = arith.constant 0 : index
    %80 = vector.load %arg7[%c0_81, %c1_82, %c0_83] : memref<18x18x128xf32, #tpu.memory_space<vmem>>, vector<16x16x128xf32>
    %81 = vector.shape_cast %80 : vector<16x16x128xf32> to vector<256x128xf32>
    %c1_84 = arith.constant 1 : index
    %c0_85 = arith.constant 0 : index
    %c0_86 = arith.constant 0 : index
    %82 = vector.load %arg4[%c1_84, %c0_85, %c0_86] : memref<9x128x128xf32, #tpu.memory_space<vmem>>, vector<1x128x128xf32>
    %83 = vector.shape_cast %82 : vector<1x128x128xf32> to vector<128x128xf32>
    %cst_87 = arith.constant dense<0.000000e+00> : vector<256x128xf32>
    %84 = tpu.matmul %81, %83, %cst_87 {dimension_numbers = #tpu.dot_dimension_numbers<[1], [0], [0], [1], [0, 0, 1, 1], [], []>} : vector<256x128xf32>, vector<128x128xf32>, vector<256x128xf32> -> vector<256x128xf32>
    %85 = arith.addf %79, %84 : vector<256x128xf32>
    %c0_88 = arith.constant 0 : index
    %c2_89 = arith.constant 2 : index
    %c0_90 = arith.constant 0 : index
    %86 = vector.load %arg7[%c0_88, %c2_89, %c0_90] : memref<18x18x128xf32, #tpu.memory_space<vmem>>, vector<16x16x128xf32>
    %87 = vector.shape_cast %86 : vector<16x16x128xf32> to vector<256x128xf32>
    %c2_91 = arith.constant 2 : index
    %c0_92 = arith.constant 0 : index
    %c0_93 = arith.constant 0 : index
    %88 = vector.load %arg4[%c2_91, %c0_92, %c0_93] : memref<9x128x128xf32, #tpu.memory_space<vmem>>, vector<1x128x128xf32>
    %89 = vector.shape_cast %88 : vector<1x128x128xf32> to vector<128x128xf32>
    %cst_94 = arith.constant dense<0.000000e+00> : vector<256x128xf32>
    %90 = tpu.matmul %87, %89, %cst_94 {dimension_numbers = #tpu.dot_dimension_numbers<[1], [0], [0], [1], [0, 0, 1, 1], [], []>} : vector<256x128xf32>, vector<128x128xf32>, vector<256x128xf32> -> vector<256x128xf32>
    %91 = arith.addf %85, %90 : vector<256x128xf32>
    %c1_95 = arith.constant 1 : index
    %c0_96 = arith.constant 0 : index
    %c0_97 = arith.constant 0 : index
    %92 = vector.load %arg7[%c1_95, %c0_96, %c0_97] : memref<18x18x128xf32, #tpu.memory_space<vmem>>, vector<16x16x128xf32>
    %93 = vector.shape_cast %92 : vector<16x16x128xf32> to vector<256x128xf32>
    %c3_98 = arith.constant 3 : index
    %c0_99 = arith.constant 0 : index
    %c0_100 = arith.constant 0 : index
    %94 = vector.load %arg4[%c3_98, %c0_99, %c0_100] : memref<9x128x128xf32, #tpu.memory_space<vmem>>, vector<1x128x128xf32>
    %95 = vector.shape_cast %94 : vector<1x128x128xf32> to vector<128x128xf32>
    %cst_101 = arith.constant dense<0.000000e+00> : vector<256x128xf32>
    %96 = tpu.matmul %93, %95, %cst_101 {dimension_numbers = #tpu.dot_dimension_numbers<[1], [0], [0], [1], [0, 0, 1, 1], [], []>} : vector<256x128xf32>, vector<128x128xf32>, vector<256x128xf32> -> vector<256x128xf32>
    %97 = arith.addf %91, %96 : vector<256x128xf32>
    %c1_102 = arith.constant 1 : index
    %c1_103 = arith.constant 1 : index
    %c0_104 = arith.constant 0 : index
    %98 = vector.load %arg7[%c1_102, %c1_103, %c0_104] : memref<18x18x128xf32, #tpu.memory_space<vmem>>, vector<16x16x128xf32>
    %99 = vector.shape_cast %98 : vector<16x16x128xf32> to vector<256x128xf32>
    %c4_105 = arith.constant 4 : index
    %c0_106 = arith.constant 0 : index
    %c0_107 = arith.constant 0 : index
    %100 = vector.load %arg4[%c4_105, %c0_106, %c0_107] : memref<9x128x128xf32, #tpu.memory_space<vmem>>, vector<1x128x128xf32>
    %101 = vector.shape_cast %100 : vector<1x128x128xf32> to vector<128x128xf32>
    %cst_108 = arith.constant dense<0.000000e+00> : vector<256x128xf32>
    %102 = tpu.matmul %99, %101, %cst_108 {dimension_numbers = #tpu.dot_dimension_numbers<[1], [0], [0], [1], [0, 0, 1, 1], [], []>} : vector<256x128xf32>, vector<128x128xf32>, vector<256x128xf32> -> vector<256x128xf32>
    %103 = arith.addf %97, %102 : vector<256x128xf32>
    %c1_109 = arith.constant 1 : index
    %c2_110 = arith.constant 2 : index
    %c0_111 = arith.constant 0 : index
    %104 = vector.load %arg7[%c1_109, %c2_110, %c0_111] : memref<18x18x128xf32, #tpu.memory_space<vmem>>, vector<16x16x128xf32>
    %105 = vector.shape_cast %104 : vector<16x16x128xf32> to vector<256x128xf32>
    %c5_112 = arith.constant 5 : index
    %c0_113 = arith.constant 0 : index
    %c0_114 = arith.constant 0 : index
    %106 = vector.load %arg4[%c5_112, %c0_113, %c0_114] : memref<9x128x128xf32, #tpu.memory_space<vmem>>, vector<1x128x128xf32>
    %107 = vector.shape_cast %106 : vector<1x128x128xf32> to vector<128x128xf32>
    %cst_115 = arith.constant dense<0.000000e+00> : vector<256x128xf32>
    %108 = tpu.matmul %105, %107, %cst_115 {dimension_numbers = #tpu.dot_dimension_numbers<[1], [0], [0], [1], [0, 0, 1, 1], [], []>} : vector<256x128xf32>, vector<128x128xf32>, vector<256x128xf32> -> vector<256x128xf32>
    %109 = arith.addf %103, %108 : vector<256x128xf32>
    %c2_116 = arith.constant 2 : index
    %c0_117 = arith.constant 0 : index
    %c0_118 = arith.constant 0 : index
    %110 = vector.load %arg7[%c2_116, %c0_117, %c0_118] : memref<18x18x128xf32, #tpu.memory_space<vmem>>, vector<16x16x128xf32>
    %111 = vector.shape_cast %110 : vector<16x16x128xf32> to vector<256x128xf32>
    %c6_119 = arith.constant 6 : index
    %c0_120 = arith.constant 0 : index
    %c0_121 = arith.constant 0 : index
    %112 = vector.load %arg4[%c6_119, %c0_120, %c0_121] : memref<9x128x128xf32, #tpu.memory_space<vmem>>, vector<1x128x128xf32>
    %113 = vector.shape_cast %112 : vector<1x128x128xf32> to vector<128x128xf32>
    %cst_122 = arith.constant dense<0.000000e+00> : vector<256x128xf32>
    %114 = tpu.matmul %111, %113, %cst_122 {dimension_numbers = #tpu.dot_dimension_numbers<[1], [0], [0], [1], [0, 0, 1, 1], [], []>} : vector<256x128xf32>, vector<128x128xf32>, vector<256x128xf32> -> vector<256x128xf32>
    %115 = arith.addf %109, %114 : vector<256x128xf32>
    %c2_123 = arith.constant 2 : index
    %c1_124 = arith.constant 1 : index
    %c0_125 = arith.constant 0 : index
    %116 = vector.load %arg7[%c2_123, %c1_124, %c0_125] : memref<18x18x128xf32, #tpu.memory_space<vmem>>, vector<16x16x128xf32>
    %117 = vector.shape_cast %116 : vector<16x16x128xf32> to vector<256x128xf32>
    %c7_126 = arith.constant 7 : index
    %c0_127 = arith.constant 0 : index
    %c0_128 = arith.constant 0 : index
    %118 = vector.load %arg4[%c7_126, %c0_127, %c0_128] : memref<9x128x128xf32, #tpu.memory_space<vmem>>, vector<1x128x128xf32>
    %119 = vector.shape_cast %118 : vector<1x128x128xf32> to vector<128x128xf32>
    %cst_129 = arith.constant dense<0.000000e+00> : vector<256x128xf32>
    %120 = tpu.matmul %117, %119, %cst_129 {dimension_numbers = #tpu.dot_dimension_numbers<[1], [0], [0], [1], [0, 0, 1, 1], [], []>} : vector<256x128xf32>, vector<128x128xf32>, vector<256x128xf32> -> vector<256x128xf32>
    %121 = arith.addf %115, %120 : vector<256x128xf32>
    %c2_130 = arith.constant 2 : index
    %c2_131 = arith.constant 2 : index
    %c0_132 = arith.constant 0 : index
    %122 = vector.load %arg7[%c2_130, %c2_131, %c0_132] : memref<18x18x128xf32, #tpu.memory_space<vmem>>, vector<16x16x128xf32>
    %123 = vector.shape_cast %122 : vector<16x16x128xf32> to vector<256x128xf32>
    %c8_133 = arith.constant 8 : index
    %c0_134 = arith.constant 0 : index
    %c0_135 = arith.constant 0 : index
    %124 = vector.load %arg4[%c8_133, %c0_134, %c0_135] : memref<9x128x128xf32, #tpu.memory_space<vmem>>, vector<1x128x128xf32>
    %125 = vector.shape_cast %124 : vector<1x128x128xf32> to vector<128x128xf32>
    %cst_136 = arith.constant dense<0.000000e+00> : vector<256x128xf32>
    %126 = tpu.matmul %123, %125, %cst_136 {dimension_numbers = #tpu.dot_dimension_numbers<[1], [0], [0], [1], [0, 0, 1, 1], [], []>} : vector<256x128xf32>, vector<128x128xf32>, vector<256x128xf32> -> vector<256x128xf32>
    %127 = arith.addf %121, %126 : vector<256x128xf32>
    %c0_137 = arith.constant 0 : index
    %c1_138 = arith.constant 1 : index
    %c1_139 = arith.constant 1 : index
    %c0_140 = arith.constant 0 : index
    %128 = vector.load %arg1[%c0_137, %c1_138, %c1_139, %c0_140] : memref<1x18x18x128xf32, #tpu.memory_space<vmem>>, vector<1x16x16x128xf32>
    %129 = vector.shape_cast %128 : vector<1x16x16x128xf32> to vector<16x16x128xf32>
    %130 = vector.shape_cast %129 : vector<16x16x128xf32> to vector<256x128xf32>
    %c0_141 = arith.constant 0 : index
    %c0_142 = arith.constant 0 : index
    %131 = vector.load %arg5[%c0_141, %c0_142] : memref<1x128xf32, #tpu.memory_space<vmem>>, vector<1x128xf32>
    %132 = vector.broadcast %131 : vector<1x128xf32> to vector<256x128xf32>
    %133 = arith.addf %127, %132 : vector<256x128xf32>
    %134 = arith.addf %133, %130 : vector<256x128xf32>
    %cst_143 = arith.constant 0.000000e+00 : f32
    %135 = vector.broadcast %cst_143 : f32 to vector<256x128xf32>
    %136 = arith.maximumf %134, %135 : vector<256x128xf32>
    %137 = vector.shape_cast %136 : vector<256x128xf32> to vector<16x16x128xf32>
    %c0_144 = arith.constant 0 : index
    %c0_145 = arith.constant 0 : index
    %c0_146 = arith.constant 0 : index
    %c0_147 = arith.constant 0 : index
    %138 = vector.load %arg6[%c0_144, %c0_145, %c0_146, %c0_147] : memref<1x16x16x128xf32, #tpu.memory_space<vmem>>, vector<1x16x16x128xf32>
    %139 = vector.shape_cast %138 : vector<1x16x16x128xf32> to vector<16x16x128xf32>
    %140 = vector.shape_cast %137 : vector<16x16x128xf32> to vector<1x16x16x128xf32>
    tpu.vector_store %arg6[%c0_144, %c0_145, %c0_146, %c0_147], %140 {strides = array<i32>} : memref<1x16x16x128xf32, #tpu.memory_space<vmem>>, vector<1x16x16x128xf32>,
    return
  }
  func.func @transform_0(%arg0: i32) -> (i32, i32, i32, i32) {
    %c0_i32 = arith.constant 0 : i32
    %c0_i32_0 = arith.constant 0 : i32
    %c0_i32_1 = arith.constant 0 : i32
    %c0_i32_2 = arith.constant 0 : i32
    return %arg0, %c0_i32, %c0_i32_0, %c0_i32_1 : i32, i32, i32, i32
  }
  func.func @transform_1(%arg0: i32) -> (i32, i32, i32) {
    %c0_i32 = arith.constant 0 : i32
    %c0_i32_0 = arith.constant 0 : i32
    %c0_i32_1 = arith.constant 0 : i32
    %c0_i32_2 = arith.constant 0 : i32
    return %c0_i32, %c0_i32_0, %c0_i32_1 : i32, i32, i32
  }
  func.func @transform_2(%arg0: i32) -> (i32, i32) {
    %c0_i32 = arith.constant 0 : i32
    %c0_i32_0 = arith.constant 0 : i32
    %c0_i32_1 = arith.constant 0 : i32
    return %c0_i32, %c0_i32_0 : i32, i32
  }
  func.func @transform_3(%arg0: i32) -> (i32, i32, i32) {
    %c0_i32 = arith.constant 0 : i32
    %c0_i32_0 = arith.constant 0 : i32
    %c0_i32_1 = arith.constant 0 : i32
    %c0_i32_2 = arith.constant 0 : i32
    return %c0_i32, %c0_i32_0, %c0_i32_1 : i32, i32, i32
  }
  func.func @transform_4(%arg0: i32) -> (i32, i32) {
    %c0_i32 = arith.constant 0 : i32
    %c0_i32_0 = arith.constant 0 : i32
    %c0_i32_1 = arith.constant 0 : i32
    return %c0_i32, %c0_i32_0 : i32, i32
  }
  func.func @transform_5(%arg0: i32) -> (i32, i32, i32, i32) {
    %c0_i32 = arith.constant 0 : i32
    %c0_i32_0 = arith.constant 0 : i32
    %c0_i32_1 = arith.constant 0 : i32
    %c0_i32_2 = arith.constant 0 : i32
    return %arg0, %c0_i32, %c0_i32_0, %c0_i32_1 : i32, i32, i32, i32
  }
}

</mosaic_0001>

<bundles_post_ra>
// kernel: basic_block_forward.1
= control target key start
LH: loop header
LB: loop body
LE: loop exit
PB: predicated region body
PF: predicated region fallthrough
CT: control target
= control target key end

     0   :  { %s9921_s18 = smov 0   ;;  %s12013_s0 = inlined_call_operand.vmem [shape: f32[2,18,18,128], index: 0, kind: input, shape index: {}]   ;;  %s12014_s1 = inlined_call_operand.vmem [shape: f32[9,128,128], index: 1, kind: input, shape index: {}]   ;;  %s12015_s2 = inlined_call_operand.vmem [shape: f32[1,128], index: 2, kind: input, shape index: {}]   ;;  %s12016_s3 = inlined_call_operand.vmem [shape: f32[9,128,128], index: 3, kind: input, shape index: {}]   ;;  %s12017_s4 = inlined_call_operand.vmem [shape: f32[1,128], index: 4, kind: input, shape index: {}]   ;;  %s12018_s5 = inlined_call_operand.vmem [shape: f32[2,16,16,128], index: 5, kind: output, shape index: {}]  }
   0x1 LB: > { %s5986_s19 = sadd.s32 4294967295, %s9888_s18   ;;  %p5990_p0 = scmp.ge.s32.totalorder %s9888_s18, 1  ;;  %s9888_s18 = sphi %s9921_s18, %s15_s18  }
   0x2   : > { %p187_p1 = scmp.lt.s32.totalorder %s9888_s18, 3 }
   0x4   : > { %p188_p2 = pnand %p5990_p0, %p187_p1 }
   0x6   : > { %191 = sbr.rel (%p188_p2) target bundleno = 1566 (0x61e), region = 40 }
   0xd   : > { %v5994_v0 = vld [vmem:[%s12014_s1 + $0x80] sm:$0xff]  ;;  %v5995_v1 = vld [vmem:[%s12014_s1 + $0x88] sm:$0xff]  ;;  %v5996_v2 = vld [vmem:[%s12014_s1 + $0x90] sm:$0xff]  ;;  %p215_p3 = scmp.lt.s32.totalorder %s5986_s19, 1 }
   0xe   : > { %v8783_v3 = vpack.c.bf16 %v5995_v1, %v5994_v0  ;;  %v5997_v4 = vld [vmem:[%s12014_s1 + $0x98] sm:$0xff]  ;;  %v5998_v6 = vld [vmem:[%s12014_s1 + $0xa0] sm:$0xff]  ;;  %v5999_v7 = vld [vmem:[%s12014_s1 + $0xa8] sm:$0xff] }
   0xf   : > { %v8787_v5 = vpack.c.bf16 %v5997_v4, %v5996_v2  ;;  %s12222_s19 = smov (!%p215_p3, %s5986_s19), 1  ;;  %v8791_v8 = vpack.c.bf16 %v5999_v7, %v5998_v6  ;;  %v6000_v9 = vld [vmem:[%s12014_s1 + $0xb0] sm:$0xff]  ;;  %v6001_v10 = vld [vmem:[%s12014_s1 + $0xb8] sm:$0xff]  ;;  %v6002_v13 = vld [vmem:[%s12014_s1 + $0xc0] sm:$0xff] }
  0x10   : > { %8784 = vmatprep.subr.bf16.mxu0 %v8783_v3  ;;  %s9871_s7 = smul.u32 432, %s12222_s19  ;;  %v8795_v12 = vpack.c.bf16 %v6001_v10, %v6000_v9  ;;  %v6003_v14 = vld [vmem:[%s12014_s1 + $0xc8] sm:$0xff]  ;;  %v6004_v16 = vld [vmem:[%s12014_s1 + $0xd0] sm:$0xff]  ;;  %v6005_v17 = vld [vmem:[%s12014_s1 + $0xd8] sm:$0xff]  ;;  %s6478_s6 = sshll.u32 %s12222_s19, 8 }
  0x11   : > { %8786 = vmatpush3.bf16.msra.mxu0 %v8783_v3  ;;  %v8799_v15 = vpack.c.bf16 %v6003_v14, %v6002_v13  ;;  %v8803_v18 = vpack.c.bf16 %v6005_v17, %v6004_v16  ;;  %v6006_v19 = vld [vmem:[%s12014_s1 + $0xe0] sm:$0xff]  ;;  %v6007_v20 = vld [vmem:[%s12014_s1 + $0xe8] sm:$0xff]  ;;  %v6008_v22 = vld [vmem:[%s12014_s1 + $0xf0] sm:$0xff]  ;;  %s11916_s9 = scalar_lea.vmem %s12018_s5, %s6478_s6 }
  0x12   : > { %8788 = vmatprep.subr.bf16.mxu0 %v8787_v5  ;;  %s9959_s14 = scalar_lea.vmem %s12013_s0, %s9871_s7  ;;  %v8807_v21 = vpack.c.bf16 %v6007_v20, %v6006_v19  ;;  %v6009_v23 = vld [vmem:[%s12014_s1 + $0xf8] sm:$0xff]  ;;  %v257_v25 = vld [vmem:[%s12014_s1] sm:$0xff]  ;;  %v258_v26 = vld [vmem:[%s12014_s1 + $0x8] sm:$0xff] }
  0x13   : > { %v273_v11 = vld [vmem:[%s9959_s14 + $0x1] sm:$0xff]  ;;  %v8811_v24 = vpack.c.bf16 %v6009_v23, %v6008_v22  ;;  %v8815_v27 = vpack.c.bf16 %v258_v26, %v257_v25  ;;  %v259_v28 = vld [vmem:[%s12014_s1 + $0x10] sm:$0xff]  ;;  %v260_v29 = vld [vmem:[%s12014_s1 + $0x18] sm:$0xff] }
  0x14   : > { %7375 = vmatprep.mubr.f32.mxu0 %v273_v11  ;;  %v274_v30 = vld [vmem:[%s9959_s14 + $0x9] sm:$0xff]  ;;  %v10000_v31 = vld [vmem:[%s9959_s14 + $0x19] sm:$0xff]  ;;  %v8819_v32 = vpack.c.bf16 %v260_v29, %v259_v28  ;;  %v10010_v35 = vld [vmem:[%s9959_s14 + $0x21] sm:$0xff] }
  0x15   : > { %8790 = vmatpush3.bf16.msra.mxu0 %v8787_v5  ;;  %v261_v33 = vld [vmem:[%s12014_s1 + $0x20] sm:$0xff]  ;;  %v262_v34 = vld [vmem:[%s12014_s1 + $0x28] sm:$0xff]  ;;  %v10013_v36 = vld [vmem:[%s9959_s14 + $0x31] sm:$0xff] }
  0x16   : > { %8792 = vmatprep.subr.bf16.mxu0 %v8791_v8  ;;  %v8823_v37 = vpack.c.bf16 %v262_v34, %v261_v33  ;;  %v263_v38 = vld [vmem:[%s12014_s1 + $0x30] sm:$0xff]  ;;  %v264_v39 = vld [vmem:[%s12014_s1 + $0x38] sm:$0xff]  ;;  %v265_v43 = vld [vmem:[%s12014_s1 + $0x40] sm:$0xff] }
  0x17   : > { %v10024_v40 = vld [vmem:[%s9959_s14 + $0x39] sm:$0xff]  ;;  %v10027_v41 = vld [vmem:[%s9959_s14 + $0x49] sm:$0xff]  ;;  %v8827_v42 = vpack.c.bf16 %v264_v39, %v263_v38  ;;  %v10038_v45 = vld [vmem:[%s9959_s14 + $0x51] sm:$0xff] }
  0x18   : > { %v266_v44 = vld [vmem:[%s12014_s1 + $0x48] sm:$0xff]  ;;  %v267_v48 = vld [vmem:[%s12014_s1 + $0x50] sm:$0xff]  ;;  %v268_v49 = vld [vmem:[%s12014_s1 + $0x58] sm:$0xff] }
  0x19   : > { %8794 = vmatpush3.bf16.msra.mxu0 %v8791_v8  ;;  %v10041_v46 = vld [vmem:[%s9959_s14 + $0x61] sm:$0xff]  ;;  %v8831_v47 = vpack.c.bf16 %v266_v44, %v265_v43  ;;  %v10052_v50 = vld [vmem:[%s9959_s14 + $0x69] sm:$0xff]  ;;  %v10055_v51 = vld [vmem:[%s9959_s14 + $0x79] sm:$0xff]  ;;  %v8835_v52 = vpack.c.bf16 %v268_v49, %v267_v48 }
  0x1a   : > { %8796 = vmatprep.subr.bf16.mxu0 %v8795_v12  ;;  %v269_v53 = vld [vmem:[%s12014_s1 + $0x60] sm:$0xff]  ;;  %v270_v54 = vld [vmem:[%s12014_s1 + $0x68] sm:$0xff]  ;;  %v10069_v56 = vld [vmem:[%s9959_s14 + $0x91] sm:$0xff] }
  0x1b   : > { %v10066_v55 = vld [vmem:[%s9959_s14 + $0x81] sm:$0xff]  ;;  %v8839_v57 = vpack.c.bf16 %v270_v54, %v269_v53  ;;  %v271_v58 = vld [vmem:[%s12014_s1 + $0x70] sm:$0xff]  ;;  %v272_v59 = vld [vmem:[%s12014_s1 + $0x78] sm:$0xff] }
  0x1c   : > { %v10080_v60 = vld [vmem:[%s9959_s14 + $0x99] sm:$0xff]  ;;  %v10083_v61 = vld [vmem:[%s9959_s14 + $0xa9] sm:$0xff]  ;;  %v8843_v62 = vpack.c.bf16 %v272_v59, %v271_v58  ;;  %v10094_v1 = vld [vmem:[%s9959_s14 + $0xb1] sm:$0xff] }
  0x1d   : > { %8798 = vmatpush3.bf16.msra.mxu0 %v8795_v12  ;;  %v6010_v63 = vld [vmem:[%s12014_s1 + $0x100] sm:$0xff]  ;;  %v6011_v0 = vld [vmem:[%s12014_s1 + $0x108] sm:$0xff]  ;;  %v10113_v7 = vld [vmem:[%s9959_s14 + $0xf1] sm:$0xff] }
  0x1e   : > { %8800 = vmatprep.subr.bf16.mxu0 %v8799_v15  ;;  %v10097_v2 = vld [vmem:[%s9959_s14 + $0xc1] sm:$0xff]  ;;  %v8847_v3 = vpack.c.bf16 %v6011_v0, %v6010_v63  ;;  %v10102_v4 = vld [vmem:[%s9959_s14 + $0xc9] sm:$0xff]  ;;  %v10105_v5 = vld [vmem:[%s9959_s14 + $0xd9] sm:$0xff] }
  0x1f   : > { %v10110_v6 = vld [vmem:[%s9959_s14 + $0xe1] sm:$0xff]  ;;  %v10118_v8 = vld [vmem:[%s9959_s14 + $0xf9] sm:$0xff]  ;;  %v10121_v9 = vld [vmem:[%s9959_s14 + $0x109] sm:$0xff] }
  0x20   : > { %v10126_v10 = vld [vmem:[%s9959_s14 + $0x111] sm:$0xff]  ;;  %v10129_v11 = vld [vmem:[%s9959_s14 + $0x121] sm:$0xff]  ;;  %v10134_v12 = vld [vmem:[%s9959_s14 + $0x129] sm:$0xff] }
  0x21   : > { %8802 = vmatpush3.bf16.msra.mxu0 %v8799_v15  ;;  %12087 = vst [vmem:[#allocation3_spill] sm:$0xff] %v10134_v12  ;;  %v10137_v13 = vld [vmem:[%s9959_s14 + $0x139] sm:$0xff]  ;;  %v10142_v14 = vld [vmem:[%s9959_s14 + $0x141] sm:$0xff]  ;;  %v10145_v15 = vld [vmem:[%s9959_s14 + $0x151] sm:$0xff] }
  0x22   : > { %8804 = vmatprep.subr.bf16.mxu0 %v8803_v18  ;;  %12088 = vst [vmem:[#allocation4_spill] sm:$0xff] %v10137_v13  ;;  %12089 = vst [vmem:[#allocation5_spill] sm:$0xff] %v10142_v14  ;;  %v10150_v16 = vld [vmem:[%s9959_s14 + $0x159] sm:$0xff]  ;;  %v10153_v17 = vld [vmem:[%s9959_s14 + $0x169] sm:$0xff] }
  0x23   : > { %12090 = vst [vmem:[#allocation6_spill] sm:$0xff] %v10145_v15  ;;  %12091 = vst [vmem:[#allocation7_spill] sm:$0xff] %v10150_v16  ;;  %v225_v19 = vld [vmem:[%s9959_s14] sm:$0xff]  ;;  %v6012_v20 = vld [vmem:[%s12014_s1 + $0x110] sm:$0xff] }
  0x24   : > { %12092 = vst [vmem:[#allocation8_spill] sm:$0xff] %v10153_v17  ;;  %v226_v22 = vld [vmem:[%s9959_s14 + $0x8] sm:$0xff]  ;;  %v10170_v23 = vld [vmem:[%s9959_s14 + $0x18] sm:$0xff]  ;;  %v6014_v25 = vld [vmem:[%s12014_s1 + $0x120] sm:$0xff] }
  0x25   : > { %8806 = vmatpush3.bf16.msra.mxu0 %v8803_v18  ;;  %v10158_v18 = vld [vmem:[%s9959_s14 + $0x171] sm:$0xff]  ;;  %v6015_v26 = vld [vmem:[%s12014_s1 + $0x128] sm:$0xff]  ;;  %v6018_v38 = vld [vmem:[%s12014_s1 + $0x140] sm:$0xff] }
  0x26   : > { %8808 = vmatprep.subr.bf16.mxu0 %v8807_v21  ;;  %12093 = vst [vmem:[#allocation9_spill] sm:$0xff] %v10158_v18  ;;  %v10183_v28 = vld [vmem:[%s9959_s14 + $0x30] sm:$0xff]  ;;  %v8855_v29 = vpack.c.bf16 %v6015_v26, %v6014_v25  ;;  %v10194_v33 = vld [vmem:[%s9959_s14 + $0x38] sm:$0xff]  ;;  %v10197_v34 = vld [vmem:[%s9959_s14 + $0x48] sm:$0xff] }
  0x27   : > { %v6019_v39 = vld [vmem:[%s12014_s1 + $0x148] sm:$0xff]  ;;  %v10211_v43 = vld [vmem:[%s9959_s14 + $0x60] sm:$0xff]  ;;  %v6021_v48 = vld [vmem:[%s12014_s1 + $0x158] sm:$0xff] }
  0x28   : > { %v8863_v44 = vpack.c.bf16 %v6019_v39, %v6018_v38  ;;  %v10222_v49 = vld [vmem:[%s9959_s14 + $0x68] sm:$0xff]  ;;  %v6022_v54 = vld [vmem:[%s12014_s1 + $0x160] sm:$0xff]  ;;  %v10239_v59 = vld [vmem:[%s9959_s14 + $0x90] sm:$0xff] }
  0x29   : > { %8810 = vmatpush3.bf16.msra.mxu0 %v8807_v21  ;;  %v6013_v21 = vld [vmem:[%s12014_s1 + $0x118] sm:$0xff]  ;;  %v10236_v58 = vld [vmem:[%s9959_s14 + $0x80] sm:$0xff]  ;;  %v6024_v63 = vld [vmem:[%s12014_s1 + $0x170] sm:$0xff] }
  0x2a   : > { %8812 = vmatprep.subr.bf16.mxu0 %v8811_v24  ;;  %v6025_v0 = vld [vmem:[%s12014_s1 + $0x178] sm:$0xff]  ;;  %v10267_v25 = vld [vmem:[%s9959_s14 + $0xc0] sm:$0xff]  ;;  %v10291_v39 = vld [vmem:[%s9959_s14 + $0x108] sm:$0xff] }
  0x2b   : > { %v10288_v38 = vld [vmem:[%s9959_s14 + $0xf8] sm:$0xff] }
  0x2d   : > { %8814 = vmatpush3.bf16.msra.mxu0 %v8811_v24  ;;  %v8851_v24 = vpack.c.bf16 %v6013_v21, %v6012_v20  ;;  %v8875_v20 = vpack.c.bf16 %v6025_v0, %v6024_v63  ;;  %v6058_v21 = vld [vmem:[%s12014_s1 + $0x180] sm:$0xff]  ;;  %v10323_v63 = vld [vmem:[%s9959_s14 + $0x168] sm:$0xff]  ;;  %v10328_v0 = vld [vmem:[%s9959_s14 + $0x170] sm:$0xff] }
  0x2e   : > { %8816 = vmatprep.subr.bf16.mxu0 %v8815_v27 }
  0x30   : > { %7376 = vmatmul.mubr.f32.vlgmr.msra.gmra.mrb[0].mxu0 %v274_v30  ;;  %v6016_v30 = vld [vmem:[%s12014_s1 + $0x130] sm:$0xff] }
  0x31   : > { %8818 = vmatpush3.bf16.msra.mxu0 %v8815_v27  ;;  %7378 = vmatprep.mubr.f32.mxu0 %v10000_v31  ;;  %v10180_v27 = vld [vmem:[%s9959_s14 + $0x20] sm:$0xff] }
  0x32   : > { %8820 = vmatprep.subr.bf16.mxu0 %v8819_v32 }
  0x34   : > { %7379 = vmatmul.mubr.f32.gmra.mrb[2].mxu0 %v10010_v35 }
  0x35   : > { %7381 = vmatprep.mubr.f32.mxu0 %v10013_v36  ;;  %8822 = vmatpush3.bf16.msra.mxu0 %v8819_v32  ;;  %v6017_v32 = vld [vmem:[%s12014_s1 + $0x138] sm:$0xff] }
  0x36   : > { %8824 = vmatprep.subr.bf16.mxu0 %v8823_v37 }
  0x38   : > { %7382 = vmatmul.mubr.f32.gmra.mrb[4].mxu0 %v10024_v40 }
  0x39   : > { %7384 = vmatprep.mubr.f32.mxu0 %v10027_v41  ;;  %8826 = vmatpush3.bf16.msra.mxu0 %v8823_v37  ;;  %v8859_v37 = vpack.c.bf16 %v6017_v32, %v6016_v30  ;;  %v10275_v30 = vld [vmem:[%s9959_s14 + $0xd8] sm:$0xff]  ;;  %v10280_v32 = vld [vmem:[%s9959_s14 + $0xe0] sm:$0xff] }
  0x3a   : > { %8828 = vmatprep.subr.bf16.mxu0 %v8827_v42 }
  0x3c   : > { %7385 = vmatmul.mubr.f32.gmra.mrb[6].mxu0 %v10038_v45 }
  0x3d   : > { %7387 = vmatprep.mubr.f32.mxu0 %v10041_v46  ;;  %8830 = vmatpush3.bf16.msra.mxu0 %v8827_v42  ;;  %v10208_v42 = vld [vmem:[%s9959_s14 + $0x50] sm:$0xff] }
  0x3e   : > { %8832 = vmatprep.subr.bf16.mxu0 %v8831_v47 }
  0x40   : > { %7388 = vmatmul.mubr.f32.gmra.mrb[8].mxu0 %v10052_v50 }
  0x41   : > { %7390 = vmatprep.mubr.f32.mxu0 %v10055_v51  ;;  %8834 = vmatpush3.bf16.msra.mxu0 %v8831_v47  ;;  %v6020_v47 = vld [vmem:[%s12014_s1 + $0x150] sm:$0xff] }
  0x42   : > { %8836 = vmatprep.subr.bf16.mxu0 %v8835_v52  ;;  %v8867_v53 = vpack.c.bf16 %v6021_v48, %v6020_v47  ;;  %v10299_v47 = vld [vmem:[%s9959_s14 + $0x120] sm:$0xff]  ;;  %v10304_v48 = vld [vmem:[%s9959_s14 + $0x128] sm:$0xff] }
  0x44   : > { %7391 = vmatmul.mubr.f32.gmra.mrb[10].mxu0 %v10066_v55 }
  0x45   : > { %7393 = vmatprep.mubr.f32.mxu0 %v10069_v56  ;;  %8838 = vmatpush3.bf16.msra.mxu0 %v8835_v52  ;;  %v10225_v52 = vld [vmem:[%s9959_s14 + $0x78] sm:$0xff] }
  0x46   : > { %8840 = vmatprep.subr.bf16.mxu0 %v8839_v57 }
  0x48   : > { %7394 = vmatmul.mubr.f32.gmra.mrb[12].mxu0 %v10080_v60 }
  0x49   : > { %7396 = vmatprep.mubr.f32.mxu0 %v10083_v61  ;;  %8842 = vmatpush3.bf16.msra.mxu0 %v8839_v57  ;;  %v6023_v57 = vld [vmem:[%s12014_s1 + $0x168] sm:$0xff] }
  0x4a   : > { %8844 = vmatprep.subr.bf16.mxu0 %v8843_v62 }
  0x4c   : > { %7397 = vmatmul.mubr.f32.gmra.mrb[14].mxu0 %v10094_v1 }
  0x4d   : > { %7399 = vmatprep.mubr.f32.mxu0 %v10097_v2  ;;  %8846 = vmatpush3.bf16.msra.mxu0 %v8843_v62  ;;  %v8871_v62 = vpack.c.bf16 %v6023_v57, %v6022_v54  ;;  %v10312_v54 = vld [vmem:[%s9959_s14 + $0x140] sm:$0xff]  ;;  %v10315_v57 = vld [vmem:[%s9959_s14 + $0x150] sm:$0xff] }
  0x4e   : > { %8848 = vmatprep.subr.bf16.mxu0 %v8847_v3 }
  0x50   : > { %7400 = vmatmul.mubr.f32.gmra.mrb[16].mxu0 %v10102_v4 }
  0x51   : > { %7402 = vmatprep.mubr.f32.mxu0 %v10105_v5 }
  0x54   : > { %7403 = vmatmul.mubr.f32.gmra.mrb[18].mxu0 %v10110_v6 }
  0x55   : > { %7405 = vmatprep.mubr.f32.mxu0 %v10113_v7 }
  0x58   : > { %7406 = vmatmul.mubr.f32.gmra.mrb[20].mxu0 %v10118_v8 }
  0x59   : > { %7408 = vmatprep.mubr.f32.mxu0 %v10121_v9 }
  0x5c   : > { %7409 = vmatmul.mubr.f32.gmra.mrb[22].mxu0 %v10126_v10 }
  0x5d   : > { %7411 = vmatprep.mubr.f32.mxu0 %v10129_v11 }
  0x60   : > { %7412 = vmatmul.mubr.f32.gmra.mrb[24].mxu0 %v10134_v12  ;;  %v6065_v12 = vld [vmem:[%s12014_s1 + $0x1b8] sm:$0xff] }
  0x61   : > { %7414 = vmatprep.mubr.f32.mxu0 %v10137_v13  ;;  %v10350_v13 = vld [vmem:[%s9959_s14 + $0x22] sm:$0xff] }
  0x62   : > { %12095 = vst [vmem:[#allocation11_spill] sm:$0xff] %v10350_v13 }
  0x64   : > { %7415 = vmatmul.mubr.f32.gmra.mrb[26].mxu0 %v10142_v14  ;;  %v6063_v14 = vld [vmem:[%s12014_s1 + $0x1a8] sm:$0xff] }
  0x65   : > { %7417 = vmatprep.mubr.f32.mxu0 %v10145_v15  ;;  %v6062_v15 = vld [vmem:[%s12014_s1 + $0x1a0] sm:$0xff] }
  0x68   : > { %7418 = vmatmul.mubr.f32.gmra.mrb[28].mxu0 %v10150_v16 }
  0x69   : > { %7420 = vmatprep.mubr.f32.mxu0 %v10153_v17  ;;  %v10340_v17 = vld [vmem:[%s9959_s14 + $0x1a] sm:$0xff] }
  0x6a   : > { %12094 = vst [vmem:[#allocation10_spill] sm:$0xff] %v10340_v17 }
  0x6c   : > { %7421 = vmatmul.mubr.f32.gmra.mrb[30].mxu0 %v10158_v18  ;;  %v773_v18 = vld [vmem:[%s9959_s14 + $0xa] sm:$0xff] }
  0x6d   : > { %7455 = vmatprep.mubr.f32.mxu0 %v225_v19  ;;  %v10253_v19 = vld [vmem:[%s9959_s14 + $0xa8] sm:$0xff] }
  0x70   : > { %7456 = vmatmul.mubr.f32.vlgmr.msra.gmra.mrb[0].mxu0 %v226_v22  ;;  %v6059_v22 = vld [vmem:[%s12014_s1 + $0x188] sm:$0xff] }
  0x71   : > { %8850 = vmatpush3.bf16.msra.mxu0 %v8847_v3  ;;  %7458 = vmatprep.mubr.f32.mxu0 %v10170_v23  ;;  %v10250_v3 = vld [vmem:[%s9959_s14 + $0x98] sm:$0xff]  ;;  %v8879_v26 = vpack.c.bf16 %v6059_v22, %v6058_v21  ;;  %v6060_v21 = vld [vmem:[%s12014_s1 + $0x190] sm:$0xff] }
  0x72   : > { %8852 = vmatprep.subr.bf16.mxu0 %v8851_v24  ;;  %v6061_v22 = vld [vmem:[%s12014_s1 + $0x198] sm:$0xff] }
  0x73   : > { %v8883_v16 = vpack.c.bf16 %v6061_v22, %v6060_v21  ;;  %v8887_v21 = vpack.c.bf16 %v6063_v14, %v6062_v15  ;;  %v6064_v22 = vld [vmem:[%s12014_s1 + $0x1b0] sm:$0xff]  ;;  %v6066_v15 = vld [vmem:[%s12014_s1 + $0x1c0] sm:$0xff] }
  0x74   : > { %7459 = vmatmul.mubr.f32.gmra.mrb[2].mxu0 %v10180_v27  ;;  %v8891_v14 = vpack.c.bf16 %v6065_v12, %v6064_v22  ;;  %v6068_v22 = vld [vmem:[%s12014_s1 + $0x1d0] sm:$0xff] }
  0x75   : > { %7461 = vmatprep.mubr.f32.mxu0 %v10183_v28  ;;  %8854 = vmatpush3.bf16.msra.mxu0 %v8851_v24  ;;  %v10264_v24 = vld [vmem:[%s9959_s14 + $0xb0] sm:$0xff] }
  0x76   : > { %8856 = vmatprep.subr.bf16.mxu0 %v8855_v29 }
  0x78   : > { %7462 = vmatmul.mubr.f32.gmra.mrb[4].mxu0 %v10194_v33 }
  0x79   : > { %7464 = vmatprep.mubr.f32.mxu0 %v10197_v34  ;;  %8858 = vmatpush3.bf16.msra.mxu0 %v8855_v29  ;;  %v10272_v29 = vld [vmem:[%s9959_s14 + $0xc8] sm:$0xff] }
  0x7a   : > { %8860 = vmatprep.subr.bf16.mxu0 %v8859_v37 }
  0x7c   : > { %7465 = vmatmul.mubr.f32.gmra.mrb[6].mxu0 %v10208_v42 }
  0x7d   : > { %7467 = vmatprep.mubr.f32.mxu0 %v10211_v43  ;;  %8862 = vmatpush3.bf16.msra.mxu0 %v8859_v37  ;;  %v10283_v37 = vld [vmem:[%s9959_s14 + $0xf0] sm:$0xff] }
  0x7e   : > { %8864 = vmatprep.subr.bf16.mxu0 %v8863_v44 }
  0x80   : > { %7468 = vmatmul.mubr.f32.gmra.mrb[8].mxu0 %v10222_v49 }
  0x81   : > { %7470 = vmatprep.mubr.f32.mxu0 %v10225_v52  ;;  %8866 = vmatpush3.bf16.msra.mxu0 %v8863_v44  ;;  %v10296_v44 = vld [vmem:[%s9959_s14 + $0x110] sm:$0xff] }
  0x82   : > { %8868 = vmatprep.subr.bf16.mxu0 %v8867_v53 }
  0x84   : > { %7471 = vmatmul.mubr.f32.gmra.mrb[10].mxu0 %v10236_v58 }
  0x85   : > { %7473 = vmatprep.mubr.f32.mxu0 %v10239_v59  ;;  %8870 = vmatpush3.bf16.msra.mxu0 %v8867_v53  ;;  %v10307_v53 = vld [vmem:[%s9959_s14 + $0x138] sm:$0xff] }
  0x86   : > { %8872 = vmatprep.subr.bf16.mxu0 %v8871_v62 }
  0x88   : > { %7474 = vmatmul.mubr.f32.gmra.mrb[12].mxu0 %v10250_v3 }
  0x89   : > { %7476 = vmatprep.mubr.f32.mxu0 %v10253_v19  ;;  %8874 = vmatpush3.bf16.msra.mxu0 %v8871_v62  ;;  %v10320_v62 = vld [vmem:[%s9959_s14 + $0x158] sm:$0xff] }
  0x8a   : > { %8876 = vmatprep.subr.bf16.mxu0 %v8875_v20 }
  0x8c   : > { %7477 = vmatmul.mubr.f32.gmra.mrb[14].mxu0 %v10264_v24 }
  0x8d   : > { %7479 = vmatprep.mubr.f32.mxu0 %v10267_v25  ;;  %8878 = vmatpush3.bf16.msra.mxu0 %v8875_v20  ;;  %v772_v20 = vld [vmem:[%s9959_s14 + $0x2] sm:$0xff] }
  0x8e   : > { %8880 = vmatprep.subr.bf16.mxu0 %v8879_v26 }
  0x90   : > { %7480 = vmatmul.mubr.f32.gmra.mrb[16].mxu0 %v10272_v29 }
  0x91   : > { %7482 = vmatprep.mubr.f32.mxu0 %v10275_v30 }
  0x94   : > { %7483 = vmatmul.mubr.f32.gmra.mrb[18].mxu0 %v10280_v32 }
  0x95   : > { %7485 = vmatprep.mubr.f32.mxu0 %v10283_v37 }
  0x98   : > { %7486 = vmatmul.mubr.f32.gmra.mrb[20].mxu0 %v10288_v38 }
  0x99   : > { %7488 = vmatprep.mubr.f32.mxu0 %v10291_v39 }
  0x9c   : > { %7489 = vmatmul.mubr.f32.gmra.mrb[22].mxu0 %v10296_v44 }
  0x9d   : > { %7491 = vmatprep.mubr.f32.mxu0 %v10299_v47 }
  0xa0   : > { %7492 = vmatmul.mubr.f32.gmra.mrb[24].mxu0 %v10304_v48 }
  0xa1   : > { %7494 = vmatprep.mubr.f32.mxu0 %v10307_v53 }
  0xa4   : > { %7495 = vmatmul.mubr.f32.gmra.mrb[26].mxu0 %v10312_v54 }
  0xa5   : > { %7497 = vmatprep.mubr.f32.mxu0 %v10315_v57 }
  0xa8   : > { %7498 = vmatmul.mubr.f32.gmra.mrb[28].mxu0 %v10320_v62 }
  0xa9   : > { %7500 = vmatprep.mubr.f32.mxu0 %v10323_v63 }
  0xac   : > { %7501 = vmatmul.mubr.f32.gmra.mrb[30].mxu0 %v10328_v0 }
  0xad   : > { %7535 = vmatprep.mubr.f32.mxu0 %v772_v20  ;;  %v10353_v20 = vld [vmem:[%s9959_s14 + $0x32] sm:$0xff] }
  0xae   : > { %12096 = vst [vmem:[#allocation12_spill] sm:$0xff] %v10353_v20 }
  0xb0   : > { %7536 = vmatmul.mubr.f32.vlgmr.msra.gmra.mrb[0].mxu0 %v773_v18  ;;  %v10364_v18 = vld [vmem:[%s9959_s14 + $0x3a] sm:$0xff] }
  0xb1   : > { %8882 = vmatpush3.bf16.msra.mxu0 %v8879_v26  ;;  %7538 = vmatprep.mubr.f32.mxu0 %v10340_v17  ;;  %12097 = vst [vmem:[#allocation13_spill] sm:$0xff] %v10364_v18  ;;  %v10367_v26 = vld [vmem:[%s9959_s14 + $0x4a] sm:$0xff] }
  0xb2   : > { %8884 = vmatprep.subr.bf16.mxu0 %v8883_v16  ;;  %12098 = vst [vmem:[#allocation14_spill] sm:$0xff] %v10367_v26  ;;  %v6067_v17 = vld [vmem:[%s12014_s1 + $0x1c8] sm:$0xff] }
  0xb3   : > { %v8895_v12 = vpack.c.bf16 %v6067_v17, %v6066_v15  ;;  %v6070_v15 = vld [vmem:[%s12014_s1 + $0x1e0] sm:$0xff] }
  0xb4   : > { %7539 = vmatmul.mubr.f32.gmra.mrb[2].mxu0 %v10350_v13  ;;  %v6069_v13 = vld [vmem:[%s12014_s1 + $0x1d8] sm:$0xff] }
  0xb5   : > { %7541 = vmatprep.mubr.f32.mxu0 %v10353_v20  ;;  %8886 = vmatpush3.bf16.msra.mxu0 %v8883_v16  ;;  %v10378_v20 = vld [vmem:[%s9959_s14 + $0x52] sm:$0xff]  ;;  %v10381_v16 = vld [vmem:[%s9959_s14 + $0x62] sm:$0xff]  ;;  %v8899_v17 = vpack.c.bf16 %v6069_v13, %v6068_v22 }
  0xb6   : > { %8888 = vmatprep.subr.bf16.mxu0 %v8887_v21  ;;  %12099 = vst [vmem:[#allocation15_spill] sm:$0xff] %v10378_v20  ;;  %12100 = vst [vmem:[#allocation16_spill] sm:$0xff] %v10381_v16  ;;  %v6072_v22 = vld [vmem:[%s12014_s1 + $0x1f0] sm:$0xff] }
  0xb8   : > { %7542 = vmatmul.mubr.f32.gmra.mrb[4].mxu0 %v10364_v18  ;;  %v6071_v18 = vld [vmem:[%s12014_s1 + $0x1e8] sm:$0xff] }
  0xb9   : > { %7544 = vmatprep.mubr.f32.mxu0 %v10367_v26  ;;  %8890 = vmatpush3.bf16.msra.mxu0 %v8887_v21  ;;  %v10392_v26 = vld [vmem:[%s9959_s14 + $0x6a] sm:$0xff]  ;;  %v10395_v21 = vld [vmem:[%s9959_s14 + $0x7a] sm:$0xff]  ;;  %v8903_v13 = vpack.c.bf16 %v6071_v18, %v6070_v15 }
  0xba   : > { %8892 = vmatprep.subr.bf16.mxu0 %v8891_v14  ;;  %12101 = vst [vmem:[#allocation17_spill] sm:$0xff] %v10392_v26  ;;  %12102 = vst [vmem:[#allocation18_spill] sm:$0xff] %v10395_v21  ;;  %v6106_v15 = vld [vmem:[%s12014_s1 + $0x200] sm:$0xff] }
  0xbc   : > { %7545 = vmatmul.mubr.f32.gmra.mrb[6].mxu0 %v10378_v20  ;;  %v6073_v20 = vld [vmem:[%s12014_s1 + $0x1f8] sm:$0xff] }
  0xbd   : > { %7547 = vmatprep.mubr.f32.mxu0 %v10381_v16  ;;  %8894 = vmatpush3.bf16.msra.mxu0 %v8891_v14  ;;  %v10406_v16 = vld [vmem:[%s9959_s14 + $0x82] sm:$0xff]  ;;  %v10409_v14 = vld [vmem:[%s9959_s14 + $0x92] sm:$0xff]  ;;  %v8907_v18 = vpack.c.bf16 %v6073_v20, %v6072_v22  ;;  %v10442_v22 = vld [vmem:[%s9959_s14 + $0xca] sm:$0xff] }
  0xbe   : > { %8896 = vmatprep.subr.bf16.mxu0 %v8895_v12  ;;  %12103 = vst [vmem:[#allocation19_spill] sm:$0xff] %v10409_v14  ;;  %12106 = vst [vmem:[#allocation22_spill] sm:$0xff] %v10442_v22 }
  0xc0   : > { %7548 = vmatmul.mubr.f32.gmra.mrb[8].mxu0 %v10392_v26  ;;  %v6107_v26 = vld [vmem:[%s12014_s1 + $0x208] sm:$0xff] }
  0xc1   : > { %7550 = vmatprep.mubr.f32.mxu0 %v10395_v21  ;;  %8898 = vmatpush3.bf16.msra.mxu0 %v8895_v12  ;;  %v10420_v21 = vld [vmem:[%s9959_s14 + $0x9a] sm:$0xff]  ;;  %v10423_v12 = vld [vmem:[%s9959_s14 + $0xaa] sm:$0xff]  ;;  %v8911_v20 = vpack.c.bf16 %v6107_v26, %v6106_v15  ;;  %v10453_v26 = vld [vmem:[%s9959_s14 + $0xf2] sm:$0xff] }
  0xc2   : > { %8900 = vmatprep.subr.bf16.mxu0 %v8899_v17  ;;  %12104 = vst [vmem:[#allocation20_spill] sm:$0xff] %v10420_v21  ;;  %12109 = vst [vmem:[#allocation25_spill] sm:$0xff] %v10453_v26  ;;  %v10461_v15 = vld [vmem:[%s9959_s14 + $0x10a] sm:$0xff] }
  0xc3   : > { %12111 = vst [vmem:[#allocation27_spill] sm:$0xff] %v10461_v15 }
  0xc4   : > { %7551 = vmatmul.mubr.f32.gmra.mrb[10].mxu0 %v10406_v16 }
  0xc5   : > { %7553 = vmatprep.mubr.f32.mxu0 %v10409_v14  ;;  %8902 = vmatpush3.bf16.msra.mxu0 %v8899_v17  ;;  %v10434_v17 = vld [vmem:[%s9959_s14 + $0xb2] sm:$0xff]  ;;  %v10437_v14 = vld [vmem:[%s9959_s14 + $0xc2] sm:$0xff] }
  0xc6   : > { %8904 = vmatprep.subr.bf16.mxu0 %v8903_v13  ;;  %12105 = vst [vmem:[#allocation21_spill] sm:$0xff] %v10437_v14 }
  0xc8   : > { %7554 = vmatmul.mubr.f32.gmra.mrb[12].mxu0 %v10420_v21  ;;  %v10445_v21 = vld [vmem:[%s9959_s14 + $0xda] sm:$0xff] }
  0xc9   : > { %7556 = vmatprep.mubr.f32.mxu0 %v10423_v12  ;;  %8906 = vmatpush3.bf16.msra.mxu0 %v8903_v13  ;;  %12107 = vst [vmem:[#allocation23_spill] sm:$0xff] %v10445_v21  ;;  %v10450_v13 = vld [vmem:[%s9959_s14 + $0xe2] sm:$0xff] }
  0xca   : > { %8908 = vmatprep.subr.bf16.mxu0 %v8907_v18  ;;  %12108 = vst [vmem:[#allocation24_spill] sm:$0xff] %v10450_v13 }
  0xcc   : > { %7557 = vmatmul.mubr.f32.gmra.mrb[14].mxu0 %v10434_v17 }
  0xcd   : > { %7559 = vmatprep.mubr.f32.mxu0 %v10437_v14  ;;  %8910 = vmatpush3.bf16.msra.mxu0 %v8907_v18  ;;  %v10458_v18 = vld [vmem:[%s9959_s14 + $0xfa] sm:$0xff] }
  0xce   : > { %8912 = vmatprep.subr.bf16.mxu0 %v8911_v20  ;;  %12110 = vst [vmem:[#allocation26_spill] sm:$0xff] %v10458_v18  ;;  %v10490_v14 = vld [vmem:[%s9959_s14 + $0x15a] sm:$0xff] }
  0xcf   : > { %12118 = vst [vmem:[#allocation34_spill] sm:$0xff] %v10490_v14 }
  0xd0   : > { %7560 = vmatmul.mubr.f32.gmra.mrb[16].mxu0 %v10442_v22  ;;  %v10469_v22 = vld [vmem:[%s9959_s14 + $0x122] sm:$0xff] }
  0xd1   : > { %7562 = vmatprep.mubr.f32.mxu0 %v10445_v21  ;;  %v10466_v21 = vld [vmem:[%s9959_s14 + $0x112] sm:$0xff]  ;;  %12113 = vst [vmem:[#allocation29_spill] sm:$0xff] %v10469_v22 }
  0xd2   : > { %12112 = vst [vmem:[#allocation28_spill] sm:$0xff] %v10466_v21 }
  0xd4   : > { %7563 = vmatmul.mubr.f32.gmra.mrb[18].mxu0 %v10450_v13  ;;  %v10477_v13 = vld [vmem:[%s9959_s14 + $0x13a] sm:$0xff] }
  0xd5   : > { %7565 = vmatprep.mubr.f32.mxu0 %v10453_v26  ;;  %v10474_v26 = vld [vmem:[%s9959_s14 + $0x12a] sm:$0xff]  ;;  %12115 = vst [vmem:[#allocation31_spill] sm:$0xff] %v10477_v13 }
  0xd6   : > { %12114 = vst [vmem:[#allocation30_spill] sm:$0xff] %v10474_v26 }
  0xd8   : > { %7566 = vmatmul.mubr.f32.gmra.mrb[20].mxu0 %v10458_v18  ;;  %v10482_v18 = vld [vmem:[%s9959_s14 + $0x142] sm:$0xff] }
  0xd9   : > { %7568 = vmatprep.mubr.f32.mxu0 %v10461_v15  ;;  %12116 = vst [vmem:[#allocation32_spill] sm:$0xff] %v10482_v18  ;;  %v10485_v15 = vld [vmem:[%s9959_s14 + $0x152] sm:$0xff] }
  0xda   : > { %12117 = vst [vmem:[#allocation33_spill] sm:$0xff] %v10485_v15 }
  0xdc   : > { %7569 = vmatmul.mubr.f32.gmra.mrb[22].mxu0 %v10466_v21  ;;  %v10493_v21 = vld [vmem:[%s9959_s14 + $0x16a] sm:$0xff] }
  0xdd   : > { %7571 = vmatprep.mubr.f32.mxu0 %v10469_v22  ;;  %12119 = vst [vmem:[#allocation35_spill] sm:$0xff] %v10493_v21  ;;  %v10498_v22 = vld [vmem:[%s9959_s14 + $0x172] sm:$0xff] }
  0xe0   : > { %7572 = vmatmul.mubr.f32.gmra.mrb[24].mxu0 %v10474_v26 }
  0xe1   : > { %7574 = vmatprep.mubr.f32.mxu0 %v10477_v13  ;;  %v6108_v13 = vld [vmem:[%s12014_s1 + $0x210] sm:$0xff] }
  0xe4   : > { %7575 = vmatmul.mubr.f32.gmra.mrb[26].mxu0 %v10482_v18  ;;  %v6109_v18 = vld [vmem:[%s12014_s1 + $0x218] sm:$0xff] }
  0xe5   : > { %7577 = vmatprep.mubr.f32.mxu0 %v10485_v15  ;;  %v8915_v15 = vpack.c.bf16 %v6109_v18, %v6108_v13  ;;  %v6113_v13 = vld [vmem:[%s12014_s1 + $0x238] sm:$0xff]  ;;  %v6116_v18 = vld [vmem:[%s12014_s1 + $0x250] sm:$0xff] }
  0xe8   : > { %7578 = vmatmul.mubr.f32.gmra.mrb[28].mxu0 %v10490_v14  ;;  %v6110_v14 = vld [vmem:[%s12014_s1 + $0x220] sm:$0xff] }
  0xe9   : > { %7580 = vmatprep.mubr.f32.mxu0 %v10493_v21  ;;  %v6111_v21 = vld [vmem:[%s12014_s1 + $0x228] sm:$0xff] }
  0xea   : > { %v8919_v26 = vpack.c.bf16 %v6111_v21, %v6110_v14  ;;  %v6115_v21 = vld [vmem:[%s12014_s1 + $0x248] sm:$0xff] }
  0xec   : > { %7581 = vmatmul.mubr.f32.gmra.mrb[30].mxu0 %v10498_v22 }
  0xed   : > { %7615 = vmatprep.mubr.f32.mxu0 %v10170_v23  ;;  %v6112_v23 = vld [vmem:[%s12014_s1 + $0x230] sm:$0xff] }
  0xf0   : > { %7616 = vmatmul.mubr.f32.vlgmr.msra.gmra.mrb[0].mxu0 %v10180_v27  ;;  %v8923_v27 = vpack.c.bf16 %v6113_v13, %v6112_v23  ;;  %v6119_v13 = vld [vmem:[%s12014_s1 + $0x268] sm:$0xff] }
  0xf1   : > { %8914 = vmatpush3.bf16.msra.mxu0 %v8911_v20  ;;  %7618 = vmatprep.mubr.f32.mxu0 %v10183_v28  ;;  %v6114_v20 = vld [vmem:[%s12014_s1 + $0x240] sm:$0xff] }
  0xf2   : > { %8916 = vmatprep.subr.bf16.mxu0 %v8915_v15  ;;  %v8927_v14 = vpack.c.bf16 %v6115_v21, %v6114_v20  ;;  %v6121_v21 = vld [vmem:[%s12014_s1 + $0x278] sm:$0xff] }
  0xf4   : > { %7619 = vmatmul.mubr.f32.gmra.mrb[2].mxu0 %v10194_v33 }
  0xf5   : > { %7621 = vmatprep.mubr.f32.mxu0 %v10197_v34  ;;  %8918 = vmatpush3.bf16.msra.mxu0 %v8915_v15  ;;  %v6117_v15 = vld [vmem:[%s12014_s1 + $0x258] sm:$0xff] }
  0xf6   : > { %8920 = vmatprep.subr.bf16.mxu0 %v8919_v26  ;;  %v8931_v23 = vpack.c.bf16 %v6117_v15, %v6116_v18  ;;  %v6155_v15 = vld [vmem:[%s12014_s1 + $0x288] sm:$0xff] }
  0xf8   : > { %7622 = vmatmul.mubr.f32.gmra.mrb[4].mxu0 %v10208_v42 }
  0xf9   : > { %7624 = vmatprep.mubr.f32.mxu0 %v10211_v43  ;;  %8922 = vmatpush3.bf16.msra.mxu0 %v8919_v26  ;;  %v6118_v26 = vld [vmem:[%s12014_s1 + $0x260] sm:$0xff] }
  0xfa   : > { %8924 = vmatprep.subr.bf16.mxu0 %v8923_v27  ;;  %v8935_v20 = vpack.c.bf16 %v6119_v13, %v6118_v26  ;;  %v10584_v13 = vld [vmem:[%s9959_s14 + $0x188] sm:$0xff] }
  0xfc   : > { %7625 = vmatmul.mubr.f32.gmra.mrb[6].mxu0 %v10222_v49 }
  0xfd   : > { %7627 = vmatprep.mubr.f32.mxu0 %v10225_v52  ;;  %8926 = vmatpush3.bf16.msra.mxu0 %v8923_v27  ;;  %v6120_v27 = vld [vmem:[%s12014_s1 + $0x270] sm:$0xff] }
  0xfe   : > { %8928 = vmatprep.subr.bf16.mxu0 %v8927_v14  ;;  %v8939_v18 = vpack.c.bf16 %v6121_v21, %v6120_v27  ;;  %v6157_v27 = vld [vmem:[%s12014_s1 + $0x298] sm:$0xff] }
 0x100   : > { %7628 = vmatmul.mubr.f32.gmra.mrb[8].mxu0 %v10236_v58 }
 0x101   : > { %7630 = vmatprep.mubr.f32.mxu0 %v10239_v59  ;;  %8930 = vmatpush3.bf16.msra.mxu0 %v8927_v14  ;;  %v6154_v14 = vld [vmem:[%s12014_s1 + $0x280] sm:$0xff] }
 0x102   : > { %8932 = vmatprep.subr.bf16.mxu0 %v8931_v23  ;;  %v8943_v26 = vpack.c.bf16 %v6155_v15, %v6154_v14  ;;  %v6159_v14 = vld [vmem:[%s12014_s1 + $0x2a8] sm:$0xff] }
 0x104   : > { %7631 = vmatmul.mubr.f32.gmra.mrb[10].mxu0 %v10250_v3 }
 0x105   : > { %7633 = vmatprep.mubr.f32.mxu0 %v10253_v19  ;;  %8934 = vmatpush3.bf16.msra.mxu0 %v8931_v23  ;;  %v10579_v23 = vld [vmem:[%s9959_s14 + $0x180] sm:$0xff] }
 0x106   : > { %8936 = vmatprep.subr.bf16.mxu0 %v8935_v20 }
 0x108   : > { %7634 = vmatmul.mubr.f32.gmra.mrb[12].mxu0 %v10264_v24 }
 0x109   : > { %7636 = vmatprep.mubr.f32.mxu0 %v10267_v25  ;;  %8938 = vmatpush3.bf16.msra.mxu0 %v8935_v20  ;;  %v6156_v20 = vld [vmem:[%s12014_s1 + $0x290] sm:$0xff] }
 0x10a   : > { %8940 = vmatprep.subr.bf16.mxu0 %v8939_v18  ;;  %v8947_v21 = vpack.c.bf16 %v6157_v27, %v6156_v20  ;;  %v6161_v20 = vld [vmem:[%s12014_s1 + $0x2b8] sm:$0xff] }
 0x10b   : > { %v6165_v27 = vld [vmem:[%s12014_s1 + $0x2d8] sm:$0xff] }
 0x10c   : > { %7637 = vmatmul.mubr.f32.gmra.mrb[14].mxu0 %v10272_v29 }
 0x10d   : > { %7639 = vmatprep.mubr.f32.mxu0 %v10275_v30  ;;  %8942 = vmatpush3.bf16.msra.mxu0 %v8939_v18  ;;  %v6158_v18 = vld [vmem:[%s12014_s1 + $0x2a0] sm:$0xff] }
 0x10e   : > { %8944 = vmatprep.subr.bf16.mxu0 %v8943_v26  ;;  %v8951_v15 = vpack.c.bf16 %v6159_v14, %v6158_v18  ;;  %v6169_v18 = vld [vmem:[%s12014_s1 + $0x2f8] sm:$0xff]  ;;  %v6203_v14 = vld [vmem:[%s12014_s1 + $0x308] sm:$0xff] }
 0x110   : > { %7640 = vmatmul.mubr.f32.gmra.mrb[16].mxu0 %v10280_v32 }
 0x111   : > { %7642 = vmatprep.mubr.f32.mxu0 %v10283_v37 }
 0x114   : > { %7643 = vmatmul.mubr.f32.gmra.mrb[18].mxu0 %v10288_v38 }
 0x115   : > { %7645 = vmatprep.mubr.f32.mxu0 %v10291_v39 }
 0x118   : > { %7646 = vmatmul.mubr.f32.gmra.mrb[20].mxu0 %v10296_v44 }
 0x119   : > { %7648 = vmatprep.mubr.f32.mxu0 %v10299_v47 }
 0x11c   : > { %7649 = vmatmul.mubr.f32.gmra.mrb[22].mxu0 %v10304_v48 }
 0x11d   : > { %7651 = vmatprep.mubr.f32.mxu0 %v10307_v53 }
 0x120   : > { %7652 = vmatmul.mubr.f32.gmra.mrb[24].mxu0 %v10312_v54 }
 0x121   : > { %7654 = vmatprep.mubr.f32.mxu0 %v10315_v57 }
 0x124   : > { %7655 = vmatmul.mubr.f32.gmra.mrb[26].mxu0 %v10320_v62 }
 0x125   : > { %7657 = vmatprep.mubr.f32.mxu0 %v10323_v63 }
 0x128   : > { %7658 = vmatmul.mubr.f32.gmra.mrb[28].mxu0 %v10328_v0 }
 0x129   : > { %7660 = vmatprep.mubr.f32.mxu0 %v10579_v23 }
 0x12c   : > { %7661 = vmatmul.mubr.f32.gmra.mrb[30].mxu0 %v10584_v13 }
 0x12d   : > { %7695 = vmatprep.mubr.f32.mxu0 %v10000_v31  ;;  %v6160_v31 = vld [vmem:[%s12014_s1 + $0x2b0] sm:$0xff] }
 0x130   : > { %7696 = vmatmul.mubr.f32.vlgmr.msra.gmra.mrb[0].mxu0 %v10010_v35  ;;  %v8955_v35 = vpack.c.bf16 %v6161_v20, %v6160_v31  ;;  %v6206_v20 = vld [vmem:[%s12014_s1 + $0x320] sm:$0xff] }
 0x131   : > { %8946 = vmatpush3.bf16.msra.mxu0 %v8943_v26  ;;  %7698 = vmatprep.mubr.f32.mxu0 %v10013_v36  ;;  %v6162_v36 = vld [vmem:[%s12014_s1 + $0x2c0] sm:$0xff]  ;;  %v6163_v26 = vld [vmem:[%s12014_s1 + $0x2c8] sm:$0xff] }
 0x132   : > { %8948 = vmatprep.subr.bf16.mxu0 %v8947_v21 }
 0x134   : > { %7699 = vmatmul.mubr.f32.gmra.mrb[2].mxu0 %v10024_v40  ;;  %v8959_v40 = vpack.c.bf16 %v6163_v26, %v6162_v36  ;;  %v12128_v36 = vld [vmem:[#allocation11_spill] sm:$0xff]  ;;  %v12129_v26 = vld [vmem:[#allocation12_spill] sm:$0xff] }
 0x135   : > { %7701 = vmatprep.mubr.f32.mxu0 %v10027_v41  ;;  %8950 = vmatpush3.bf16.msra.mxu0 %v8947_v21  ;;  %v6164_v41 = vld [vmem:[%s12014_s1 + $0x2d0] sm:$0xff]  ;;  %v6167_v21 = vld [vmem:[%s12014_s1 + $0x2e8] sm:$0xff] }
 0x136   : > { %8952 = vmatprep.subr.bf16.mxu0 %v8951_v15 }
 0x138   : > { %7702 = vmatmul.mubr.f32.gmra.mrb[4].mxu0 %v10038_v45  ;;  %v8963_v45 = vpack.c.bf16 %v6165_v27, %v6164_v41  ;;  %v6208_v41 = vld [vmem:[%s12014_s1 + $0x330] sm:$0xff]  ;;  %v6209_v27 = vld [vmem:[%s12014_s1 + $0x338] sm:$0xff] }
 0x139   : > { %7704 = vmatprep.mubr.f32.mxu0 %v10041_v46  ;;  %8954 = vmatpush3.bf16.msra.mxu0 %v8951_v15  ;;  %v6166_v46 = vld [vmem:[%s12014_s1 + $0x2e0] sm:$0xff]  ;;  %v12127_v15 = vld [vmem:[#allocation10_spill] sm:$0xff] }
 0x13a   : > { %8956 = vmatprep.subr.bf16.mxu0 %v8955_v35 }
 0x13c   : > { %7705 = vmatmul.mubr.f32.gmra.mrb[6].mxu0 %v10052_v50  ;;  %v8967_v50 = vpack.c.bf16 %v6167_v21, %v6166_v46  ;;  %v12131_v46 = vld [vmem:[#allocation14_spill] sm:$0xff]  ;;  %v8987_v21 = vpack.c.bf16 %v6209_v27, %v6208_v41  ;;  %v12142_v41 = vld [vmem:[#allocation25_spill] sm:$0xff] }
 0x13d   : > { %7707 = vmatprep.mubr.f32.mxu0 %v10055_v51  ;;  %8958 = vmatpush3.bf16.msra.mxu0 %v8955_v35  ;;  %v6168_v51 = vld [vmem:[%s12014_s1 + $0x2f0] sm:$0xff]  ;;  %v6207_v35 = vld [vmem:[%s12014_s1 + $0x328] sm:$0xff] }
 0x13e   : > { %8960 = vmatprep.subr.bf16.mxu0 %v8959_v40  ;;  %v12143_v27 = vld [vmem:[#allocation26_spill] sm:$0xff] }
 0x140   : > { %7708 = vmatmul.mubr.f32.gmra.mrb[8].mxu0 %v10066_v55  ;;  %v8971_v55 = vpack.c.bf16 %v6169_v18, %v6168_v51  ;;  %v6211_v51 = vld [vmem:[%s12014_s1 + $0x348] sm:$0xff]  ;;  %v12132_v18 = vld [vmem:[#allocation15_spill] sm:$0xff] }
 0x141   : > { %7710 = vmatprep.mubr.f32.mxu0 %v10069_v56  ;;  %8962 = vmatpush3.bf16.msra.mxu0 %v8959_v40  ;;  %v6202_v56 = vld [vmem:[%s12014_s1 + $0x300] sm:$0xff]  ;;  %v8983_v40 = vpack.c.bf16 %v6207_v35, %v6206_v20  ;;  %v6251_v20 = vld [vmem:[%s12014_s1 + $0x388] sm:$0xff] }
 0x142   : > { %8964 = vmatprep.subr.bf16.mxu0 %v8963_v45  ;;  %v12138_v35 = vld [vmem:[#allocation21_spill] sm:$0xff] }
 0x144   : > { %7711 = vmatmul.mubr.f32.gmra.mrb[10].mxu0 %v10080_v60  ;;  %v8975_v60 = vpack.c.bf16 %v6203_v14, %v6202_v56  ;;  %v6212_v14 = vld [vmem:[%s12014_s1 + $0x350] sm:$0xff] }
 0x145   : > { %7713 = vmatprep.mubr.f32.mxu0 %v10083_v61  ;;  %8966 = vmatpush3.bf16.msra.mxu0 %v8963_v45  ;;  %v12120_v61 = vld [vmem:[#allocation3_spill] sm:$0xff]  ;;  %v12130_v45 = vld [vmem:[#allocation13_spill] sm:$0xff] }
 0x146   : > { %8968 = vmatprep.subr.bf16.mxu0 %v8967_v50 }
 0x148   : > { %7714 = vmatmul.mubr.f32.gmra.mrb[12].mxu0 %v10094_v1  ;;  %v12121_v1 = vld [vmem:[#allocation4_spill] sm:$0xff] }
 0x149   : > { %7716 = vmatprep.mubr.f32.mxu0 %v10097_v2  ;;  %8970 = vmatpush3.bf16.msra.mxu0 %v8967_v50  ;;  %v12122_v2 = vld [vmem:[#allocation5_spill] sm:$0xff] }
 0x14a   : > { %8972 = vmatprep.subr.bf16.mxu0 %v8971_v55  ;;  %v6210_v50 = vld [vmem:[%s12014_s1 + $0x340] sm:$0xff] }
 0x14b   : > { %v8991_v56 = vpack.c.bf16 %v6211_v51, %v6210_v50  ;;  %v12148_v50 = vld [vmem:[#allocation31_spill] sm:$0xff]  ;;  %v12149_v51 = vld [vmem:[#allocation32_spill] sm:$0xff] }
 0x14c   : > { %7717 = vmatmul.mubr.f32.gmra.mrb[14].mxu0 %v10102_v4  ;;  %v12123_v4 = vld [vmem:[#allocation6_spill] sm:$0xff] }
 0x14d   : > { %7719 = vmatprep.mubr.f32.mxu0 %v10105_v5  ;;  %8974 = vmatpush3.bf16.msra.mxu0 %v8971_v55  ;;  %v12124_v5 = vld [vmem:[#allocation7_spill] sm:$0xff]  ;;  %v12133_v55 = vld [vmem:[#allocation16_spill] sm:$0xff] }
 0x14e   : > { %8976 = vmatprep.subr.bf16.mxu0 %v8975_v60 }
 0x150   : > { %7720 = vmatmul.mubr.f32.gmra.mrb[16].mxu0 %v10110_v6  ;;  %v12125_v6 = vld [vmem:[#allocation8_spill] sm:$0xff] }
 0x151   : > { %7722 = vmatprep.mubr.f32.mxu0 %v10113_v7  ;;  %v10665_v7 = vld [vmem:[%s9959_s14 + $0x181] sm:$0xff] }
 0x154   : > { %7723 = vmatmul.mubr.f32.gmra.mrb[18].mxu0 %v10118_v8  ;;  %v12126_v8 = vld [vmem:[#allocation9_spill] sm:$0xff] }
 0x155   : > { %7725 = vmatprep.mubr.f32.mxu0 %v10121_v9  ;;  %v10670_v9 = vld [vmem:[%s9959_s14 + $0x189] sm:$0xff] }
 0x158   : > { %7726 = vmatmul.mubr.f32.gmra.mrb[20].mxu0 %v10126_v10  ;;  %v6204_v10 = vld [vmem:[%s12014_s1 + $0x310] sm:$0xff] }
 0x159   : > { %7728 = vmatprep.mubr.f32.mxu0 %v10129_v11  ;;  %v6205_v11 = vld [vmem:[%s12014_s1 + $0x318] sm:$0xff] }
 0x15a   : > { %v8979_v31 = vpack.c.bf16 %v6205_v11, %v6204_v10  ;;  %v6216_v10 = vld [vmem:[%s12014_s1 + $0x370] sm:$0xff]  ;;  %v6217_v11 = vld [vmem:[%s12014_s1 + $0x378] sm:$0xff] }
 0x15c   : > { %7729 = vmatmul.mubr.f32.gmra.mrb[22].mxu0 %v12120_v61  ;;  %v12134_v61 = vld [vmem:[#allocation17_spill] sm:$0xff] }
 0x15d   : > { %7731 = vmatprep.mubr.f32.mxu0 %v12121_v1  ;;  %v12135_v1 = vld [vmem:[#allocation18_spill] sm:$0xff] }
 0x160   : > { %7732 = vmatmul.mubr.f32.gmra.mrb[24].mxu0 %v12122_v2 }
 0x161   : > { %7734 = vmatprep.mubr.f32.mxu0 %v12123_v4  ;;  %v6214_v4 = vld [vmem:[%s12014_s1 + $0x360] sm:$0xff] }
 0x164   : > { %7735 = vmatmul.mubr.f32.gmra.mrb[26].mxu0 %v12124_v5  ;;  %v6215_v5 = vld [vmem:[%s12014_s1 + $0x368] sm:$0xff] }
 0x165   : > { %7737 = vmatprep.mubr.f32.mxu0 %v12125_v6  ;;  %v12136_v6 = vld [vmem:[#allocation19_spill] sm:$0xff] }
 0x168   : > { %7738 = vmatmul.mubr.f32.gmra.mrb[28].mxu0 %v12126_v8  ;;  %v8999_v8 = vpack.c.bf16 %v6215_v5, %v6214_v4  ;;  %v6255_v4 = vld [vmem:[%s12014_s1 + $0x3a8] sm:$0xff] }
 0x169   : > { %7740 = vmatprep.mubr.f32.mxu0 %v10665_v7 }
 0x16c   : > { %7741 = vmatmul.mubr.f32.gmra.mrb[30].mxu0 %v10670_v9 }
 0x16d   : > { %7775 = vmatprep.mubr.f32.mxu0 %v12127_v15  ;;  %v12137_v15 = vld [vmem:[#allocation20_spill] sm:$0xff] }
 0x170   : > { %7776 = vmatmul.mubr.f32.vlgmr.msra.gmra.mrb[0].mxu0 %v12128_v36 }
 0x171   : > { %8978 = vmatpush3.bf16.msra.mxu0 %v8975_v60  ;;  %7778 = vmatprep.mubr.f32.mxu0 %v12129_v26  ;;  %v6213_v60 = vld [vmem:[%s12014_s1 + $0x358] sm:$0xff]  ;;  %v12139_v26 = vld [vmem:[#allocation22_spill] sm:$0xff] }
 0x172   : > { %8980 = vmatprep.subr.bf16.mxu0 %v8979_v31  ;;  %v8995_v2 = vpack.c.bf16 %v6213_v60, %v6212_v14  ;;  %v10751_v14 = vld [vmem:[%s9959_s14 + $0x182] sm:$0xff]  ;;  %v10756_v60 = vld [vmem:[%s9959_s14 + $0x18a] sm:$0xff] }
 0x174   : > { %7779 = vmatmul.mubr.f32.gmra.mrb[2].mxu0 %v12130_v45  ;;  %v12145_v45 = vld [vmem:[#allocation28_spill] sm:$0xff] }
 0x175   : > { %7781 = vmatprep.mubr.f32.mxu0 %v12131_v46  ;;  %8982 = vmatpush3.bf16.msra.mxu0 %v8979_v31  ;;  %v6250_v31 = vld [vmem:[%s12014_s1 + $0x380] sm:$0xff] }
 0x176   : > { %8984 = vmatprep.subr.bf16.mxu0 %v8983_v40  ;;  %v9007_v36 = vpack.c.bf16 %v6251_v20, %v6250_v31  ;;  %v12146_v46 = vld [vmem:[#allocation29_spill] sm:$0xff]  ;;  %v6221_v31 = vld [vmem:[%s9959_s14 + $0x51] sm:$0xff] }
 0x177   : > { %v6222_v20 = vld [vmem:[%s9959_s14 + $0x61] sm:$0xff] }
 0x178   : > { %7782 = vmatmul.mubr.f32.gmra.mrb[4].mxu0 %v12132_v18  ;;  %v12150_v18 = vld [vmem:[#allocation33_spill] sm:$0xff] }
 0x179   : > { %7784 = vmatprep.mubr.f32.mxu0 %v12133_v55  ;;  %8986 = vmatpush3.bf16.msra.mxu0 %v8983_v40  ;;  %v12141_v40 = vld [vmem:[#allocation24_spill] sm:$0xff]  ;;  %v12151_v55 = vld [vmem:[#allocation34_spill] sm:$0xff] }
 0x17a   : > { %8988 = vmatprep.subr.bf16.mxu0 %v8987_v21 }
 0x17c   : > { %7785 = vmatmul.mubr.f32.gmra.mrb[6].mxu0 %v12134_v61  ;;  %v6252_v61 = vld [vmem:[%s12014_s1 + $0x390] sm:$0xff] }
 0x17d   : > { %7787 = vmatprep.mubr.f32.mxu0 %v12135_v1  ;;  %8990 = vmatpush3.bf16.msra.mxu0 %v8987_v21  ;;  %v12147_v21 = vld [vmem:[#allocation30_spill] sm:$0xff]  ;;  %v6253_v1 = vld [vmem:[%s12014_s1 + $0x398] sm:$0xff] }
 0x17e   : > { %8992 = vmatprep.subr.bf16.mxu0 %v8991_v56 }
 0x180   : > { %7788 = vmatmul.mubr.f32.gmra.mrb[8].mxu0 %v10406_v16  ;;  %v9003_v16 = vpack.c.bf16 %v6217_v11, %v6216_v10  ;;  %v6261_v10 = vld [vmem:[%s12014_s1 + $0x3d8] sm:$0xff]  ;;  %v6263_v11 = vld [vmem:[%s12014_s1 + $0x3e8] sm:$0xff] }
 0x181   : > { %7790 = vmatprep.mubr.f32.mxu0 %v12136_v6  ;;  %8994 = vmatpush3.bf16.msra.mxu0 %v8991_v56  ;;  %v12152_v56 = vld [vmem:[#allocation35_spill] sm:$0xff]  ;;  %v6257_v6 = vld [vmem:[%s12014_s1 + $0x3b8] sm:$0xff] }
 0x182   : > { %8996 = vmatprep.subr.bf16.mxu0 %v8995_v2 }
 0x184   : > { %7791 = vmatmul.mubr.f32.gmra.mrb[10].mxu0 %v12137_v15  ;;  %v6265_v15 = vld [vmem:[%s12014_s1 + $0x3f8] sm:$0xff] }
 0x185   : > { %7793 = vmatprep.mubr.f32.mxu0 %v10423_v12  ;;  %8998 = vmatpush3.bf16.msra.mxu0 %v8995_v2  ;;  %v12140_v12 = vld [vmem:[#allocation23_spill] sm:$0xff]  ;;  %v9011_v2 = vpack.c.bf16 %v6253_v1, %v6252_v61 }
 0x186   : > { %9000 = vmatprep.subr.bf16.mxu0 %v8999_v8  ;;  %v6308_v1 = vld [vmem:[%s12014_s1 + $0x450] sm:$0xff] }
 0x188   : > { %7794 = vmatmul.mubr.f32.gmra.mrb[12].mxu0 %v10434_v17  ;;  %v12144_v17 = vld [vmem:[#allocation27_spill] sm:$0xff] }
 0x189   : > { %7796 = vmatprep.mubr.f32.mxu0 %v12138_v35  ;;  %9002 = vmatpush3.bf16.msra.mxu0 %v8999_v8  ;;  %v6259_v8 = vld [vmem:[%s12014_s1 + $0x3c8] sm:$0xff] }
 0x18a   : > { %9004 = vmatprep.subr.bf16.mxu0 %v9003_v16 }
 0x18c   : > { %7797 = vmatmul.mubr.f32.gmra.mrb[14].mxu0 %v12139_v26 }
 0x18d   : > { %7799 = vmatprep.mubr.f32.mxu0 %v12140_v12  ;;  %9006 = vmatpush3.bf16.msra.mxu0 %v9003_v16  ;;  %v6299_v16 = vld [vmem:[%s12014_s1 + $0x408] sm:$0xff]  ;;  %v6305_v12 = vld [vmem:[%s12014_s1 + $0x438] sm:$0xff] }
 0x18e   : > { %9008 = vmatprep.subr.bf16.mxu0 %v9007_v36 }
 0x190   : > { %7800 = vmatmul.mubr.f32.gmra.mrb[16].mxu0 %v12141_v40  ;;  %v6321_v40 = vld [vmem:[%s12016_s3 + $0xb0] sm:$0xff] }
 0x191   : > { %7802 = vmatprep.mubr.f32.mxu0 %v12142_v41  ;;  %v6322_v41 = vld [vmem:[%s12016_s3 + $0xb8] sm:$0xff] }
 0x194   : > { %7803 = vmatmul.mubr.f32.gmra.mrb[18].mxu0 %v12143_v27  ;;  %v6223_v27 = vld [vmem:[%s9959_s14 + $0x69] sm:$0xff] }
 0x195   : > { %7805 = vmatprep.mubr.f32.mxu0 %v12144_v17  ;;  %v6224_v17 = vld [vmem:[%s9959_s14 + $0x79] sm:$0xff] }
 0x198   : > { %7806 = vmatmul.mubr.f32.gmra.mrb[20].mxu0 %v12145_v45 }
 0x199   : > { %7808 = vmatprep.mubr.f32.mxu0 %v12146_v46  ;;  %v6306_v46 = vld [vmem:[%s12014_s1 + $0x440] sm:$0xff] }
 0x19c   : > { %7809 = vmatmul.mubr.f32.gmra.mrb[22].mxu0 %v12147_v21  ;;  %v9083_v21 = vpack.c.bf16 %v6322_v41, %v6321_v40  ;;  %v6281_v40 = vld [vmem:[%s9959_s14 + $0xe2] sm:$0xff]  ;;  %v6282_v41 = vld [vmem:[%s9959_s14 + $0xf2] sm:$0xff] }
 0x19d   : > { %7811 = vmatprep.mubr.f32.mxu0 %v12148_v50  ;;  %v6307_v50 = vld [vmem:[%s12014_s1 + $0x448] sm:$0xff] }
 0x19e   : > { %v9055_v61 = vpack.c.bf16 %v6307_v50, %v6306_v46  ;;  %v6286_v46 = vld [vmem:[%s9959_s14 + $0x122] sm:$0xff]  ;;  %v6288_v50 = vld [vmem:[%s9959_s14 + $0x13a] sm:$0xff] }
 0x1a0   : > { %7812 = vmatmul.mubr.f32.gmra.mrb[24].mxu0 %v12149_v51  ;;  %v6323_v51 = vld [vmem:[%s12016_s3 + $0xc0] sm:$0xff] }
 0x1a1   : > { %7814 = vmatprep.mubr.f32.mxu0 %v12150_v18  ;;  %v6324_v18 = vld [vmem:[%s12016_s3 + $0xc8] sm:$0xff] }
 0x1a4   : > { %7815 = vmatmul.mubr.f32.gmra.mrb[26].mxu0 %v12151_v55  ;;  %v6225_v55 = vld [vmem:[%s9959_s14 + $0x81] sm:$0xff] }
 0x1a5   : > { %7817 = vmatprep.mubr.f32.mxu0 %v12152_v56  ;;  %v6226_v56 = vld [vmem:[%s9959_s14 + $0x91] sm:$0xff] }
 0x1a8   : > { %7818 = vmatmul.mubr.f32.gmra.mrb[28].mxu0 %v10498_v22  ;;  %v6254_v22 = vld [vmem:[%s12014_s1 + $0x3a0] sm:$0xff] }
 0x1a9   : > { %7820 = vmatprep.mubr.f32.mxu0 %v10751_v14  ;;  %v9015_v5 = vpack.c.bf16 %v6255_v4, %v6254_v22  ;;  %v6309_v22 = vld [vmem:[%s12014_s1 + $0x458] sm:$0xff]  ;;  %v6325_v4 = vld [vmem:[%s12016_s3 + $0xd0] sm:$0xff] }
 0x1ac   : > { %7821 = vmatmul.mubr.f32.gmra.mrb[30].mxu0 %v10756_v60 }
 0x1ad   : > { %7855 = vmatprep.mubr.f32.mxu0 %v10183_v28  ;;  %v6256_v28 = vld [vmem:[%s12014_s1 + $0x3b0] sm:$0xff] }
 0x1b0   : > { %7856 = vmatmul.mubr.f32.vlgmr.msra.gmra.mrb[0].mxu0 %v10194_v33  ;;  %v9019_v33 = vpack.c.bf16 %v6257_v6, %v6256_v28  ;;  %v6227_v28 = vld [vmem:[%s9959_s14 + $0x99] sm:$0xff]  ;;  %v6228_v6 = vld [vmem:[%s9959_s14 + $0xa9] sm:$0xff] }
 0x1b1   : > { %9010 = vmatpush3.bf16.msra.mxu0 %v9007_v36  ;;  %7858 = vmatprep.mubr.f32.mxu0 %v10197_v34  ;;  %v6258_v34 = vld [vmem:[%s12014_s1 + $0x3c0] sm:$0xff]  ;;  %v6304_v36 = vld [vmem:[%s12014_s1 + $0x430] sm:$0xff] }
 0x1b2   : > { %9012 = vmatprep.subr.bf16.mxu0 %v9011_v2  ;;  %v9051_v45 = vpack.c.bf16 %v6305_v12, %v6304_v36  ;;  %v6278_v36 = vld [vmem:[%s9959_s14 + $0xc2] sm:$0xff]  ;;  %v6280_v12 = vld [vmem:[%s9959_s14 + $0xda] sm:$0xff] }
 0x1b4   : > { %7859 = vmatmul.mubr.f32.gmra.mrb[2].mxu0 %v10208_v42  ;;  %v9023_v42 = vpack.c.bf16 %v6259_v8, %v6258_v34  ;;  %v6310_v8 = vld [vmem:[%s12014_s1 + $0x460] sm:$0xff] }
 0x1b5   : > { %7861 = vmatprep.mubr.f32.mxu0 %v10211_v43  ;;  %9014 = vmatpush3.bf16.msra.mxu0 %v9011_v2  ;;  %v6260_v43 = vld [vmem:[%s12014_s1 + $0x3d0] sm:$0xff]  ;;  %v9087_v2 = vpack.c.bf16 %v6324_v18, %v6323_v51  ;;  %v6289_v51 = vld [vmem:[%s9959_s14 + $0x142] sm:$0xff] }
 0x1b6   : > { %9016 = vmatprep.subr.bf16.mxu0 %v9015_v5  ;;  %v6290_v18 = vld [vmem:[%s9959_s14 + $0x152] sm:$0xff] }
 0x1b8   : > { %7862 = vmatmul.mubr.f32.gmra.mrb[4].mxu0 %v10222_v49  ;;  %v9027_v49 = vpack.c.bf16 %v6261_v10, %v6260_v43  ;;  %v6229_v43 = vld [vmem:[%s9959_s14 + $0xb1] sm:$0xff]  ;;  %v6230_v10 = vld [vmem:[%s9959_s14 + $0xc1] sm:$0xff] }
 0x1b9   : > { %7864 = vmatprep.mubr.f32.mxu0 %v10225_v52  ;;  %9018 = vmatpush3.bf16.msra.mxu0 %v9015_v5  ;;  %v6262_v52 = vld [vmem:[%s12014_s1 + $0x3e0] sm:$0xff]  ;;  %v6326_v5 = vld [vmem:[%s12016_s3 + $0xd8] sm:$0xff] }
 0x1ba   : > { %9020 = vmatprep.subr.bf16.mxu0 %v9019_v33  ;;  %v9091_v34 = vpack.c.bf16 %v6326_v5, %v6325_v4  ;;  %v6328_v4 = vld [vmem:[%s12016_s3 + $0xe8] sm:$0xff] }
 0x1bc   : > { %7865 = vmatmul.mubr.f32.gmra.mrb[6].mxu0 %v10236_v58  ;;  %v9031_v58 = vpack.c.bf16 %v6263_v11, %v6262_v52  ;;  %v6312_v52 = vld [vmem:[%s12014_s1 + $0x470] sm:$0xff]  ;;  %v6313_v11 = vld [vmem:[%s12014_s1 + $0x478] sm:$0xff] }
 0x1bd   : > { %7867 = vmatprep.mubr.f32.mxu0 %v10239_v59  ;;  %9022 = vmatpush3.bf16.msra.mxu0 %v9019_v33  ;;  %v6264_v59 = vld [vmem:[%s12014_s1 + $0x3f0] sm:$0xff]  ;;  %v9059_v33 = vpack.c.bf16 %v6309_v22, %v6308_v1  ;;  %v6296_v1 = vld [vmem:[%s9959_s14 + $0x19a] sm:$0xff] }
 0x1be   : > { %9024 = vmatprep.subr.bf16.mxu0 %v9023_v42  ;;  %v6327_v22 = vld [vmem:[%s12016_s3 + $0xe0] sm:$0xff] }
 0x1bf   : > { %v9095_v5 = vpack.c.bf16 %v6328_v4, %v6327_v22 }
 0x1c0   : > { %7868 = vmatmul.mubr.f32.gmra.mrb[8].mxu0 %v10250_v3  ;;  %v9035_v3 = vpack.c.bf16 %v6265_v15, %v6264_v59  ;;  %v6232_v59 = vld [vmem:[%s9959_s14 + $0xd9] sm:$0xff]  ;;  %v9067_v15 = vpack.c.bf16 %v6313_v11, %v6312_v52 }
 0x1c1   : > { %7870 = vmatprep.mubr.f32.mxu0 %v10253_v19  ;;  %9026 = vmatpush3.bf16.msra.mxu0 %v9023_v42  ;;  %v6298_v19 = vld [vmem:[%s12014_s1 + $0x400] sm:$0xff]  ;;  %v6311_v42 = vld [vmem:[%s12014_s1 + $0x468] sm:$0xff] }
 0x1c2   : > { %9028 = vmatprep.subr.bf16.mxu0 %v9027_v49  ;;  %v3110_v11 = vld [vmem:[%s12016_s3 + $0x20] sm:$0xff] }
 0x1c4   : > { %7871 = vmatmul.mubr.f32.gmra.mrb[10].mxu0 %v10264_v24  ;;  %v9039_v24 = vpack.c.bf16 %v6299_v16, %v6298_v19  ;;  %v6234_v19 = vld [vmem:[%s9959_s14 + $0xf1] sm:$0xff]  ;;  %v6235_v16 = vld [vmem:[%s9959_s14 + $0xf9] sm:$0xff] }
 0x1c5   : > { %7873 = vmatprep.mubr.f32.mxu0 %v10267_v25  ;;  %9030 = vmatpush3.bf16.msra.mxu0 %v9027_v49  ;;  %v6200_v25 = vld [vmem:[%s9959_s14 + $0x198] sm:$0xff]  ;;  %v9063_v49 = vpack.c.bf16 %v6311_v42, %v6310_v8  ;;  %v3106_v8 = vld [vmem:[%s12016_s3] sm:$0xff]  ;;  %v3107_v42 = vld [vmem:[%s12016_s3 + $0x8] sm:$0xff] }
 0x1c6   : > { %9032 = vmatprep.subr.bf16.mxu0 %v9031_v58 }
 0x1c8   : > { %7874 = vmatmul.mubr.f32.gmra.mrb[12].mxu0 %v10272_v29  ;;  %v6201_v29 = vld [vmem:[%s9959_s14 + $0x1a0] sm:$0xff] }
 0x1c9   : > { %7876 = vmatprep.mubr.f32.mxu0 %v10275_v30  ;;  %9034 = vmatpush3.bf16.msra.mxu0 %v9031_v58  ;;  %v6218_v30 = vld [vmem:[%s9959_s14 + $0x31] sm:$0xff]  ;;  %v6231_v58 = vld [vmem:[%s9959_s14 + $0xc9] sm:$0xff] }
 0x1ca   : > { %9036 = vmatprep.subr.bf16.mxu0 %v9035_v3 }
 0x1cc   : > { %7877 = vmatmul.mubr.f32.gmra.mrb[14].mxu0 %v10280_v32  ;;  %v6300_v32 = vld [vmem:[%s12014_s1 + $0x410] sm:$0xff] }
 0x1cd   : > { %7879 = vmatprep.mubr.f32.mxu0 %v10283_v37  ;;  %9038 = vmatpush3.bf16.msra.mxu0 %v9035_v3  ;;  %v6301_v37 = vld [vmem:[%s12014_s1 + $0x418] sm:$0xff]  ;;  %v6233_v3 = vld [vmem:[%s9959_s14 + $0xe1] sm:$0xff] }
 0x1ce   : > { %9040 = vmatprep.subr.bf16.mxu0 %v9039_v24 }
 0x1d0   : > { %7880 = vmatmul.mubr.f32.gmra.mrb[16].mxu0 %v10288_v38  ;;  %v6315_v38 = vld [vmem:[%s12016_s3 + $0x80] sm:$0xff] }
 0x1d1   : > { %7882 = vmatprep.mubr.f32.mxu0 %v10291_v39  ;;  %v6316_v39 = vld [vmem:[%s12016_s3 + $0x88] sm:$0xff] }
 0x1d4   : > { %7883 = vmatmul.mubr.f32.gmra.mrb[18].mxu0 %v10296_v44  ;;  %v6317_v44 = vld [vmem:[%s12016_s3 + $0x90] sm:$0xff] }
 0x1d5   : > { %7885 = vmatprep.mubr.f32.mxu0 %v10299_v47  ;;  %v6219_v47 = vld [vmem:[%s9959_s14 + $0x39] sm:$0xff] }
 0x1d8   : > { %7886 = vmatmul.mubr.f32.gmra.mrb[20].mxu0 %v10304_v48  ;;  %v9071_v48 = vpack.c.bf16 %v6316_v39, %v6315_v38  ;;  %v6242_v38 = vld [vmem:[%s9959_s14 + $0x151] sm:$0xff]  ;;  %v6243_v39 = vld [vmem:[%s9959_s14 + $0x159] sm:$0xff] }
 0x1d9   : > { %7888 = vmatprep.mubr.f32.mxu0 %v10307_v53  ;;  %v6318_v53 = vld [vmem:[%s12016_s3 + $0x98] sm:$0xff] }
 0x1da   : > { %9072 = vmatprep.subr.bf16.mxu1 %v9071_v48 }
 0x1db   : > { %9074 = vmatpush3.bf16.msra.mxu1 %v9071_v48  ;;  %v6248_v48 = vld [vmem:[%s9959_s14 + $0x199] sm:$0xff] }
 0x1dc   : > { %7889 = vmatmul.mubr.f32.gmra.mrb[22].mxu0 %v10312_v54  ;;  %v6220_v54 = vld [vmem:[%s9959_s14 + $0x49] sm:$0xff] }
 0x1dd   : > { %7891 = vmatprep.mubr.f32.mxu0 %v10315_v57  ;;  %v9043_v57 = vpack.c.bf16 %v6301_v37, %v6300_v32  ;;  %v6240_v32 = vld [vmem:[%s9959_s14 + $0x139] sm:$0xff]  ;;  %v6241_v37 = vld [vmem:[%s9959_s14 + $0x141] sm:$0xff] }
 0x1e0   : > { %7892 = vmatmul.mubr.f32.gmra.mrb[24].mxu0 %v10320_v62  ;;  %v6302_v62 = vld [vmem:[%s12014_s1 + $0x420] sm:$0xff] }
 0x1e1   : > { %7894 = vmatprep.mubr.f32.mxu0 %v10323_v63  ;;  %v9075_v63 = vpack.c.bf16 %v6318_v53, %v6317_v44  ;;  %v6244_v44 = vld [vmem:[%s9959_s14 + $0x169] sm:$0xff]  ;;  %v6249_v53 = vld [vmem:[%s9959_s14 + $0x1a1] sm:$0xff] }
 0x1e3   : > { %9076 = vmatprep.subr.bf16.mxu1 %v9075_v63 }
 0x1e4   : > { %7895 = vmatmul.mubr.f32.gmra.mrb[26].mxu0 %v10328_v0  ;;  %v6303_v0 = vld [vmem:[%s12014_s1 + $0x428] sm:$0xff]  ;;  %9078 = vmatpush3.bf16.msra.mxu1 %v9075_v63  ;;  %v6269_v63 = vld [vmem:[%s9959_s14 + $0x52] sm:$0xff] }
 0x1e5   : > { %7897 = vmatprep.mubr.f32.mxu0 %v10579_v23  ;;  %v6319_v23 = vld [vmem:[%s12016_s3 + $0xa0] sm:$0xff]  ;;  %v9047_v35 = vpack.c.bf16 %v6303_v0, %v6302_v62  ;;  %v6268_v62 = vld [vmem:[%s9959_s14 + $0x4a] sm:$0xff] }
 0x1e6   : > { %v6272_v0 = vld [vmem:[%s9959_s14 + $0x7a] sm:$0xff] }
 0x1e8   : > { %7898 = vmatmul.mubr.f32.gmra.mrb[28].mxu0 %v10584_v13  ;;  %v6320_v13 = vld [vmem:[%s12016_s3 + $0xa8] sm:$0xff] }
 0x1e9   : > { %7900 = vmatprep.mubr.f32.mxu0 %v6200_v25  ;;  %v9079_v26 = vpack.c.bf16 %v6320_v13, %v6319_v23  ;;  %v6237_v25 = vld [vmem:[%s9959_s14 + $0x111] sm:$0xff]  ;;  %v6273_v23 = vld [vmem:[%s9959_s14 + $0x82] sm:$0xff] }
 0x1ea   : > { %v6274_v13 = vld [vmem:[%s9959_s14 + $0x92] sm:$0xff] }
 0x1eb   : > { %9080 = vmatprep.subr.bf16.mxu1 %v9079_v26 }
 0x1ec   : > { %7901 = vmatmul.mubr.f32.gmra.mrb[30].mxu0 %v6201_v29  ;;  %9082 = vmatpush3.bf16.msra.mxu1 %v9079_v26  ;;  %v6238_v29 = vld [vmem:[%s9959_s14 + $0x121] sm:$0xff]  ;;  %v6279_v26 = vld [vmem:[%s9959_s14 + $0xca] sm:$0xff] }
 0x1ed   : > { %7935 = vmatprep.mubr.f32.mxu0 %v6218_v30  ;;  %9084 = vmatprep.subr.bf16.mxu1 %v9083_v21  ;;  %v6239_v30 = vld [vmem:[%s9959_s14 + $0x129] sm:$0xff] }
 0x1f0   : > { %7936 = vmatmul.mubr.f32.vlgmr.msra.gmra.mrb[0].mxu0 %v6219_v47  ;;  %9086 = vmatpush3.bf16.msra.mxu1 %v9083_v21  ;;  %v6245_v47 = vld [vmem:[%s9959_s14 + $0x171] sm:$0xff] }
 0x1f1   : > { %9042 = vmatpush3.bf16.msra.mxu0 %v9039_v24  ;;  %7938 = vmatprep.mubr.f32.mxu0 %v6220_v54  ;;  %v6236_v24 = vld [vmem:[%s9959_s14 + $0x109] sm:$0xff]  ;;  %v6266_v54 = vld [vmem:[%s9959_s14 + $0x32] sm:$0xff] }
 0x1f2   : > { %9044 = vmatprep.subr.bf16.mxu0 %v9043_v57  ;;  %9088 = vmatprep.subr.bf16.mxu1 %v9087_v2  ;;  %v6287_v21 = vld [vmem:[%s9959_s14 + $0x12a] sm:$0xff] }
 0x1f4   : > { %7939 = vmatmul.mubr.f32.gmra.mrb[2].mxu0 %v6221_v31  ;;  %9090 = vmatpush3.bf16.msra.mxu1 %v9087_v2  ;;  %v6275_v31 = vld [vmem:[%s9959_s14 + $0x9a] sm:$0xff]  ;;  %v6297_v2 = vld [vmem:[%s9959_s14 + $0x1a2] sm:$0xff] }
 0x1f5   : > { %7941 = vmatprep.mubr.f32.mxu0 %v6222_v20  ;;  %9046 = vmatpush3.bf16.msra.mxu0 %v9043_v57  ;;  %v6267_v57 = vld [vmem:[%s9959_s14 + $0x3a] sm:$0xff]  ;;  %v6276_v20 = vld [vmem:[%s9959_s14 + $0xaa] sm:$0xff] }
 0x1f6   : > { %9048 = vmatprep.subr.bf16.mxu0 %v9047_v35  ;;  %9092 = vmatprep.subr.bf16.mxu1 %v9091_v34 }
 0x1f8   : > { %7942 = vmatmul.mubr.f32.gmra.mrb[4].mxu0 %v6223_v27  ;;  %9094 = vmatpush3.bf16.msra.mxu1 %v9091_v34  ;;  %v6283_v27 = vld [vmem:[%s9959_s14 + $0xfa] sm:$0xff] }
 0x1f9   : > { %7944 = vmatprep.mubr.f32.mxu0 %v6224_v17  ;;  %9050 = vmatpush3.bf16.msra.mxu0 %v9047_v35  ;;  %v6277_v35 = vld [vmem:[%s9959_s14 + $0xb2] sm:$0xff]  ;;  %v6284_v17 = vld [vmem:[%s9959_s14 + $0x10a] sm:$0xff] }
 0x1fa   : > { %9052 = vmatprep.subr.bf16.mxu0 %v9051_v45  ;;  %9096 = vmatprep.subr.bf16.mxu1 %v9095_v5 }
 0x1fc   : > { %7945 = vmatmul.mubr.f32.gmra.mrb[6].mxu0 %v6225_v55  ;;  %v6291_v55 = vld [vmem:[%s9959_s14 + $0x15a] sm:$0xff]  ;;  %9098 = vmatpush3.bf16.msra.mxu1 %v9095_v5 }
 0x1fd   : > { %7947 = vmatprep.mubr.f32.mxu0 %v6226_v56  ;;  %9054 = vmatpush3.bf16.msra.mxu0 %v9051_v45  ;;  %v6285_v45 = vld [vmem:[%s9959_s14 + $0x112] sm:$0xff]  ;;  %v6292_v56 = vld [vmem:[%s9959_s14 + $0x16a] sm:$0xff] }
 0x1fe   : > { %9056 = vmatprep.subr.bf16.mxu0 %v9055_v61 }
 0x200   : > { %7948 = vmatmul.mubr.f32.gmra.mrb[8].mxu0 %v6227_v28  ;;  %v9890_v28 = vmov 0.0  }
 0x201   : > { %7950 = vmatprep.mubr.f32.mxu0 %v6228_v6  ;;  %9058 = vmatpush3.bf16.msra.mxu0 %v9055_v61  ;;  %v6293_v61 = vld [vmem:[%s9959_s14 + $0x172] sm:$0xff]  ;;  %2991 = vst [vmem:[#allocation2 + $0x20] sm:$0xff] %v9890_v28  ;;  %2992 = vst [vmem:[#allocation2 + $0x28] sm:$0x3] %v9890_v28 }
 0x202   : > { %9060 = vmatprep.subr.bf16.mxu0 %v9059_v33  ;;  %2987 = vst [vmem:[#allocation2] sm:$0xff] %v9890_v28  ;;  %2988 = vst [vmem:[#allocation2 + $0x8] sm:$0xff] %v9890_v28 }
 0x203   : > { %2989 = vst [vmem:[#allocation2 + $0x10] sm:$0x3] %v9890_v28  ;;  %2990 = vst [vmem:[#allocation2 + $0x18] sm:$0xff] %v9890_v28 }
 0x204   : > { %7951 = vmatmul.mubr.f32.gmra.mrb[10].mxu0 %v6229_v43  ;;  %2993 = vst [vmem:[#allocation2 + $0x30] sm:$0xff] %v9890_v28  ;;  %2994 = vst [vmem:[#allocation2 + $0x38] sm:$0xff] %v9890_v28  ;;  %v9103_v43 = vpack.c.bf16 %v3107_v42, %v3106_v8 }
 0x205   : > { %7953 = vmatprep.mubr.f32.mxu0 %v6230_v10  ;;  %9062 = vmatpush3.bf16.msra.mxu0 %v9059_v33  ;;  %2995 = vst [vmem:[#allocation2 + $0x40] sm:$0x3] %v9890_v28  ;;  %2996 = vst [vmem:[#allocation2 + $0x48] sm:$0xff] %v9890_v28  ;;  %v3108_v10 = vld [vmem:[%s12016_s3 + $0x10] sm:$0xff] }
 0x206   : > { %9064 = vmatprep.subr.bf16.mxu0 %v9063_v49  ;;  %2997 = vst [vmem:[#allocation2 + $0x50] sm:$0xff] %v9890_v28  ;;  %2998 = vst [vmem:[#allocation2 + $0x58] sm:$0x3] %v9890_v28 }
 0x207   : > { %2999 = vst [vmem:[#allocation2 + $0x60] sm:$0xff] %v9890_v28  ;;  %3000 = vst [vmem:[#allocation2 + $0x68] sm:$0xff] %v9890_v28 }
 0x208   : > { %7954 = vmatmul.mubr.f32.gmra.mrb[12].mxu0 %v6231_v58  ;;  %3001 = vst [vmem:[#allocation2 + $0x70] sm:$0x3] %v9890_v28  ;;  %3002 = vst [vmem:[#allocation2 + $0x78] sm:$0xff] %v9890_v28  ;;  %v3111_v58 = vld [vmem:[%s12016_s3 + $0x28] sm:$0xff] }
 0x209   : > { %7956 = vmatprep.mubr.f32.mxu0 %v6232_v59  ;;  %9066 = vmatpush3.bf16.msra.mxu0 %v9063_v49  ;;  %3003 = vst [vmem:[#allocation2 + $0x80] sm:$0xff] %v9890_v28  ;;  %3004 = vst [vmem:[#allocation2 + $0x88] sm:$0x3] %v9890_v28  ;;  %v3122_v33 = vld [vmem:[#allocation2 + $0x1] sm:$0xff]  ;;  %v3109_v49 = vld [vmem:[%s12016_s3 + $0x18] sm:$0xff]  ;;  %v9111_v59 = vpack.c.bf16 %v3111_v58, %v3110_v11 }
 0x20a   : > { %9068 = vmatprep.subr.bf16.mxu0 %v9067_v15  ;;  %3005 = vst [vmem:[#allocation2 + $0x90] sm:$0xff] %v9890_v28  ;;  %3006 = vst [vmem:[#allocation2 + $0x98] sm:$0xff] %v9890_v28  ;;  %8095 = vmatprep.mubr.f32.mxu1 %v3122_v33  ;;  %v3123_v34 = vld [vmem:[#allocation2 + $0x9] sm:$0xff]  ;;  %v9107_v52 = vpack.c.bf16 %v3109_v49, %v3108_v10 }
 0x20b   : > { %3007 = vst [vmem:[#allocation2 + $0xa0] sm:$0x3] %v9890_v28  ;;  %3008 = vst [vmem:[#allocation2 + $0xa8] sm:$0xff] %v9890_v28 }
 0x20c   : > { %7957 = vmatmul.mubr.f32.gmra.mrb[14].mxu0 %v6233_v3  ;;  %3009 = vst [vmem:[#allocation2 + $0xb0] sm:$0xff] %v9890_v28  ;;  %3010 = vst [vmem:[#allocation2 + $0xb8] sm:$0x3] %v9890_v28  ;;  %v3113_v3 = vld [vmem:[%s12016_s3 + $0x38] sm:$0xff] }
 0x20d   : > { %7959 = vmatprep.mubr.f32.mxu0 %v6234_v19  ;;  %9070 = vmatpush3.bf16.msra.mxu0 %v9067_v15  ;;  %3011 = vst [vmem:[#allocation2 + $0xc0] sm:$0xff] %v9890_v28  ;;  %3012 = vst [vmem:[#allocation2 + $0xc8] sm:$0xff] %v9890_v28  ;;  %v3112_v15 = vld [vmem:[%s12016_s3 + $0x30] sm:$0xff] }
 0x20e   : > { %3013 = vst [vmem:[#allocation2 + $0xd0] sm:$0x3] %v9890_v28  ;;  %3014 = vst [vmem:[#allocation2 + $0xd8] sm:$0xff] %v9890_v28  ;;  %v9115_v19 = vpack.c.bf16 %v3113_v3, %v3112_v15 }
 0x20f   : > { %3015 = vst [vmem:[#allocation2 + $0xe0] sm:$0xff] %v9890_v28  ;;  %3016 = vst [vmem:[#allocation2 + $0xe8] sm:$0x3] %v9890_v28 }
 0x210   : > { %7960 = vmatmul.mubr.f32.gmra.mrb[16].mxu0 %v6235_v16  ;;  %3017 = vst [vmem:[#allocation2 + $0xf0] sm:$0xff] %v9890_v28  ;;  %3018 = vst [vmem:[#allocation2 + $0xf8] sm:$0xff] %v9890_v28  ;;  %v3114_v16 = vld [vmem:[%s12016_s3 + $0x40] sm:$0xff] }
 0x211   : > { %7962 = vmatprep.mubr.f32.mxu0 %v6236_v24  ;;  %3019 = vst [vmem:[#allocation2 + $0x100] sm:$0x3] %v9890_v28  ;;  %3020 = vst [vmem:[#allocation2 + $0x108] sm:$0xff] %v9890_v28  ;;  %v3115_v24 = vld [vmem:[%s12016_s3 + $0x48] sm:$0xff] }
 0x212   : > { %3021 = vst [vmem:[#allocation2 + $0x110] sm:$0xff] %v9890_v28  ;;  %3022 = vst [vmem:[#allocation2 + $0x118] sm:$0x3] %v9890_v28 }
 0x213   : > { %3023 = vst [vmem:[#allocation2 + $0x120] sm:$0xff] %v9890_v28  ;;  %3024 = vst [vmem:[#allocation2 + $0x128] sm:$0xff] %v9890_v28 }
 0x214   : > { %7963 = vmatmul.mubr.f32.gmra.mrb[18].mxu0 %v6237_v25  ;;  %3025 = vst [vmem:[#allocation2 + $0x130] sm:$0x3] %v9890_v28  ;;  %3026 = vst [vmem:[#allocation2 + $0x138] sm:$0xff] %v9890_v28  ;;  %v9119_v25 = vpack.c.bf16 %v3115_v24, %v3114_v16 }
 0x215   : > { %7965 = vmatprep.mubr.f32.mxu0 %v6238_v29  ;;  %3027 = vst [vmem:[#allocation2 + $0x140] sm:$0xff] %v9890_v28  ;;  %3028 = vst [vmem:[#allocation2 + $0x148] sm:$0x3] %v9890_v28  ;;  %v3116_v29 = vld [vmem:[%s12016_s3 + $0x50] sm:$0xff] }
 0x216   : > { %3029 = vst [vmem:[#allocation2 + $0x150] sm:$0xff] %v9890_v28  ;;  %3030 = vst [vmem:[#allocation2 + $0x158] sm:$0xff] %v9890_v28 }
 0x217   : > { %3031 = vst [vmem:[#allocation2 + $0x160] sm:$0x3] %v9890_v28  ;;  %3032 = vst [vmem:[#allocation2 + $0x168] sm:$0xff] %v9890_v28 }
 0x218   : > { %7966 = vmatmul.mubr.f32.gmra.mrb[20].mxu0 %v6239_v30  ;;  %3033 = vst [vmem:[#allocation2 + $0x170] sm:$0xff] %v9890_v28  ;;  %3034 = vst [vmem:[#allocation2 + $0x178] sm:$0x3] %v9890_v28  ;;  %v3117_v30 = vld [vmem:[%s12016_s3 + $0x58] sm:$0xff] }
 0x219   : > { %7968 = vmatprep.mubr.f32.mxu0 %v6240_v32  ;;  %3035 = vst [vmem:[#allocation2 + $0x180] sm:$0xff] %v9890_v28  ;;  %3036 = vst [vmem:[#allocation2 + $0x188] sm:$0xff] %v9890_v28  ;;  %v9123_v32 = vpack.c.bf16 %v3117_v30, %v3116_v29 }
 0x21a   : > { %3037 = vst [vmem:[#allocation2 + $0x190] sm:$0x3] %v9890_v28  ;;  %3038 = vst [vmem:[#allocation2 + $0x198] sm:$0xff] %v9890_v28 }
 0x21b   : > { %3039 = vst [vmem:[#allocation2 + $0x1a0] sm:$0xff] %v9890_v28  ;;  %3040 = vst [vmem:[#allocation2 + $0x1a8] sm:$0x3] %v9890_v28 }
 0x21c   : > { %7969 = vmatmul.mubr.f32.gmra.mrb[22].mxu0 %v6241_v37  ;;  %v3118_v37 = vld [vmem:[%s12016_s3 + $0x60] sm:$0xff] }
 0x21d   : > { %7971 = vmatprep.mubr.f32.mxu0 %v6242_v38  ;;  %v3119_v38 = vld [vmem:[%s12016_s3 + $0x68] sm:$0xff] }
 0x220   : > { %7972 = vmatmul.mubr.f32.gmra.mrb[24].mxu0 %v6243_v39  ;;  %v9127_v39 = vpack.c.bf16 %v3119_v38, %v3118_v37 }
 0x221   : > { %7974 = vmatprep.mubr.f32.mxu0 %v6244_v44  ;;  %v3120_v44 = vld [vmem:[%s12016_s3 + $0x70] sm:$0xff] }
 0x224   : > { %7975 = vmatmul.mubr.f32.gmra.mrb[26].mxu0 %v6245_v47  ;;  %v3121_v47 = vld [vmem:[%s12016_s3 + $0x78] sm:$0xff] }
 0x225   : > { %7977 = vmatprep.mubr.f32.mxu0 %v10665_v7  ;;  %v6270_v7 = vld [vmem:[%s9959_s14 + $0x62] sm:$0xff] }
 0x228   : > { %7978 = vmatmul.mubr.f32.gmra.mrb[28].mxu0 %v10670_v9  ;;  %v6271_v9 = vld [vmem:[%s9959_s14 + $0x6a] sm:$0xff] }
 0x229   : > { %7980 = vmatprep.mubr.f32.mxu0 %v6248_v48  ;;  %v9131_v48 = vpack.c.bf16 %v3121_v47, %v3120_v44 }
 0x22c   : > { %7981 = vmatmul.mubr.f32.gmra.mrb[30].mxu0 %v6249_v53  ;;  %v6331_v53 = vld [vmem:[%s12016_s3 + $0x100] sm:$0xff] }
 0x22d   : > { %8015 = vmatprep.mubr.f32.mxu0 %v6266_v54  ;;  %v6332_v54 = vld [vmem:[%s12016_s3 + $0x108] sm:$0xff] }
 0x230   : > { %8016 = vmatmul.mubr.f32.vlgmr.msra.gmra.mrb[0].mxu0 %v6267_v57  ;;  %v11101_v57 = vpack.c.bf16 %v6332_v54, %v6331_v53 }
 0x231   : > { %8018 = vmatprep.mubr.f32.mxu0 %v6268_v62  ;;  %v11107_v62 = vld [vmem:[%s12015_s2] ss:$0 sm:$0xff] }
 0x234   : > { %8019 = vmatmul.mubr.f32.gmra.mrb[2].mxu0 %v6269_v63 }
 0x235   : > { %8021 = vmatprep.mubr.f32.mxu0 %v6270_v7 }
 0x238   : > { %8022 = vmatmul.mubr.f32.gmra.mrb[4].mxu0 %v6271_v9 }
 0x239   : > { %8024 = vmatprep.mubr.f32.mxu0 %v6272_v0 }
 0x23c   : > { %8025 = vmatmul.mubr.f32.gmra.mrb[6].mxu0 %v6273_v23 }
 0x23d   : > { %8027 = vmatprep.mubr.f32.mxu0 %v6274_v13 }
 0x240   : > { %8028 = vmatmul.mubr.f32.gmra.mrb[8].mxu0 %v6275_v31 }
 0x241   : > { %8030 = vmatprep.mubr.f32.mxu0 %v6276_v20 }
 0x244   : > { %8031 = vmatmul.mubr.f32.gmra.mrb[10].mxu0 %v6277_v35 }
 0x245   : > { %8033 = vmatprep.mubr.f32.mxu0 %v6278_v36 }
 0x248   : > { %8034 = vmatmul.mubr.f32.gmra.mrb[12].mxu0 %v6279_v26 }
 0x249   : > { %8036 = vmatprep.mubr.f32.mxu0 %v6280_v12 }
 0x24c   : > { %8037 = vmatmul.mubr.f32.gmra.mrb[14].mxu0 %v6281_v40 }
 0x24d   : > { %8039 = vmatprep.mubr.f32.mxu0 %v6282_v41 }
 0x250   : > { %8040 = vmatmul.mubr.f32.gmra.mrb[16].mxu0 %v6283_v27 }
 0x251   : > { %8042 = vmatprep.mubr.f32.mxu0 %v6284_v17 }
 0x254   : > { %8043 = vmatmul.mubr.f32.gmra.mrb[18].mxu0 %v6285_v45 }
 0x255   : > { %8045 = vmatprep.mubr.f32.mxu0 %v6286_v46 }
 0x258   : > { %8046 = vmatmul.mubr.f32.gmra.mrb[20].mxu0 %v6287_v21 }
 0x259   : > { %8048 = vmatprep.mubr.f32.mxu0 %v6288_v50 }
 0x25c   : > { %8049 = vmatmul.mubr.f32.gmra.mrb[22].mxu0 %v6289_v51 }
 0x25d   : > { %8051 = vmatprep.mubr.f32.mxu0 %v6290_v18 }
 0x260   : > { %8052 = vmatmul.mubr.f32.gmra.mrb[24].mxu0 %v6291_v55 }
 0x261   : > { %8054 = vmatprep.mubr.f32.mxu0 %v6292_v56 }
 0x264   : > { %8055 = vmatmul.mubr.f32.gmra.mrb[26].mxu0 %v6293_v61 }
 0x265   : > { %8057 = vmatprep.mubr.f32.mxu0 %v10751_v14  ;;  %v6329_v14 = vld [vmem:[%s12016_s3 + $0xf0] sm:$0xff] }
 0x268   : > { %8058 = vmatmul.mubr.f32.gmra.mrb[28].mxu0 %v10756_v60  ;;  %v6330_v60 = vld [vmem:[%s12016_s3 + $0xf8] sm:$0xff] }
 0x269   : > { %8060 = vmatprep.mubr.f32.mxu0 %v6296_v1  ;;  %v9099_v6 = vpack.c.bf16 %v6330_v60, %v6329_v14 }
 0x26b   : > { %9100 = vmatprep.subr.bf16.mxu1 %v9099_v6 }
 0x26c   : > { %8061 = vmatmul.mubr.f32.gmra.mrb[30].mxu0 %v6297_v2  ;;  %9102 = vmatpush3.bf16.msra.mxu1 %v9099_v6 }
 0x26d   : > { %9104 = vmatprep.subr.bf16.mxu1 %v9103_v43 }
 0x26f   : > { %8096 = vmatmul.mubr.f32.vlgmr.msra.gmra.mrb[0].mxu1 %v3123_v34 }
 0x270   : > { %9106 = vmatpush3.bf16.msra.mxu1 %v9103_v43 }
 0x271   : > { %9108 = vmatprep.subr.bf16.mxu1 %v9107_v52 }
 0x274   : > { %9110 = vmatpush3.bf16.msra.mxu1 %v9107_v52 }
 0x275   : > { %9112 = vmatprep.subr.bf16.mxu1 %v9111_v59 }
 0x278   : > { %9114 = vmatpush3.bf16.msra.mxu1 %v9111_v59 }
 0x279   : > { %9116 = vmatprep.subr.bf16.mxu1 %v9115_v19 }
 0x27c   : > { %9118 = vmatpush3.bf16.msra.mxu1 %v9115_v19 }
 0x27d   : > { %9120 = vmatprep.subr.bf16.mxu1 %v9119_v25 }
 0x280   : > { %9122 = vmatpush3.bf16.msra.mxu1 %v9119_v25 }
 0x281   : > { %9124 = vmatprep.subr.bf16.mxu1 %v9123_v32 }
 0x284   : > { %9126 = vmatpush3.bf16.msra.mxu1 %v9123_v32 }
 0x285   : > { %9128 = vmatprep.subr.bf16.mxu1 %v9127_v39 }
 0x288   : > { %9130 = vmatpush3.bf16.msra.mxu1 %v9127_v39 }
 0x289   : > { %9132 = vmatprep.subr.bf16.mxu1 %v9131_v48 }
 0x28c   : > { %9134 = vmatpush3.bf16.msra.mxu1 %v9131_v48 }
 0x28d   : > { %9136 = vmatprep.subr.bf16.mxu1 %v11101_v57 }
 0x303   : > { %v8017_v63 = vpop.f32.mrb[0].mxu0 }
 0x304   : > { %v2924_v7 = vadd.f32 %v8017_v63, %v11107_v62  ;;  %v2725_v9 = vpop.f32.mrb[1].mxu0 }
 0x305   : > { %v2923_v0 = vadd.f32 %v11107_v62, %v2725_v9 }
 0x306   : > { %v2956_v23 = vmax.f32 %v2924_v7, 0.0 }
 0x307   : > { %v2955_v13 = vmax.f32 %v2923_v0, 0.0  ;;  %v8020_v31 = vpop.f32.mrb[2].mxu0 }
 0x308   : > { %3043 = vst [vmem:[#allocation2 + $0x21] sm:$0xff] %v2956_v23  ;;  %v2926_v20 = vadd.f32 %v8020_v31, %v11107_v62  ;;  %v2735_v35 = vpop.f32.mrb[3].mxu0 }
 0x309   : > { %3042 = vst [vmem:[#allocation2 + $0x19] sm:$0xff] %v2955_v13  ;;  %v2925_v36 = vadd.f32 %v11107_v62, %v2735_v35  ;;  %8098 = vmatprep.mubr.f32.mxu1 %v2955_v13 }
 0x30a   : > { %v2958_v26 = vmax.f32 %v2926_v20, 0.0  ;;  %8099 = vmatmul.mubr.f32.gmra.mrb[2].mxu1 %v2956_v23 }
 0x30b   : > { %v2957_v12 = vmax.f32 %v2925_v36, 0.0  ;;  %v8023_v40 = vpop.f32.mrb[4].mxu0 }
 0x30c   : > { %3045 = vst [vmem:[#allocation2 + $0x39] sm:$0xff] %v2958_v26  ;;  %v2928_v41 = vadd.f32 %v8023_v40, %v11107_v62  ;;  %v2745_v27 = vpop.f32.mrb[5].mxu0 }
 0x30d   : > { %3044 = vst [vmem:[#allocation2 + $0x31] sm:$0xff] %v2957_v12  ;;  %v2927_v17 = vadd.f32 %v11107_v62, %v2745_v27  ;;  %8101 = vmatprep.mubr.f32.mxu1 %v2957_v12 }
 0x30e   : > { %v2960_v45 = vmax.f32 %v2928_v41, 0.0  ;;  %8102 = vmatmul.mubr.f32.gmra.mrb[4].mxu1 %v2958_v26 }
 0x30f   : > { %v2959_v46 = vmax.f32 %v2927_v17, 0.0  ;;  %v8026_v21 = vpop.f32.mrb[6].mxu0 }
 0x310   : > { %3047 = vst [vmem:[#allocation2 + $0x51] sm:$0xff] %v2960_v45  ;;  %v2930_v50 = vadd.f32 %v8026_v21, %v11107_v62  ;;  %v2755_v51 = vpop.f32.mrb[7].mxu0 }
 0x311   : > { %3046 = vst [vmem:[#allocation2 + $0x49] sm:$0xff] %v2959_v46  ;;  %v2929_v18 = vadd.f32 %v11107_v62, %v2755_v51  ;;  %8104 = vmatprep.mubr.f32.mxu1 %v2959_v46 }
 0x312   : > { %v2962_v55 = vmax.f32 %v2930_v50, 0.0  ;;  %8105 = vmatmul.mubr.f32.gmra.mrb[6].mxu1 %v2960_v45 }
 0x313   : > { %v2961_v56 = vmax.f32 %v2929_v18, 0.0  ;;  %v8029_v61 = vpop.f32.mrb[8].mxu0 }
 0x314   : > { %3049 = vst [vmem:[#allocation2 + $0x69] sm:$0xff] %v2962_v55  ;;  %v2932_v1 = vadd.f32 %v8029_v61, %v11107_v62  ;;  %v2765_v2 = vpop.f32.mrb[9].mxu0 }
 0x315   : > { %3048 = vst [vmem:[#allocation2 + $0x61] sm:$0xff] %v2961_v56  ;;  %v2931_v22 = vadd.f32 %v11107_v62, %v2765_v2  ;;  %8107 = vmatprep.mubr.f32.mxu1 %v2961_v56 }
 0x316   : > { %v2964_v4 = vmax.f32 %v2932_v1, 0.0  ;;  %8108 = vmatmul.mubr.f32.gmra.mrb[8].mxu1 %v2962_v55 }
 0x317   : > { %v2963_v5 = vmax.f32 %v2931_v22, 0.0  ;;  %v8032_v14 = vpop.f32.mrb[10].mxu0 }
 0x318   : > { %3051 = vst [vmem:[#allocation2 + $0x81] sm:$0xff] %v2964_v4  ;;  %v2934_v60 = vadd.f32 %v8032_v14, %v11107_v62  ;;  %v2775_v6 = vpop.f32.mrb[11].mxu0 }
 0x319   : > { %3050 = vst [vmem:[#allocation2 + $0x79] sm:$0xff] %v2963_v5  ;;  %v2933_v33 = vadd.f32 %v11107_v62, %v2775_v6  ;;  %8110 = vmatprep.mubr.f32.mxu1 %v2963_v5 }
 0x31a   : > { %v2966_v34 = vmax.f32 %v2934_v60, 0.0  ;;  %8111 = vmatmul.mubr.f32.gmra.mrb[10].mxu1 %v2964_v4 }
 0x31b   : > { %v11121_v8 = vmax.f32 %v2933_v33, 0.0  ;;  %v8035_v42 = vpop.f32.mrb[12].mxu0  ;;  %v6333_v33 = vld [vmem:[%s12016_s3 + $0x110] sm:$0xff] }
 0x31c   : > { %3053 = vst [vmem:[#allocation2 + $0x99] sm:$0xff] %v2966_v34  ;;  %v2936_v43 = vadd.f32 %v8035_v42, %v11107_v62  ;;  %v2785_v10 = vpop.f32.mrb[13].mxu0 }
 0x31d   : > { %3052 = vst [vmem:[#allocation2 + $0x91] sm:$0xff] %v11121_v8  ;;  %v2935_v49 = vadd.f32 %v11107_v62, %v2785_v10  ;;  %8113 = vmatprep.mubr.f32.mxu1 %v11121_v8  ;;  %v6335_v10 = vld [vmem:[%s12016_s3 + $0x120] sm:$0xff] }
 0x31e   : > { %v11127_v52 = vmax.f32 %v2936_v43, 0.0  ;;  %8114 = vmatmul.mubr.f32.gmra.mrb[12].mxu1 %v2966_v34  ;;  %v6334_v34 = vld [vmem:[%s12016_s3 + $0x118] sm:$0xff] }
 0x31f   : > { %v11129_v11 = vmax.f32 %v2935_v49, 0.0  ;;  %v8038_v58 = vpop.f32.mrb[14].mxu0  ;;  %v6336_v49 = vld [vmem:[%s12016_s3 + $0x128] sm:$0xff] }
 0x320   : > { %3055 = vst [vmem:[#allocation2 + $0xb1] sm:$0xff] %v11127_v52  ;;  %v2938_v59 = vadd.f32 %v8038_v58, %v11107_v62  ;;  %v2795_v15 = vpop.f32.mrb[15].mxu0  ;;  %v11241_v58 = vld [vmem:[#allocation2 + $0x18] sm:$0xff] }
 0x321   : > { %3054 = vst [vmem:[#allocation2 + $0xa9] sm:$0xff] %v11129_v11  ;;  %v2937_v3 = vadd.f32 %v11107_v62, %v2795_v15  ;;  %8116 = vmatprep.mubr.f32.mxu1 %v11129_v11  ;;  %v11245_v15 = vld [vmem:[#allocation2 + $0x20] sm:$0xff] }
 0x322   : > { %v11136_v19 = vmax.f32 %v2938_v59, 0.0  ;;  %8117 = vmatmul.mubr.f32.gmra.mrb[14].mxu1 %v11127_v52  ;;  %v9143_v59 = vpack.c.bf16 %v6336_v49, %v6335_v10 }
 0x323   : > { %v11139_v16 = vmax.f32 %v2937_v3, 0.0  ;;  %v8041_v24 = vpop.f32.mrb[16].mxu0  ;;  %v6337_v3 = vld [vmem:[%s12016_s3 + $0x130] sm:$0xff] }
 0x324   : > { %3057 = vst [vmem:[#allocation2 + $0xc9] sm:$0xff] %v11136_v19  ;;  %v2940_v25 = vadd.f32 %v8041_v24, %v11107_v62  ;;  %v2805_v29 = vpop.f32.mrb[17].mxu0  ;;  %v6338_v24 = vld [vmem:[%s12016_s3 + $0x138] sm:$0xff] }
 0x325   : > { %3056 = vst [vmem:[#allocation2 + $0xc1] sm:$0xff] %v11139_v16  ;;  %v2939_v30 = vadd.f32 %v11107_v62, %v2805_v29  ;;  %8119 = vmatprep.mubr.f32.mxu1 %v11139_v16  ;;  %v6339_v29 = vld [vmem:[%s12016_s3 + $0x140] sm:$0xff] }
 0x326   : > { %v11146_v32 = vmax.f32 %v2940_v25, 0.0  ;;  %8120 = vmatmul.mubr.f32.gmra.mrb[16].mxu1 %v11136_v19  ;;  %v11257_v25 = vld [vmem:[#allocation2 + $0x38] sm:$0xff] }
 0x327   : > { %v11149_v37 = vmax.f32 %v2939_v30, 0.0  ;;  %v8044_v38 = vpop.f32.mrb[18].mxu0  ;;  %v6340_v30 = vld [vmem:[%s12016_s3 + $0x148] sm:$0xff] }
 0x328   : > { %3059 = vst [vmem:[#allocation2 + $0xe1] sm:$0xff] %v11146_v32  ;;  %v2942_v39 = vadd.f32 %v8044_v38, %v11107_v62  ;;  %v2815_v44 = vpop.f32.mrb[19].mxu0  ;;  %v11266_v38 = vld [vmem:[#allocation2 + $0x48] sm:$0xff] }
 0x329   : > { %3058 = vst [vmem:[#allocation2 + $0xd9] sm:$0xff] %v11149_v37  ;;  %v2941_v47 = vadd.f32 %v11107_v62, %v2815_v44  ;;  %8122 = vmatprep.mubr.f32.mxu1 %v11149_v37  ;;  %v11269_v44 = vld [vmem:[#allocation2 + $0x50] sm:$0xff] }
 0x32a   : > { %v11156_v48 = vmax.f32 %v2942_v39, 0.0  ;;  %8123 = vmatmul.mubr.f32.gmra.mrb[18].mxu1 %v11146_v32  ;;  %v9151_v39 = vpack.c.bf16 %v6340_v30, %v6339_v29 }
 0x32b   : > { %v11159_v53 = vmax.f32 %v2941_v47, 0.0  ;;  %v8047_v54 = vpop.f32.mrb[20].mxu0  ;;  %v6341_v47 = vld [vmem:[%s12016_s3 + $0x150] sm:$0xff] }
 0x32c   : > { %3061 = vst [vmem:[#allocation2 + $0xf9] sm:$0xff] %v11156_v48  ;;  %v2944_v63 = vadd.f32 %v8047_v54, %v11107_v62  ;;  %v2825_v7 = vpop.f32.mrb[21].mxu0  ;;  %v6342_v54 = vld [vmem:[%s12016_s3 + $0x158] sm:$0xff] }
 0x32d   : > { %3060 = vst [vmem:[#allocation2 + $0xf1] sm:$0xff] %v11159_v53  ;;  %v2943_v9 = vadd.f32 %v11107_v62, %v2825_v7  ;;  %8125 = vmatprep.mubr.f32.mxu1 %v11159_v53  ;;  %v9155_v7 = vpack.c.bf16 %v6342_v54, %v6341_v47  ;;  %v3621_v47 = vld [vmem:[#allocation2 + $0x2] sm:$0xff] }
 0x32e   : > { %v11166_v0 = vmax.f32 %v2944_v63, 0.0  ;;  %8126 = vmatmul.mubr.f32.gmra.mrb[20].mxu1 %v11156_v48  ;;  %v11278_v63 = vld [vmem:[#allocation2 + $0x60] sm:$0xff] }
 0x32f   : > { %v11169_v23 = vmax.f32 %v2943_v9, 0.0  ;;  %v8050_v13 = vpop.f32.mrb[22].mxu0  ;;  %v11281_v9 = vld [vmem:[#allocation2 + $0x68] sm:$0xff] }
 0x330   : > { %3063 = vst [vmem:[#allocation2 + $0x111] sm:$0xff] %v11166_v0  ;;  %v2946_v31 = vadd.f32 %v8050_v13, %v11107_v62  ;;  %v2835_v20 = vpop.f32.mrb[23].mxu0  ;;  %v6343_v13 = vld [vmem:[%s12016_s3 + $0x160] sm:$0xff] }
 0x331   : > { %3062 = vst [vmem:[#allocation2 + $0x109] sm:$0xff] %v11169_v23  ;;  %v2945_v35 = vadd.f32 %v11107_v62, %v2835_v20  ;;  %8128 = vmatprep.mubr.f32.mxu1 %v11169_v23  ;;  %v11290_v20 = vld [vmem:[#allocation2 + $0x78] sm:$0xff] }
 0x332   : > { %v11176_v36 = vmax.f32 %v2946_v31, 0.0  ;;  %8129 = vmatmul.mubr.f32.gmra.mrb[22].mxu1 %v11166_v0  ;;  %v6344_v31 = vld [vmem:[%s12016_s3 + $0x168] sm:$0xff] }
 0x333   : > { %v11179_v26 = vmax.f32 %v2945_v35, 0.0  ;;  %v8053_v12 = vpop.f32.mrb[24].mxu0  ;;  %v9159_v35 = vpack.c.bf16 %v6344_v31, %v6343_v13  ;;  %v6350_v13 = vld [vmem:[%s12016_s3 + $0x198] sm:$0xff]  ;;  %v3622_v31 = vld [vmem:[#allocation2 + $0xa] sm:$0xff] }
 0x334   : > { %3065 = vst [vmem:[#allocation2 + $0x129] sm:$0xff] %v11176_v36  ;;  %v2948_v40 = vadd.f32 %v8053_v12, %v11107_v62  ;;  %v2845_v41 = vpop.f32.mrb[25].mxu0  ;;  %v11293_v12 = vld [vmem:[#allocation2 + $0x80] sm:$0xff] }
 0x335   : > { %3064 = vst [vmem:[#allocation2 + $0x121] sm:$0xff] %v11179_v26  ;;  %v2947_v27 = vadd.f32 %v11107_v62, %v2845_v41  ;;  %8131 = vmatprep.mubr.f32.mxu1 %v11179_v26  ;;  %v6346_v41 = vld [vmem:[%s12016_s3 + $0x178] sm:$0xff] }
 0x336   : > { %v11186_v17 = vmax.f32 %v2948_v40, 0.0  ;;  %8132 = vmatmul.mubr.f32.gmra.mrb[24].mxu1 %v11176_v36  ;;  %v6345_v40 = vld [vmem:[%s12016_s3 + $0x170] sm:$0xff] }
 0x337   : > { %v11189_v45 = vmax.f32 %v2947_v27, 0.0  ;;  %v8056_v46 = vpop.f32.mrb[26].mxu0  ;;  %v11302_v27 = vld [vmem:[#allocation2 + $0x90] sm:$0xff] }
 0x338   : > { %3067 = vst [vmem:[#allocation2 + $0x141] sm:$0xff] %v11186_v17  ;;  %v2950_v21 = vadd.f32 %v8056_v46, %v11107_v62  ;;  %v2855_v50 = vpop.f32.mrb[27].mxu0  ;;  %v9163_v46 = vpack.c.bf16 %v6346_v41, %v6345_v40  ;;  %v11338_v10 = vld [vmem:[#allocation2 + $0x108] sm:$0xff]  ;;  %v11341_v49 = vld [vmem:[#allocation2 + $0x110] sm:$0xff]  ;;  %v6351_v40 = vld [vmem:[%s12016_s3 + $0x1a0] sm:$0xff] }
 0x339   : > { %3066 = vst [vmem:[#allocation2 + $0x139] sm:$0xff] %v11189_v45  ;;  %v2949_v51 = vadd.f32 %v11107_v62, %v2855_v50  ;;  %8134 = vmatprep.mubr.f32.mxu1 %v11189_v45  ;;  %v6347_v50 = vld [vmem:[%s12016_s3 + $0x180] sm:$0xff]  ;;  %v6352_v41 = vld [vmem:[%s12016_s3 + $0x1a8] sm:$0xff] }
 0x33a   : > { %v11196_v18 = vmax.f32 %v2950_v21, 0.0  ;;  %8135 = vmatmul.mubr.f32.gmra.mrb[26].mxu1 %v11186_v17  ;;  %v11305_v21 = vld [vmem:[#allocation2 + $0x98] sm:$0xff] }
 0x33b   : > { %v11199_v55 = vmax.f32 %v2949_v51, 0.0  ;;  %v8059_v56 = vpop.f32.mrb[28].mxu0  ;;  %v6348_v51 = vld [vmem:[%s12016_s3 + $0x188] sm:$0xff] }
 0x33c   : > { %3069 = vst [vmem:[#allocation2 + $0x159] sm:$0xff] %v11196_v18  ;;  %v2952_v61 = vadd.f32 %v8059_v56, %v11107_v62  ;;  %v2865_v1 = vpop.f32.mrb[29].mxu0  ;;  %v11314_v56 = vld [vmem:[#allocation2 + $0xa8] sm:$0xff] }
 0x33d   : > { %3068 = vst [vmem:[#allocation2 + $0x151] sm:$0xff] %v11199_v55  ;;  %v2951_v2 = vadd.f32 %v11107_v62, %v2865_v1  ;;  %8137 = vmatprep.mubr.f32.mxu1 %v11199_v55  ;;  %v11317_v1 = vld [vmem:[#allocation2 + $0xb0] sm:$0xff] }
 0x33e   : > { %v11206_v22 = vmax.f32 %v2952_v61, 0.0  ;;  %8138 = vmatmul.mubr.f32.gmra.mrb[28].mxu1 %v11196_v18  ;;  %v9167_v61 = vpack.c.bf16 %v6348_v51, %v6347_v50  ;;  %v9175_v50 = vpack.c.bf16 %v6352_v41, %v6351_v40  ;;  %v11383_v51 = vld [vmem:[#allocation2 + $0x22] sm:$0xff] }
 0x33f   : > { %v11209_v4 = vmax.f32 %v2951_v2, 0.0  ;;  %v8062_v5 = vpop.f32.mrb[30].mxu0  ;;  %v11320_v2 = vld [vmem:[#allocation2 + $0xc0] sm:$0xff]  ;;  %v6356_v41 = vld [vmem:[%s12016_s3 + $0x1c8] sm:$0xff] }
 0x340   : > { %3071 = vst [vmem:[#allocation2 + $0x171] sm:$0xff] %v11206_v22  ;;  %v11213_v14 = vadd.f32 %v8062_v5, %v11107_v62  ;;  %v2875_v60 = vpop.f32.mrb[31].mxu0  ;;  %v11323_v5 = vld [vmem:[#allocation2 + $0xc8] sm:$0xff]  ;;  %v6355_v40 = vld [vmem:[%s12016_s3 + $0x1c0] sm:$0xff] }
 0x341   : > { %3070 = vst [vmem:[#allocation2 + $0x169] sm:$0xff] %v11209_v4  ;;  %v11217_v6 = vadd.f32 %v11107_v62, %v2875_v60  ;;  %8140 = vmatprep.mubr.f32.mxu1 %v11209_v4  ;;  %v9139_v62 = vpack.c.bf16 %v6334_v34, %v6333_v33  ;;  %v11326_v60 = vld [vmem:[#allocation2 + $0xd8] sm:$0xff]  ;;  %v11329_v33 = vld [vmem:[#allocation2 + $0xe0] sm:$0xff]  ;;  %v11332_v34 = vld [vmem:[#allocation2 + $0xf0] sm:$0xff] }
 0x342   : > { %v12052_v42 = vmax.f32 %v11213_v14, 0.0  ;;  %8141 = vmatmul.mubr.f32.gmra.mrb[30].mxu1 %v11206_v22 }
 0x343   : > { %v12053_v43 = vmax.f32 %v11217_v6, 0.0  ;;  %8175 = vmatprep.mubr.f32.mxu1 %v9890_v28 }
 0x344   : > { %3073 = vst [vmem:[#allocation2 + $0x189] sm:$0xff] %v12052_v42  ;;  %v11356_v29 = vld [vmem:[#allocation2 + $0x150] sm:$0xff]  ;;  %v11359_v30 = vld [vmem:[#allocation2 + $0x158] sm:$0xff] }
 0x345   : > { %3072 = vst [vmem:[#allocation2 + $0x181] sm:$0xff] %v12053_v43  ;;  %v11404_v42 = vld [vmem:[#allocation2 + $0x4a] sm:$0xff]  ;;  %v6358_v43 = vld [vmem:[%s12016_s3 + $0x1d8] sm:$0xff] }
 0x346   : > { %8176 = vmatmul.mubr.f32.vlgmr.msra.gmra.mrb[0].mxu1 %v9890_v28  ;;  %v11254_v28 = vld [vmem:[#allocation2 + $0x30] sm:$0xff]  ;;  %12156 = vst [vmem:[#allocation6_spill] sm:$0xff] %v11404_v42 }
 0x347   : > { %8178 = vmatprep.mubr.f32.mxu1 %v11241_v58  ;;  %9138 = vmatpush3.bf16.msra.mxu1 %v11101_v57  ;;  %v9147_v57 = vpack.c.bf16 %v6338_v24, %v6337_v3  ;;  %v11347_v3 = vld [vmem:[#allocation2 + $0x128] sm:$0xff]  ;;  %v11350_v24 = vld [vmem:[#allocation2 + $0x138] sm:$0xff] }
 0x348   : > { %9140 = vmatprep.subr.bf16.mxu1 %v9139_v62  ;;  %v11365_v54 = vld [vmem:[#allocation2 + $0x170] sm:$0xff] }
 0x349   : > { %12154 = vst [vmem:[#allocation4_spill] sm:$0xff] %v11365_v54 }
 0x34a   : > { %8179 = vmatmul.mubr.f32.gmra.mrb[2].mxu1 %v11245_v15 }
 0x34b   : > { %8181 = vmatprep.mubr.f32.mxu1 %v11254_v28  ;;  %9142 = vmatpush3.bf16.msra.mxu1 %v9139_v62  ;;  %v11335_v62 = vld [vmem:[#allocation2 + $0xf8] sm:$0xff] }
 0x34c   : > { %9144 = vmatprep.subr.bf16.mxu1 %v9143_v59 }
 0x34e   : > { %8182 = vmatmul.mubr.f32.gmra.mrb[4].mxu1 %v11257_v25 }
 0x34f   : > { %8184 = vmatprep.mubr.f32.mxu1 %v11266_v38  ;;  %9146 = vmatpush3.bf16.msra.mxu1 %v9143_v59  ;;  %v11344_v59 = vld [vmem:[#allocation2 + $0x120] sm:$0xff] }
 0x350   : > { %9148 = vmatprep.subr.bf16.mxu1 %v9147_v57 }
 0x352   : > { %8185 = vmatmul.mubr.f32.gmra.mrb[6].mxu1 %v11269_v44 }
 0x353   : > { %8187 = vmatprep.mubr.f32.mxu1 %v11278_v63  ;;  %9150 = vmatpush3.bf16.msra.mxu1 %v9147_v57  ;;  %v11353_v57 = vld [vmem:[#allocation2 + $0x140] sm:$0xff] }
 0x354   : > { %9152 = vmatprep.subr.bf16.mxu1 %v9151_v39 }
 0x356   : > { %8188 = vmatmul.mubr.f32.gmra.mrb[8].mxu1 %v11281_v9 }
 0x357   : > { %8190 = vmatprep.mubr.f32.mxu1 %v11290_v20  ;;  %9154 = vmatpush3.bf16.msra.mxu1 %v9151_v39  ;;  %v11362_v39 = vld [vmem:[#allocation2 + $0x168] sm:$0xff] }
 0x358   : > { %9156 = vmatprep.subr.bf16.mxu1 %v9155_v7  ;;  %12153 = vst [vmem:[#allocation3_spill] sm:$0xff] %v11362_v39 }
 0x35a   : > { %8191 = vmatmul.mubr.f32.gmra.mrb[10].mxu1 %v11293_v12 }
 0x35b   : > { %8193 = vmatprep.mubr.f32.mxu1 %v11302_v27  ;;  %9158 = vmatpush3.bf16.msra.mxu1 %v9155_v7  ;;  %v6349_v7 = vld [vmem:[%s12016_s3 + $0x190] sm:$0xff] }
 0x35c   : > { %9160 = vmatprep.subr.bf16.mxu1 %v9159_v35 }
 0x35e   : > { %8194 = vmatmul.mubr.f32.gmra.mrb[12].mxu1 %v11305_v21 }
 0x35f   : > { %8196 = vmatprep.mubr.f32.mxu1 %v11314_v56  ;;  %9162 = vmatpush3.bf16.msra.mxu1 %v9159_v35  ;;  %v9171_v35 = vpack.c.bf16 %v6350_v13, %v6349_v7  ;;  %v6354_v7 = vld [vmem:[%s12016_s3 + $0x1b8] sm:$0xff] }
 0x360   : > { %9164 = vmatprep.subr.bf16.mxu1 %v9163_v46  ;;  %v11392_v13 = vld [vmem:[#allocation2 + $0x32] sm:$0xff] }
 0x362   : > { %8197 = vmatmul.mubr.f32.gmra.mrb[14].mxu1 %v11317_v1 }
 0x363   : > { %8199 = vmatprep.mubr.f32.mxu1 %v11320_v2  ;;  %9166 = vmatpush3.bf16.msra.mxu1 %v9163_v46  ;;  %v11380_v46 = vld [vmem:[#allocation2 + $0x1a] sm:$0xff] }
 0x364   : > { %9168 = vmatprep.subr.bf16.mxu1 %v9167_v61 }
 0x366   : > { %8200 = vmatmul.mubr.f32.gmra.mrb[16].mxu1 %v11323_v5 }
 0x367   : > { %8202 = vmatprep.mubr.f32.mxu1 %v11326_v60 }
 0x36a   : > { %8203 = vmatmul.mubr.f32.gmra.mrb[18].mxu1 %v11329_v33 }
 0x36b   : > { %8205 = vmatprep.mubr.f32.mxu1 %v11332_v34 }
 0x36e   : > { %8206 = vmatmul.mubr.f32.gmra.mrb[20].mxu1 %v11335_v62 }
 0x36f   : > { %8208 = vmatprep.mubr.f32.mxu1 %v11338_v10 }
 0x372   : > { %8209 = vmatmul.mubr.f32.gmra.mrb[22].mxu1 %v11341_v49 }
 0x373   : > { %8211 = vmatprep.mubr.f32.mxu1 %v11344_v59 }
 0x376   : > { %8212 = vmatmul.mubr.f32.gmra.mrb[24].mxu1 %v11347_v3 }
 0x377   : > { %8214 = vmatprep.mubr.f32.mxu1 %v11350_v24 }
 0x37a   : > { %8215 = vmatmul.mubr.f32.gmra.mrb[26].mxu1 %v11353_v57 }
 0x37b   : > { %8217 = vmatprep.mubr.f32.mxu1 %v11356_v29 }
 0x37e   : > { %8218 = vmatmul.mubr.f32.gmra.mrb[28].mxu1 %v11359_v30 }
 0x37f   : > { %8220 = vmatprep.mubr.f32.mxu1 %v11362_v39 }
 0x382   : > { %8221 = vmatmul.mubr.f32.gmra.mrb[30].mxu1 %v11365_v54 }
 0x383   : > { %8255 = vmatprep.mubr.f32.mxu1 %v3621_v47  ;;  %v6353_v47 = vld [vmem:[%s12016_s3 + $0x1b0] sm:$0xff] }
 0x386   : > { %8256 = vmatmul.mubr.f32.vlgmr.msra.gmra.mrb[0].mxu1 %v3622_v31  ;;  %v11395_v31 = vld [vmem:[#allocation2 + $0x3a] sm:$0xff] }
 0x387   : > { %8258 = vmatprep.mubr.f32.mxu1 %v11380_v46  ;;  %9170 = vmatpush3.bf16.msra.mxu1 %v9167_v61  ;;  %v9179_v61 = vpack.c.bf16 %v6354_v7, %v6353_v47  ;;  %12155 = vst [vmem:[#allocation5_spill] sm:$0xff] %v11395_v31  ;;  %v11407_v47 = vld [vmem:[#allocation2 + $0x52] sm:$0xff] }
 0x388   : > { %9172 = vmatprep.subr.bf16.mxu1 %v9171_v35  ;;  %12157 = vst [vmem:[#allocation7_spill] sm:$0xff] %v11407_v47  ;;  %v6357_v7 = vld [vmem:[%s12016_s3 + $0x1d0] sm:$0xff] }
 0x38a   : > { %8259 = vmatmul.mubr.f32.gmra.mrb[2].mxu1 %v11383_v51 }
 0x38b   : > { %8261 = vmatprep.mubr.f32.mxu1 %v11392_v13  ;;  %9174 = vmatpush3.bf16.msra.mxu1 %v9171_v35  ;;  %v9183_v35 = vpack.c.bf16 %v6356_v41, %v6355_v40  ;;  %v11419_v40 = vld [vmem:[#allocation2 + $0x6a] sm:$0xff]  ;;  %v6359_v41 = vld [vmem:[%s12016_s3 + $0x1e0] sm:$0xff] }
 0x38c   : > { %9176 = vmatprep.subr.bf16.mxu1 %v9175_v50  ;;  %12159 = vst [vmem:[#allocation9_spill] sm:$0xff] %v11419_v40 }
 0x38e   : > { %8262 = vmatmul.mubr.f32.gmra.mrb[4].mxu1 %v11395_v31  ;;  %v11416_v31 = vld [vmem:[#allocation2 + $0x62] sm:$0xff] }
 0x38f   : > { %8264 = vmatprep.mubr.f32.mxu1 %v11404_v42  ;;  %9178 = vmatpush3.bf16.msra.mxu1 %v9175_v50  ;;  %12158 = vst [vmem:[#allocation8_spill] sm:$0xff] %v11416_v31  ;;  %v9187_v50 = vpack.c.bf16 %v6358_v43, %v6357_v7  ;;  %v6360_v42 = vld [vmem:[%s12016_s3 + $0x1e8] sm:$0xff]  ;;  %v6361_v7 = vld [vmem:[%s12016_s3 + $0x1f0] sm:$0xff] }
 0x390   : > { %9180 = vmatprep.subr.bf16.mxu1 %v9179_v61  ;;  %v11431_v43 = vld [vmem:[#allocation2 + $0x82] sm:$0xff] }
 0x391   : > { %12161 = vst [vmem:[#allocation11_spill] sm:$0xff] %v11431_v43 }
 0x392   : > { %8265 = vmatmul.mubr.f32.gmra.mrb[6].mxu1 %v11407_v47  ;;  %v11428_v47 = vld [vmem:[#allocation2 + $0x7a] sm:$0xff] }
 0x393   : > { %8267 = vmatprep.mubr.f32.mxu1 %v11416_v31  ;;  %9182 = vmatpush3.bf16.msra.mxu1 %v9179_v61  ;;  %12160 = vst [vmem:[#allocation10_spill] sm:$0xff] %v11428_v47  ;;  %v9191_v61 = vpack.c.bf16 %v6360_v42, %v6359_v41  ;;  %v6362_v31 = vld [vmem:[%s12016_s3 + $0x1f8] sm:$0xff]  ;;  %v6363_v41 = vld [vmem:[%s12016_s3 + $0x200] sm:$0xff] }
 0x394   : > { %9184 = vmatprep.subr.bf16.mxu1 %v9183_v35  ;;  %v11443_v42 = vld [vmem:[#allocation2 + $0x9a] sm:$0xff] }
 0x395   : > { %12163 = vst [vmem:[#allocation13_spill] sm:$0xff] %v11443_v42 }
 0x396   : > { %8268 = vmatmul.mubr.f32.gmra.mrb[8].mxu1 %v11419_v40  ;;  %v11440_v40 = vld [vmem:[#allocation2 + $0x92] sm:$0xff] }
 0x397   : > { %8270 = vmatprep.mubr.f32.mxu1 %v11428_v47  ;;  %9186 = vmatpush3.bf16.msra.mxu1 %v9183_v35  ;;  %12162 = vst [vmem:[#allocation12_spill] sm:$0xff] %v11440_v40  ;;  %v9195_v35 = vpack.c.bf16 %v6362_v31, %v6361_v7  ;;  %v6364_v47 = vld [vmem:[%s12016_s3 + $0x208] sm:$0xff]  ;;  %v11455_v31 = vld [vmem:[#allocation2 + $0xb2] sm:$0xff] }
 0x398   : > { %9188 = vmatprep.subr.bf16.mxu1 %v9187_v50  ;;  %v11458_v7 = vld [vmem:[#allocation2 + $0xc2] sm:$0xff] }
 0x399   : > { %12164 = vst [vmem:[#allocation14_spill] sm:$0xff] %v11458_v7 }
 0x39a   : > { %8271 = vmatmul.mubr.f32.gmra.mrb[10].mxu1 %v11431_v43  ;;  %v11452_v43 = vld [vmem:[#allocation2 + $0xaa] sm:$0xff] }
 0x39b   : > { %8273 = vmatprep.mubr.f32.mxu1 %v11440_v40  ;;  %9190 = vmatpush3.bf16.msra.mxu1 %v9187_v50  ;;  %v9199_v50 = vpack.c.bf16 %v6364_v47, %v6363_v41  ;;  %v11461_v40 = vld [vmem:[#allocation2 + $0xca] sm:$0xff]  ;;  %v11470_v47 = vld [vmem:[#allocation2 + $0xf2] sm:$0xff]  ;;  %v11473_v41 = vld [vmem:[#allocation2 + $0xfa] sm:$0xff] }
 0x39c   : > { %9192 = vmatprep.subr.bf16.mxu1 %v9191_v61  ;;  %12165 = vst [vmem:[#allocation15_spill] sm:$0xff] %v11461_v40  ;;  %12168 = vst [vmem:[#allocation18_spill] sm:$0xff] %v11470_v47 }
 0x39d   : > { %12169 = vst [vmem:[#allocation19_spill] sm:$0xff] %v11473_v41 }
 0x39e   : > { %8274 = vmatmul.mubr.f32.gmra.mrb[12].mxu1 %v11443_v42  ;;  %v11464_v42 = vld [vmem:[#allocation2 + $0xda] sm:$0xff] }
 0x39f   : > { %8276 = vmatprep.mubr.f32.mxu1 %v11452_v43  ;;  %9194 = vmatpush3.bf16.msra.mxu1 %v9191_v61  ;;  %12166 = vst [vmem:[#allocation16_spill] sm:$0xff] %v11464_v42  ;;  %v11467_v61 = vld [vmem:[#allocation2 + $0xe2] sm:$0xff] }
 0x3a0   : > { %9196 = vmatprep.subr.bf16.mxu1 %v9195_v35  ;;  %12167 = vst [vmem:[#allocation17_spill] sm:$0xff] %v11467_v61 }
 0x3a2   : > { %8277 = vmatmul.mubr.f32.gmra.mrb[14].mxu1 %v11455_v31 }
 0x3a3   : > { %8279 = vmatprep.mubr.f32.mxu1 %v11458_v7  ;;  %9198 = vmatpush3.bf16.msra.mxu1 %v9195_v35  ;;  %v11476_v35 = vld [vmem:[#allocation2 + $0x10a] sm:$0xff] }
 0x3a4   : > { %9200 = vmatprep.subr.bf16.mxu1 %v9199_v50  ;;  %12170 = vst [vmem:[#allocation20_spill] sm:$0xff] %v11476_v35 }
 0x3a6   : > { %8280 = vmatmul.mubr.f32.gmra.mrb[16].mxu1 %v11461_v40  ;;  %v11479_v40 = vld [vmem:[#allocation2 + $0x112] sm:$0xff] }
 0x3a7   : > { %8282 = vmatprep.mubr.f32.mxu1 %v11464_v42  ;;  %12171 = vst [vmem:[#allocation21_spill] sm:$0xff] %v11479_v40  ;;  %v11482_v42 = vld [vmem:[#allocation2 + $0x122] sm:$0xff] }
 0x3a8   : > { %12172 = vst [vmem:[#allocation22_spill] sm:$0xff] %v11482_v42 }
 0x3aa   : > { %8283 = vmatmul.mubr.f32.gmra.mrb[18].mxu1 %v11467_v61  ;;  %v11485_v61 = vld [vmem:[#allocation2 + $0x12a] sm:$0xff] }
 0x3ab   : > { %8285 = vmatprep.mubr.f32.mxu1 %v11470_v47  ;;  %12173 = vst [vmem:[#allocation23_spill] sm:$0xff] %v11485_v61  ;;  %v11488_v47 = vld [vmem:[#allocation2 + $0x13a] sm:$0xff] }
 0x3ac   : > { %12174 = vst [vmem:[#allocation24_spill] sm:$0xff] %v11488_v47 }
 0x3ae   : > { %8286 = vmatmul.mubr.f32.gmra.mrb[20].mxu1 %v11473_v41  ;;  %v11491_v41 = vld [vmem:[#allocation2 + $0x142] sm:$0xff] }
 0x3af   : > { %8288 = vmatprep.mubr.f32.mxu1 %v11476_v35  ;;  %12175 = vst [vmem:[#allocation25_spill] sm:$0xff] %v11491_v41  ;;  %v11494_v35 = vld [vmem:[#allocation2 + $0x152] sm:$0xff] }
 0x3b0   : > { %12176 = vst [vmem:[#allocation26_spill] sm:$0xff] %v11494_v35 }
 0x3b2   : > { %8289 = vmatmul.mubr.f32.gmra.mrb[22].mxu1 %v11479_v40  ;;  %v11497_v40 = vld [vmem:[#allocation2 + $0x15a] sm:$0xff] }
 0x3b3   : > { %8291 = vmatprep.mubr.f32.mxu1 %v11482_v42  ;;  %12177 = vst [vmem:[#allocation27_spill] sm:$0xff] %v11497_v40  ;;  %v11500_v42 = vld [vmem:[#allocation2 + $0x16a] sm:$0xff] }
 0x3b4   : > { %12178 = vst [vmem:[#allocation28_spill] sm:$0xff] %v11500_v42 }
 0x3b6   : > { %8292 = vmatmul.mubr.f32.gmra.mrb[24].mxu1 %v11485_v61  ;;  %v11503_v61 = vld [vmem:[#allocation2 + $0x172] sm:$0xff] }
 0x3b7   : > { %8294 = vmatprep.mubr.f32.mxu1 %v11488_v47  ;;  %v6365_v47 = vld [vmem:[%s12016_s3 + $0x210] sm:$0xff] }
 0x3ba   : > { %8295 = vmatmul.mubr.f32.gmra.mrb[26].mxu1 %v11491_v41  ;;  %v6366_v41 = vld [vmem:[%s12016_s3 + $0x218] sm:$0xff] }
 0x3bb   : > { %8297 = vmatprep.mubr.f32.mxu1 %v11494_v35  ;;  %v9203_v35 = vpack.c.bf16 %v6366_v41, %v6365_v47  ;;  %v6370_v47 = vld [vmem:[%s12016_s3 + $0x238] sm:$0xff]  ;;  %v6373_v41 = vld [vmem:[%s12016_s3 + $0x250] sm:$0xff] }
 0x3be   : > { %8298 = vmatmul.mubr.f32.gmra.mrb[28].mxu1 %v11497_v40  ;;  %v6367_v40 = vld [vmem:[%s12016_s3 + $0x220] sm:$0xff] }
 0x3bf   : > { %8300 = vmatprep.mubr.f32.mxu1 %v11500_v42  ;;  %v6368_v42 = vld [vmem:[%s12016_s3 + $0x228] sm:$0xff] }
 0x3c0   : > { %v9207_v7 = vpack.c.bf16 %v6368_v42, %v6367_v40  ;;  %v6372_v40 = vld [vmem:[%s12016_s3 + $0x248] sm:$0xff] }
 0x3c2   : > { %8301 = vmatmul.mubr.f32.gmra.mrb[30].mxu1 %v11503_v61 }
 0x3c3   : > { %8335 = vmatprep.mubr.f32.mxu1 %v11241_v58  ;;  %v6369_v58 = vld [vmem:[%s12016_s3 + $0x230] sm:$0xff] }
 0x3c6   : > { %8336 = vmatmul.mubr.f32.vlgmr.msra.gmra.mrb[0].mxu1 %v11245_v15  ;;  %v9211_v15 = vpack.c.bf16 %v6370_v47, %v6369_v58  ;;  %v6376_v47 = vld [vmem:[%s12016_s3 + $0x268] sm:$0xff] }
 0x3c7   : > { %8338 = vmatprep.mubr.f32.mxu1 %v11254_v28  ;;  %9202 = vmatpush3.bf16.msra.mxu1 %v9199_v50  ;;  %v6371_v50 = vld [vmem:[%s12016_s3 + $0x240] sm:$0xff] }
 0x3c8   : > { %9204 = vmatprep.subr.bf16.mxu1 %v9203_v35  ;;  %v9215_v42 = vpack.c.bf16 %v6372_v40, %v6371_v50  ;;  %v6378_v40 = vld [vmem:[%s12016_s3 + $0x278] sm:$0xff] }
 0x3ca   : > { %8339 = vmatmul.mubr.f32.gmra.mrb[2].mxu1 %v11257_v25 }
 0x3cb   : > { %8341 = vmatprep.mubr.f32.mxu1 %v11266_v38  ;;  %9206 = vmatpush3.bf16.msra.mxu1 %v9203_v35  ;;  %v6374_v35 = vld [vmem:[%s12016_s3 + $0x258] sm:$0xff] }
 0x3cc   : > { %9208 = vmatprep.subr.bf16.mxu1 %v9207_v7  ;;  %v9219_v58 = vpack.c.bf16 %v6374_v35, %v6373_v41  ;;  %v6380_v35 = vld [vmem:[%s12016_s3 + $0x288] sm:$0xff] }
 0x3ce   : > { %8342 = vmatmul.mubr.f32.gmra.mrb[4].mxu1 %v11269_v44 }
 0x3cf   : > { %8344 = vmatprep.mubr.f32.mxu1 %v11278_v63  ;;  %9210 = vmatpush3.bf16.msra.mxu1 %v9207_v7  ;;  %v6375_v7 = vld [vmem:[%s12016_s3 + $0x260] sm:$0xff] }
 0x3d0   : > { %9212 = vmatprep.subr.bf16.mxu1 %v9211_v15  ;;  %v9223_v50 = vpack.c.bf16 %v6376_v47, %v6375_v7  ;;  %v11587_v47 = vld [vmem:[#allocation2 + $0x188] sm:$0xff] }
 0x3d1   : > { %12180 = vst [vmem:[#allocation30_spill] sm:$0xff] %v11587_v47 }
 0x3d2   : > { %8345 = vmatmul.mubr.f32.gmra.mrb[6].mxu1 %v11281_v9 }
 0x3d3   : > { %8347 = vmatprep.mubr.f32.mxu1 %v11290_v20  ;;  %9214 = vmatpush3.bf16.msra.mxu1 %v9211_v15  ;;  %v6377_v15 = vld [vmem:[%s12016_s3 + $0x270] sm:$0xff] }
 0x3d4   : > { %9216 = vmatprep.subr.bf16.mxu1 %v9215_v42  ;;  %v9227_v41 = vpack.c.bf16 %v6378_v40, %v6377_v15  ;;  %v6382_v15 = vld [vmem:[%s12016_s3 + $0x298] sm:$0xff] }
 0x3d5   : > { %v4233_v40 = vld [vmem:[#allocation2 + $0x19] sm:$0xff] }
 0x3d6   : > { %8348 = vmatmul.mubr.f32.gmra.mrb[8].mxu1 %v11293_v12 }
 0x3d7   : > { %8350 = vmatprep.mubr.f32.mxu1 %v11302_v27  ;;  %9218 = vmatpush3.bf16.msra.mxu1 %v9215_v42  ;;  %v6379_v42 = vld [vmem:[%s12016_s3 + $0x280] sm:$0xff] }
 0x3d8   : > { %9220 = vmatprep.subr.bf16.mxu1 %v9219_v58  ;;  %v9231_v7 = vpack.c.bf16 %v6380_v35, %v6379_v42  ;;  %v4234_v42 = vld [vmem:[#allocation2 + $0x21] sm:$0xff] }
 0x3d9   : > { %v6383_v35 = vld [vmem:[%s12016_s3 + $0x2a0] sm:$0xff] }
 0x3da   : > { %8351 = vmatmul.mubr.f32.gmra.mrb[10].mxu1 %v11305_v21 }
 0x3db   : > { %8353 = vmatprep.mubr.f32.mxu1 %v11314_v56  ;;  %9222 = vmatpush3.bf16.msra.mxu1 %v9219_v58  ;;  %v11584_v58 = vld [vmem:[#allocation2 + $0x180] sm:$0xff] }
 0x3dc   : > { %9224 = vmatprep.subr.bf16.mxu1 %v9223_v50  ;;  %12179 = vst [vmem:[#allocation29_spill] sm:$0xff] %v11584_v58 }
 0x3de   : > { %8354 = vmatmul.mubr.f32.gmra.mrb[12].mxu1 %v11317_v1 }
 0x3df   : > { %8356 = vmatprep.mubr.f32.mxu1 %v11320_v2  ;;  %9226 = vmatpush3.bf16.msra.mxu1 %v9223_v50  ;;  %v6381_v50 = vld [vmem:[%s12016_s3 + $0x290] sm:$0xff] }
 0x3e0   : > { %9228 = vmatprep.subr.bf16.mxu1 %v9227_v41 }
 0x3e2   : > { %8357 = vmatmul.mubr.f32.gmra.mrb[14].mxu1 %v11323_v5 }
 0x3e3   : > { %8359 = vmatprep.mubr.f32.mxu1 %v11326_v60  ;;  %9230 = vmatpush3.bf16.msra.mxu1 %v9227_v41  ;;  %v9235_v41 = vpack.c.bf16 %v6382_v15, %v6381_v50  ;;  %v6385_v50 = vld [vmem:[%s12016_s3 + $0x2b0] sm:$0xff]  ;;  %v6386_v15 = vld [vmem:[%s12016_s3 + $0x2b8] sm:$0xff] }
 0x3e4   : > { %9232 = vmatprep.subr.bf16.mxu1 %v9231_v7 }
 0x3e6   : > { %8360 = vmatmul.mubr.f32.gmra.mrb[16].mxu1 %v11329_v33 }
 0x3e7   : > { %8362 = vmatprep.mubr.f32.mxu1 %v11332_v34 }
 0x3ea   : > { %8363 = vmatmul.mubr.f32.gmra.mrb[18].mxu1 %v11335_v62 }
 0x3eb   : > { %8365 = vmatprep.mubr.f32.mxu1 %v11338_v10 }
 0x3ee   : > { %8366 = vmatmul.mubr.f32.gmra.mrb[20].mxu1 %v11341_v49 }
 0x3ef   : > { %8368 = vmatprep.mubr.f32.mxu1 %v11344_v59 }
 0x3f2   : > { %8369 = vmatmul.mubr.f32.gmra.mrb[22].mxu1 %v11347_v3 }
 0x3f3   : > { %8371 = vmatprep.mubr.f32.mxu1 %v11350_v24 }
 0x3f6   : > { %8372 = vmatmul.mubr.f32.gmra.mrb[24].mxu1 %v11353_v57 }
 0x3f7   : > { %8374 = vmatprep.mubr.f32.mxu1 %v11356_v29 }
 0x3fa   : > { %8375 = vmatmul.mubr.f32.gmra.mrb[26].mxu1 %v11359_v30 }
 0x3fb   : > { %8377 = vmatprep.mubr.f32.mxu1 %v11362_v39  ;;  %v11605_v39 = vld [vmem:[#allocation2 + $0x39] sm:$0xff] }
 0x3fc   : > { %12181 = vst [vmem:[#allocation31_spill] sm:$0xff] %v11605_v39 }
 0x3fe   : > { %8378 = vmatmul.mubr.f32.gmra.mrb[28].mxu1 %v11365_v54  ;;  %v11602_v54 = vld [vmem:[#allocation2 + $0x31] sm:$0xff] }
 0x3ff   : > { %8380 = vmatprep.mubr.f32.mxu1 %v11584_v58  ;;  %v6384_v58 = vld [vmem:[%s12016_s3 + $0x2a8] sm:$0xff] }
 0x402   : > { %8381 = vmatmul.mubr.f32.gmra.mrb[30].mxu1 %v11587_v47  ;;  %v9239_v47 = vpack.c.bf16 %v6384_v58, %v6383_v35  ;;  %v11617_v58 = vld [vmem:[#allocation2 + $0x51] sm:$0xff]  ;;  %v6388_v35 = vld [vmem:[%s12016_s3 + $0x2c8] sm:$0xff] }
 0x403   : > { %8415 = vmatprep.mubr.f32.mxu1 %v4233_v40  ;;  %v11614_v40 = vld [vmem:[#allocation2 + $0x49] sm:$0xff]  ;;  %12183 = vst [vmem:[#allocation33_spill] sm:$0xff] %v11617_v58 }
 0x404   : > { %12182 = vst [vmem:[#allocation32_spill] sm:$0xff] %v11614_v40 }
 0x406   : > { %8416 = vmatmul.mubr.f32.vlgmr.msra.gmra.mrb[0].mxu1 %v4234_v42  ;;  %v6387_v42 = vld [vmem:[%s12016_s3 + $0x2c0] sm:$0xff] }
 0x407   : > { %8418 = vmatprep.mubr.f32.mxu1 %v11602_v54  ;;  %9234 = vmatpush3.bf16.msra.mxu1 %v9231_v7  ;;  %v9243_v7 = vpack.c.bf16 %v6386_v15, %v6385_v50  ;;  %v11629_v50 = vld [vmem:[#allocation2 + $0x69] sm:$0xff] }
 0x408   : > { %9236 = vmatprep.subr.bf16.mxu1 %v9235_v41  ;;  %v6389_v15 = vld [vmem:[%s12016_s3 + $0x2d0] sm:$0xff] }
 0x40a   : > { %8419 = vmatmul.mubr.f32.gmra.mrb[2].mxu1 %v11605_v39  ;;  %v11626_v39 = vld [vmem:[#allocation2 + $0x61] sm:$0xff] }
 0x40b   : > { %8421 = vmatprep.mubr.f32.mxu1 %v11614_v40  ;;  %9238 = vmatpush3.bf16.msra.mxu1 %v9235_v41  ;;  %12184 = vst [vmem:[#allocation34_spill] sm:$0xff] %v11626_v39  ;;  %v9247_v41 = vpack.c.bf16 %v6388_v35, %v6387_v42  ;;  %v6390_v40 = vld [vmem:[%s12016_s3 + $0x2d8] sm:$0xff]  ;;  %v11641_v42 = vld [vmem:[#allocation2 + $0x81] sm:$0xff] }
 0x40c   : > { %9240 = vmatprep.subr.bf16.mxu1 %v9239_v47  ;;  %v6391_v35 = vld [vmem:[%s12016_s3 + $0x2e0] sm:$0xff] }
 0x40e   : > { %8422 = vmatmul.mubr.f32.gmra.mrb[4].mxu1 %v11617_v58  ;;  %v11638_v58 = vld [vmem:[#allocation2 + $0x79] sm:$0xff] }
 0x40f   : > { %8424 = vmatprep.mubr.f32.mxu1 %v11626_v39  ;;  %9242 = vmatpush3.bf16.msra.mxu1 %v9239_v47  ;;  %12185 = vst [vmem:[#allocation35_spill] sm:$0xff] %v11638_v58  ;;  %v9251_v47 = vpack.c.bf16 %v6390_v40, %v6389_v15  ;;  %v6392_v39 = vld [vmem:[%s12016_s3 + $0x2e8] sm:$0xff]  ;;  %v6393_v40 = vld [vmem:[%s12016_s3 + $0x2f0] sm:$0xff]  ;;  %v6394_v15 = vld [vmem:[%s12016_s3 + $0x2f8] sm:$0xff] }
 0x410   : > { %9244 = vmatprep.subr.bf16.mxu1 %v9243_v7 }
 0x412   : > { %8425 = vmatmul.mubr.f32.gmra.mrb[6].mxu1 %v11629_v50 }
 0x413   : > { %8427 = vmatprep.mubr.f32.mxu1 %v11638_v58  ;;  %9246 = vmatpush3.bf16.msra.mxu1 %v9243_v7  ;;  %v9255_v58 = vpack.c.bf16 %v6392_v39, %v6391_v35  ;;  %v11651_v7 = vld [vmem:[#allocation2 + $0x99] sm:$0xff] }
 0x414   : > { %9248 = vmatprep.subr.bf16.mxu1 %v9247_v41  ;;  %v6395_v39 = vld [vmem:[%s12016_s3 + $0x300] sm:$0xff] }
 0x416   : > { %8428 = vmatmul.mubr.f32.gmra.mrb[8].mxu1 %v11641_v42 }
 0x417   : > { %8430 = vmatprep.mubr.f32.mxu1 %v11121_v8  ;;  %9250 = vmatpush3.bf16.msra.mxu1 %v9247_v41  ;;  %v9259_v8 = vpack.c.bf16 %v6394_v15, %v6393_v40  ;;  %v6396_v41 = vld [vmem:[%s12016_s3 + $0x308] sm:$0xff]  ;;  %v12194_v40 = vld [vmem:[#allocation11_spill] sm:$0xff]  ;;  %v12195_v15 = vld [vmem:[#allocation12_spill] sm:$0xff] }
 0x418   : > { %9252 = vmatprep.subr.bf16.mxu1 %v9251_v47  ;;  %v9263_v35 = vpack.c.bf16 %v6396_v41, %v6395_v39  ;;  %v6409_v39 = vld [vmem:[%s12016_s3 + $0x370] sm:$0xff]  ;;  %v6410_v41 = vld [vmem:[%s12016_s3 + $0x378] sm:$0xff] }
 0x41a   : > { %8431 = vmatmul.mubr.f32.gmra.mrb[10].mxu1 %v11651_v7 }
 0x41b   : > { %8433 = vmatprep.mubr.f32.mxu1 %v11129_v11  ;;  %9254 = vmatpush3.bf16.msra.mxu1 %v9251_v47  ;;  %v6397_v11 = vld [vmem:[%s12016_s3 + $0x310] sm:$0xff]  ;;  %v6408_v47 = vld [vmem:[%s12016_s3 + $0x368] sm:$0xff] }
 0x41c   : > { %9256 = vmatprep.subr.bf16.mxu1 %v9255_v58 }
 0x41e   : > { %8434 = vmatmul.mubr.f32.gmra.mrb[12].mxu1 %v11127_v52  ;;  %v12186_v52 = vmax.f32 %v11217_v6, 0.0  ;;  %v6406_v6 = vld [vmem:[%s12016_s3 + $0x358] sm:$0xff] }
 0x41f   : > { %8436 = vmatprep.mubr.f32.mxu1 %v11139_v16  ;;  %9258 = vmatpush3.bf16.msra.mxu1 %v9255_v58  ;;  %v12187_v16 = vmax.f32 %v11213_v14, 0.0  ;;  %v6405_v14 = vld [vmem:[%s12016_s3 + $0x350] sm:$0xff]  ;;  %v6407_v58 = vld [vmem:[%s12016_s3 + $0x360] sm:$0xff] }
 0x420   : > { %9260 = vmatprep.subr.bf16.mxu1 %v9259_v8 }
 0x422   : > { %8437 = vmatmul.mubr.f32.gmra.mrb[14].mxu1 %v11136_v19  ;;  %v6398_v19 = vld [vmem:[%s12016_s3 + $0x318] sm:$0xff] }
 0x423   : > { %8439 = vmatprep.mubr.f32.mxu1 %v11149_v37  ;;  %9262 = vmatpush3.bf16.msra.mxu1 %v9259_v8  ;;  %v6399_v37 = vld [vmem:[%s12016_s3 + $0x320] sm:$0xff]  ;;  %v9287_v8 = vpack.c.bf16 %v6408_v47, %v6407_v58  ;;  %v6418_v47 = vld [vmem:[%s12016_s3 + $0x3b8] sm:$0xff] }
 0x424   : > { %9264 = vmatprep.subr.bf16.mxu1 %v9263_v35 }
 0x426   : > { %8440 = vmatmul.mubr.f32.gmra.mrb[16].mxu1 %v11146_v32  ;;  %v9267_v32 = vpack.c.bf16 %v6398_v19, %v6397_v11  ;;  %v6411_v11 = vld [vmem:[%s12016_s3 + $0x380] sm:$0xff]  ;;  %v6412_v19 = vld [vmem:[%s12016_s3 + $0x388] sm:$0xff] }
 0x427   : > { %8442 = vmatprep.mubr.f32.mxu1 %v11159_v53 }
 0x42a   : > { %8443 = vmatmul.mubr.f32.gmra.mrb[18].mxu1 %v11156_v48  ;;  %v6400_v48 = vld [vmem:[%s12016_s3 + $0x328] sm:$0xff] }
 0x42b   : > { %8445 = vmatprep.mubr.f32.mxu1 %v11169_v23  ;;  %v9271_v53 = vpack.c.bf16 %v6400_v48, %v6399_v37  ;;  %v6402_v23 = vld [vmem:[%s12016_s3 + $0x338] sm:$0xff]  ;;  %v12198_v37 = vld [vmem:[#allocation15_spill] sm:$0xff]  ;;  %v12200_v48 = vld [vmem:[#allocation17_spill] sm:$0xff] }
 0x42e   : > { %8446 = vmatmul.mubr.f32.gmra.mrb[20].mxu1 %v11166_v0  ;;  %v6401_v0 = vld [vmem:[%s12016_s3 + $0x330] sm:$0xff] }
 0x42f   : > { %8448 = vmatprep.mubr.f32.mxu1 %v11179_v26  ;;  %v12189_v26 = vld [vmem:[#allocation6_spill] sm:$0xff] }
 0x432   : > { %8449 = vmatmul.mubr.f32.gmra.mrb[22].mxu1 %v11176_v36  ;;  %v12188_v36 = vld [vmem:[#allocation5_spill] sm:$0xff] }
 0x433   : > { %8451 = vmatprep.mubr.f32.mxu1 %v11189_v45  ;;  %v6403_v45 = vld [vmem:[%s12016_s3 + $0x340] sm:$0xff] }
 0x436   : > { %8452 = vmatmul.mubr.f32.gmra.mrb[24].mxu1 %v11186_v17  ;;  %v9275_v17 = vpack.c.bf16 %v6402_v23, %v6401_v0  ;;  %v12202_v0 = vld [vmem:[#allocation19_spill] sm:$0xff]  ;;  %v12203_v23 = vld [vmem:[#allocation20_spill] sm:$0xff] }
 0x437   : > { %8454 = vmatprep.mubr.f32.mxu1 %v11199_v55  ;;  %v12190_v55 = vld [vmem:[#allocation7_spill] sm:$0xff] }
 0x43a   : > { %8455 = vmatmul.mubr.f32.gmra.mrb[26].mxu1 %v11196_v18  ;;  %v6404_v18 = vld [vmem:[%s12016_s3 + $0x348] sm:$0xff] }
 0x43b   : > { %8457 = vmatprep.mubr.f32.mxu1 %v11209_v4  ;;  %v9279_v4 = vpack.c.bf16 %v6404_v18, %v6403_v45  ;;  %v12208_v45 = vld [vmem:[#allocation25_spill] sm:$0xff]  ;;  %v12209_v18 = vld [vmem:[#allocation26_spill] sm:$0xff] }
 0x43e   : > { %8458 = vmatmul.mubr.f32.gmra.mrb[28].mxu1 %v11206_v22  ;;  %v12191_v22 = vld [vmem:[#allocation8_spill] sm:$0xff] }
 0x43f   : > { %8460 = vmatprep.mubr.f32.mxu1 %v12186_v52  ;;  %v9291_v52 = vpack.c.bf16 %v6410_v41, %v6409_v39  ;;  %v6426_v39 = vld [vmem:[%s12016_s3 + $0x3f8] sm:$0xff]  ;;  %v6428_v41 = vld [vmem:[%s12016_s3 + $0x408] sm:$0xff] }
 0x442   : > { %8461 = vmatmul.mubr.f32.gmra.mrb[30].mxu1 %v12187_v16  ;;  %v12197_v16 = vld [vmem:[#allocation14_spill] sm:$0xff] }
 0x443   : > { %8495 = vmatprep.mubr.f32.mxu1 %v11380_v46  ;;  %v12192_v46 = vld [vmem:[#allocation9_spill] sm:$0xff] }
 0x446   : > { %8496 = vmatmul.mubr.f32.vlgmr.msra.gmra.mrb[0].mxu1 %v11383_v51  ;;  %v12193_v51 = vld [vmem:[#allocation10_spill] sm:$0xff] }
 0x447   : > { %8498 = vmatprep.mubr.f32.mxu1 %v11392_v13  ;;  %9266 = vmatpush3.bf16.msra.mxu1 %v9263_v35  ;;  %v9283_v13 = vpack.c.bf16 %v6406_v6, %v6405_v14  ;;  %v12196_v35 = vld [vmem:[#allocation13_spill] sm:$0xff]  ;;  %v11769_v14 = vld [vmem:[#allocation2 + $0x18a] sm:$0xff] }
 0x448   : > { %9268 = vmatprep.subr.bf16.mxu1 %v9267_v32  ;;  %v6413_v6 = vld [vmem:[%s12016_s3 + $0x390] sm:$0xff] }
 0x44a   : > { %8499 = vmatmul.mubr.f32.gmra.mrb[2].mxu1 %v12188_v36  ;;  %v12205_v36 = vld [vmem:[#allocation22_spill] sm:$0xff] }
 0x44b   : > { %8501 = vmatprep.mubr.f32.mxu1 %v12189_v26  ;;  %9270 = vmatpush3.bf16.msra.mxu1 %v9267_v32  ;;  %v9295_v32 = vpack.c.bf16 %v6412_v19, %v6411_v11  ;;  %v12206_v26 = vld [vmem:[#allocation23_spill] sm:$0xff]  ;;  %v6435_v19 = vld [vmem:[%s12016_s3 + $0x440] sm:$0xff] }
 0x44c   : > { %9272 = vmatprep.subr.bf16.mxu1 %v9271_v53 }
 0x44e   : > { %8502 = vmatmul.mubr.f32.gmra.mrb[4].mxu1 %v12190_v55  ;;  %v12210_v55 = vld [vmem:[#allocation27_spill] sm:$0xff] }
 0x44f   : > { %8504 = vmatprep.mubr.f32.mxu1 %v12191_v22  ;;  %9274 = vmatpush3.bf16.msra.mxu1 %v9271_v53  ;;  %v12201_v53 = vld [vmem:[#allocation18_spill] sm:$0xff]  ;;  %v12211_v22 = vld [vmem:[#allocation28_spill] sm:$0xff] }
 0x450   : > { %9276 = vmatprep.subr.bf16.mxu1 %v9275_v17 }
 0x452   : > { %8505 = vmatmul.mubr.f32.gmra.mrb[6].mxu1 %v12192_v46  ;;  %v6414_v46 = vld [vmem:[%s12016_s3 + $0x398] sm:$0xff] }
 0x453   : > { %8507 = vmatprep.mubr.f32.mxu1 %v12193_v51  ;;  %9278 = vmatpush3.bf16.msra.mxu1 %v9275_v17  ;;  %v12207_v17 = vld [vmem:[#allocation24_spill] sm:$0xff]  ;;  %v9299_v51 = vpack.c.bf16 %v6414_v46, %v6413_v6 }
 0x454   : > { %9280 = vmatprep.subr.bf16.mxu1 %v9279_v4  ;;  %v5168_v6 = vld [vmem:[#allocation2 + $0xf1] sm:$0xff]  ;;  %v5169_v46 = vld [vmem:[#allocation2 + $0xf9] sm:$0xff] }
 0x456   : > { %8508 = vmatmul.mubr.f32.gmra.mrb[8].mxu1 %v12194_v40  ;;  %v6420_v40 = vld [vmem:[%s12016_s3 + $0x3c8] sm:$0xff] }
 0x457   : > { %8510 = vmatprep.mubr.f32.mxu1 %v12195_v15  ;;  %9282 = vmatpush3.bf16.msra.mxu1 %v9279_v4  ;;  %v11766_v4 = vld [vmem:[#allocation2 + $0x182] sm:$0xff]  ;;  %v6422_v15 = vld [vmem:[%s12016_s3 + $0x3d8] sm:$0xff] }
 0x458   : > { %9284 = vmatprep.subr.bf16.mxu1 %v9283_v13 }
 0x45a   : > { %8511 = vmatmul.mubr.f32.gmra.mrb[10].mxu1 %v12196_v35  ;;  %v12218_v35 = vld [vmem:[#allocation33_spill] sm:$0xff] }
 0x45b   : > { %8513 = vmatprep.mubr.f32.mxu1 %v11452_v43  ;;  %9286 = vmatpush3.bf16.msra.mxu1 %v9283_v13  ;;  %v12199_v43 = vld [vmem:[#allocation16_spill] sm:$0xff]  ;;  %v6416_v13 = vld [vmem:[%s12016_s3 + $0x3a8] sm:$0xff] }
 0x45c   : > { %9288 = vmatprep.subr.bf16.mxu1 %v9287_v8 }
 0x45e   : > { %8514 = vmatmul.mubr.f32.gmra.mrb[12].mxu1 %v11455_v31  ;;  %v12204_v31 = vld [vmem:[#allocation21_spill] sm:$0xff] }
 0x45f   : > { %8516 = vmatprep.mubr.f32.mxu1 %v12197_v16  ;;  %9290 = vmatpush3.bf16.msra.mxu1 %v9287_v8  ;;  %v6424_v8 = vld [vmem:[%s12016_s3 + $0x3e8] sm:$0xff] }
 0x460   : > { %9292 = vmatprep.subr.bf16.mxu1 %v9291_v52  ;;  %v6436_v16 = vld [vmem:[%s12016_s3 + $0x448] sm:$0xff] }
 0x462   : > { %8517 = vmatmul.mubr.f32.gmra.mrb[14].mxu1 %v12198_v37  ;;  %v9343_v37 = vpack.c.bf16 %v6436_v16, %v6435_v19  ;;  %v5484_v19 = vld [vmem:[#allocation2 + $0x16a] sm:$0xff]  ;;  %v5485_v16 = vld [vmem:[#allocation2 + $0x172] sm:$0xff] }
 0x463   : > { %8519 = vmatprep.mubr.f32.mxu1 %v12199_v43  ;;  %9294 = vmatpush3.bf16.msra.mxu1 %v9291_v52  ;;  %v12219_v52 = vld [vmem:[#allocation34_spill] sm:$0xff]  ;;  %v6437_v43 = vld [vmem:[%s12016_s3 + $0x450] sm:$0xff] }
 0x464   : > { %9296 = vmatprep.subr.bf16.mxu1 %v9295_v32 }
 0x466   : > { %8520 = vmatmul.mubr.f32.gmra.mrb[16].mxu1 %v12200_v48  ;;  %v6438_v48 = vld [vmem:[%s12016_s3 + $0x458] sm:$0xff] }
 0x467   : > { %8522 = vmatprep.mubr.f32.mxu1 %v12201_v53  ;;  %v5160_v53 = vld [vmem:[#allocation2 + $0x91] sm:$0xff] }
 0x46a   : > { %8523 = vmatmul.mubr.f32.gmra.mrb[18].mxu1 %v12202_v0  ;;  %v6439_v0 = vld [vmem:[%s12016_s3 + $0x460] sm:$0xff] }
 0x46b   : > { %8525 = vmatprep.mubr.f32.mxu1 %v12203_v23  ;;  %v6440_v23 = vld [vmem:[%s12016_s3 + $0x468] sm:$0xff] }
 0x46e   : > { %8526 = vmatmul.mubr.f32.gmra.mrb[20].mxu1 %v12204_v31  ;;  %v5162_v31 = vld [vmem:[#allocation2 + $0xa9] sm:$0xff] }
 0x46f   : > { %8528 = vmatprep.mubr.f32.mxu1 %v12205_v36  ;;  %v5163_v36 = vld [vmem:[#allocation2 + $0xb1] sm:$0xff] }
 0x472   : > { %8529 = vmatmul.mubr.f32.gmra.mrb[22].mxu1 %v12206_v26  ;;  %v6441_v26 = vld [vmem:[%s12016_s3 + $0x470] sm:$0xff] }
 0x473   : > { %8531 = vmatprep.mubr.f32.mxu1 %v12207_v17  ;;  %v6442_v17 = vld [vmem:[%s12016_s3 + $0x478] sm:$0xff] }
 0x476   : > { %8532 = vmatmul.mubr.f32.gmra.mrb[24].mxu1 %v12208_v45  ;;  %v5164_v45 = vld [vmem:[#allocation2 + $0xc1] sm:$0xff] }
 0x477   : > { %8534 = vmatprep.mubr.f32.mxu1 %v12209_v18  ;;  %v5165_v18 = vld [vmem:[#allocation2 + $0xc9] sm:$0xff] }
 0x47a   : > { %8535 = vmatmul.mubr.f32.gmra.mrb[26].mxu1 %v12210_v55  ;;  %v5166_v55 = vld [vmem:[#allocation2 + $0xd9] sm:$0xff] }
 0x47b   : > { %8537 = vmatprep.mubr.f32.mxu1 %v12211_v22  ;;  %v5167_v22 = vld [vmem:[#allocation2 + $0xe1] sm:$0xff] }
 0x47e   : > { %8538 = vmatmul.mubr.f32.gmra.mrb[28].mxu1 %v11503_v61  ;;  %v6415_v61 = vld [vmem:[%s12016_s3 + $0x3a0] sm:$0xff] }
 0x47f   : > { %8540 = vmatprep.mubr.f32.mxu1 %v11766_v4  ;;  %v9303_v58 = vpack.c.bf16 %v6416_v13, %v6415_v61  ;;  %v5171_v61 = vld [vmem:[#allocation2 + $0x111] sm:$0xff]  ;;  %v5172_v13 = vld [vmem:[#allocation2 + $0x121] sm:$0xff] }
 0x482   : > { %8541 = vmatmul.mubr.f32.gmra.mrb[30].mxu1 %v11769_v14 }
 0x483   : > { %8575 = vmatprep.mubr.f32.mxu1 %v11254_v28  ;;  %v6417_v28 = vld [vmem:[%s12016_s3 + $0x3b0] sm:$0xff] }
 0x486   : > { %8576 = vmatmul.mubr.f32.vlgmr.msra.gmra.mrb[0].mxu1 %v11257_v25  ;;  %v9307_v25 = vpack.c.bf16 %v6418_v47, %v6417_v28  ;;  %v5174_v28 = vld [vmem:[#allocation2 + $0x139] sm:$0xff]  ;;  %v5175_v47 = vld [vmem:[#allocation2 + $0x141] sm:$0xff] }
 0x487   : > { %8578 = vmatprep.mubr.f32.mxu1 %v11266_v38  ;;  %9298 = vmatpush3.bf16.msra.mxu1 %v9295_v32  ;;  %v6419_v38 = vld [vmem:[%s12016_s3 + $0x3c0] sm:$0xff]  ;;  %v12220_v32 = vld [vmem:[#allocation35_spill] sm:$0xff] }
 0x488   : > { %9300 = vmatprep.subr.bf16.mxu1 %v9299_v51 }
 0x48a   : > { %8579 = vmatmul.mubr.f32.gmra.mrb[2].mxu1 %v11269_v44  ;;  %v9311_v44 = vpack.c.bf16 %v6420_v40, %v6419_v38  ;;  %v5177_v38 = vld [vmem:[#allocation2 + $0x159] sm:$0xff]  ;;  %v5178_v40 = vld [vmem:[#allocation2 + $0x169] sm:$0xff] }
 0x48b   : > { %8581 = vmatprep.mubr.f32.mxu1 %v11278_v63  ;;  %9302 = vmatpush3.bf16.msra.mxu1 %v9299_v51  ;;  %v6421_v63 = vld [vmem:[%s12016_s3 + $0x3d0] sm:$0xff] }
 0x48c   : > { %9304 = vmatprep.subr.bf16.mxu1 %v9303_v58  ;;  %v5170_v51 = vld [vmem:[#allocation2 + $0x109] sm:$0xff] }
 0x48e   : > { %8582 = vmatmul.mubr.f32.gmra.mrb[4].mxu1 %v11281_v9  ;;  %v9315_v9 = vpack.c.bf16 %v6422_v15, %v6421_v63  ;;  %v5180_v63 = vld [vmem:[#allocation2 + $0x181] sm:$0xff]  ;;  %v5182_v15 = vld [vmem:[#allocation2 + $0x199] sm:$0xff] }
 0x48f   : > { %8584 = vmatprep.mubr.f32.mxu1 %v11290_v20  ;;  %9306 = vmatpush3.bf16.msra.mxu1 %v9303_v58  ;;  %v6423_v20 = vld [vmem:[%s12016_s3 + $0x3e0] sm:$0xff]  ;;  %v5173_v58 = vld [vmem:[#allocation2 + $0x129] sm:$0xff] }
 0x490   : > { %9308 = vmatprep.subr.bf16.mxu1 %v9307_v25 }
 0x492   : > { %8585 = vmatmul.mubr.f32.gmra.mrb[6].mxu1 %v11293_v12  ;;  %v9319_v12 = vpack.c.bf16 %v6424_v8, %v6423_v20  ;;  %v5183_v20 = vld [vmem:[#allocation2 + $0x1a1] sm:$0xff]  ;;  %v5458_v8 = vld [vmem:[#allocation2 + $0x32] sm:$0xff] }
 0x493   : > { %8587 = vmatprep.mubr.f32.mxu1 %v11302_v27  ;;  %9310 = vmatpush3.bf16.msra.mxu1 %v9307_v25  ;;  %v6425_v27 = vld [vmem:[%s12016_s3 + $0x3f0] sm:$0xff] }
 0x494   : > { %9312 = vmatprep.subr.bf16.mxu1 %v9311_v44  ;;  %v5176_v25 = vld [vmem:[#allocation2 + $0x151] sm:$0xff] }
 0x496   : > { %8588 = vmatmul.mubr.f32.gmra.mrb[8].mxu1 %v11305_v21  ;;  %v9323_v21 = vpack.c.bf16 %v6426_v39, %v6425_v27  ;;  %v5460_v27 = vld [vmem:[#allocation2 + $0x4a] sm:$0xff]  ;;  %v5461_v39 = vld [vmem:[#allocation2 + $0x52] sm:$0xff] }
 0x497   : > { %8590 = vmatprep.mubr.f32.mxu1 %v11314_v56  ;;  %9314 = vmatpush3.bf16.msra.mxu1 %v9311_v44  ;;  %v6427_v56 = vld [vmem:[%s12016_s3 + $0x400] sm:$0xff]  ;;  %v5179_v44 = vld [vmem:[#allocation2 + $0x171] sm:$0xff] }
 0x498   : > { %9316 = vmatprep.subr.bf16.mxu1 %v9315_v9 }
 0x49a   : > { %8591 = vmatmul.mubr.f32.gmra.mrb[10].mxu1 %v11317_v1  ;;  %v9327_v1 = vpack.c.bf16 %v6428_v41, %v6427_v56  ;;  %v5463_v56 = vld [vmem:[#allocation2 + $0x6a] sm:$0xff]  ;;  %v5464_v41 = vld [vmem:[#allocation2 + $0x7a] sm:$0xff] }
 0x49b   : > { %8593 = vmatprep.mubr.f32.mxu1 %v11320_v2  ;;  %9318 = vmatpush3.bf16.msra.mxu1 %v9315_v9  ;;  %v12212_v2 = vld [vmem:[#allocation3_spill] sm:$0xff] }
 0x49c   : > { %9320 = vmatprep.subr.bf16.mxu1 %v9319_v12  ;;  %v5181_v9 = vld [vmem:[#allocation2 + $0x189] sm:$0xff] }
 0x49e   : > { %8594 = vmatmul.mubr.f32.gmra.mrb[12].mxu1 %v11323_v5  ;;  %v12213_v5 = vld [vmem:[#allocation4_spill] sm:$0xff] }
 0x49f   : > { %8596 = vmatprep.mubr.f32.mxu1 %v11326_v60  ;;  %9322 = vmatpush3.bf16.msra.mxu1 %v9319_v12  ;;  %v12214_v60 = vld [vmem:[#allocation29_spill] sm:$0xff] }
 0x4a0   : > { %9324 = vmatprep.subr.bf16.mxu1 %v9323_v21  ;;  %v5459_v12 = vld [vmem:[#allocation2 + $0x3a] sm:$0xff] }
 0x4a2   : > { %8597 = vmatmul.mubr.f32.gmra.mrb[14].mxu1 %v11329_v33  ;;  %v12215_v33 = vld [vmem:[#allocation30_spill] sm:$0xff] }
 0x4a3   : > { %8599 = vmatprep.mubr.f32.mxu1 %v11332_v34  ;;  %9326 = vmatpush3.bf16.msra.mxu1 %v9323_v21  ;;  %v9881_v34 = vld [vmem:[#allocation2] sm:$0xff] }
 0x4a4   : > { %9328 = vmatprep.subr.bf16.mxu1 %v9327_v1  ;;  %v5462_v21 = vld [vmem:[#allocation2 + $0x62] sm:$0xff] }
 0x4a6   : > { %8600 = vmatmul.mubr.f32.gmra.mrb[16].mxu1 %v11335_v62  ;;  %v6429_v62 = vld [vmem:[%s12016_s3 + $0x410] sm:$0xff] }
 0x4a7   : > { %8602 = vmatprep.mubr.f32.mxu1 %v11338_v10  ;;  %v6430_v10 = vld [vmem:[%s12016_s3 + $0x418] sm:$0xff] }
 0x4aa   : > { %8603 = vmatmul.mubr.f32.gmra.mrb[18].mxu1 %v11341_v49  ;;  %v9331_v49 = vpack.c.bf16 %v6430_v10, %v6429_v62  ;;  %v5471_v62 = vld [vmem:[#allocation2 + $0xca] sm:$0xff]  ;;  %v5472_v10 = vld [vmem:[#allocation2 + $0xda] sm:$0xff] }
 0x4ab   : > { %8605 = vmatprep.mubr.f32.mxu1 %v11344_v59  ;;  %v6431_v59 = vld [vmem:[%s12016_s3 + $0x420] sm:$0xff] }
 0x4ae   : > { %8606 = vmatmul.mubr.f32.gmra.mrb[20].mxu1 %v11347_v3  ;;  %v6432_v3 = vld [vmem:[%s12016_s3 + $0x428] sm:$0xff] }
 0x4af   : > { %8608 = vmatprep.mubr.f32.mxu1 %v11350_v24  ;;  %v12216_v24 = vld [vmem:[#allocation31_spill] sm:$0xff] }
 0x4b2   : > { %8609 = vmatmul.mubr.f32.gmra.mrb[22].mxu1 %v11353_v57  ;;  %v12217_v57 = vld [vmem:[#allocation32_spill] sm:$0xff] }
 0x4b3   : > { %8611 = vmatprep.mubr.f32.mxu1 %v11356_v29  ;;  %v9335_v29 = vpack.c.bf16 %v6432_v3, %v6431_v59  ;;  %v5474_v59 = vld [vmem:[#allocation2 + $0xf2] sm:$0xff]  ;;  %v5475_v3 = vld [vmem:[#allocation2 + $0xfa] sm:$0xff] }
 0x4b6   : > { %8612 = vmatmul.mubr.f32.gmra.mrb[24].mxu1 %v11359_v30  ;;  %v6433_v30 = vld [vmem:[%s12016_s3 + $0x430] sm:$0xff] }
 0x4b7   : > { %8614 = vmatprep.mubr.f32.mxu1 %v12212_v2  ;;  %v5466_v2 = vld [vmem:[#allocation2 + $0x92] sm:$0xff] }
 0x4ba   : > { %8615 = vmatmul.mubr.f32.gmra.mrb[26].mxu1 %v12213_v5  ;;  %v5467_v5 = vld [vmem:[#allocation2 + $0x9a] sm:$0xff] }
 0x4bb   : > { %8617 = vmatprep.mubr.f32.mxu1 %v12214_v60  ;;  %v5468_v60 = vld [vmem:[#allocation2 + $0xaa] sm:$0xff] }
 0x4be   : > { %8618 = vmatmul.mubr.f32.gmra.mrb[28].mxu1 %v12215_v33  ;;  %v5469_v33 = vld [vmem:[#allocation2 + $0xb2] sm:$0xff] }
 0x4bf   : > { %8620 = vmatprep.mubr.f32.mxu1 %v9881_v34 }
 0x4c2   : > { %8621 = vmatmul.mubr.f32.gmra.mrb[30].mxu1 %v9881_v34  ;;  %v5470_v34 = vld [vmem:[#allocation2 + $0xc2] sm:$0xff] }
 0x4c3   : > { %8655 = vmatprep.mubr.f32.mxu1 %v11602_v54  ;;  %v6434_v54 = vld [vmem:[%s12016_s3 + $0x438] sm:$0xff] }
 0x4c4   : > { %v9339_v11 = vpack.c.bf16 %v6434_v54, %v6433_v30  ;;  %v5479_v30 = vld [vmem:[#allocation2 + $0x12a] sm:$0xff]  ;;  %v5480_v54 = vld [vmem:[#allocation2 + $0x13a] sm:$0xff] }
 0x4c6   : > { %8656 = vmatmul.mubr.f32.vlgmr.msra.gmra.mrb[0].mxu1 %v12216_v24  ;;  %v5476_v24 = vld [vmem:[#allocation2 + $0x10a] sm:$0xff] }
 0x4c7   : > { %8658 = vmatprep.mubr.f32.mxu1 %v12217_v57  ;;  %9330 = vmatpush3.bf16.msra.mxu1 %v9327_v1  ;;  %v5465_v1 = vld [vmem:[#allocation2 + $0x82] sm:$0xff]  ;;  %v5477_v57 = vld [vmem:[#allocation2 + $0x112] sm:$0xff] }
 0x4c8   : > { %9332 = vmatprep.subr.bf16.mxu1 %v9331_v49 }
 0x4ca   : > { %8659 = vmatmul.mubr.f32.gmra.mrb[2].mxu1 %v12218_v35  ;;  %v5481_v35 = vld [vmem:[#allocation2 + $0x142] sm:$0xff] }
 0x4cb   : > { %8661 = vmatprep.mubr.f32.mxu1 %v12219_v52  ;;  %9334 = vmatpush3.bf16.msra.mxu1 %v9331_v49  ;;  %v5473_v49 = vld [vmem:[#allocation2 + $0xe2] sm:$0xff]  ;;  %v5482_v52 = vld [vmem:[#allocation2 + $0x152] sm:$0xff] }
 0x4cc   : > { %9336 = vmatprep.subr.bf16.mxu1 %v9335_v29 }
 0x4ce   : > { %8662 = vmatmul.mubr.f32.gmra.mrb[4].mxu1 %v11629_v50  ;;  %v9347_v50 = vpack.c.bf16 %v6438_v48, %v6437_v43  ;;  %v11906_v43 = vld [vmem:[%s12017_s4] ss:$0 sm:$0xff] }
 0x4cf   : > { %8664 = vmatprep.mubr.f32.mxu1 %v12220_v32  ;;  %9338 = vmatpush3.bf16.msra.mxu1 %v9335_v29  ;;  %v5478_v29 = vld [vmem:[#allocation2 + $0x122] sm:$0xff]  ;;  %v5488_v32 = vld [vmem:[#allocation2 + $0x19a] sm:$0xff] }
 0x4d0   : > { %9340 = vmatprep.subr.bf16.mxu1 %v9339_v11 }
 0x4d2   : > { %8665 = vmatmul.mubr.f32.gmra.mrb[6].mxu1 %v11641_v42  ;;  %v9351_v42 = vpack.c.bf16 %v6440_v23, %v6439_v0 }
 0x4d3   : > { %8667 = vmatprep.mubr.f32.mxu1 %v5160_v53  ;;  %9342 = vmatpush3.bf16.msra.mxu1 %v9339_v11  ;;  %v5483_v11 = vld [vmem:[#allocation2 + $0x15a] sm:$0xff] }
 0x4d4   : > { %9344 = vmatprep.subr.bf16.mxu1 %v9343_v37  ;;  %v6444_v53 = vld [vmem:[%s9959_s14 + $0x21] sm:$0xff] }
 0x4d6   : > { %8668 = vmatmul.mubr.f32.gmra.mrb[8].mxu1 %v11651_v7  ;;  %v9355_v7 = vpack.c.bf16 %v6442_v17, %v6441_v26 }
 0x4d7   : > { %8670 = vmatprep.mubr.f32.mxu1 %v5162_v31  ;;  %9346 = vmatpush3.bf16.msra.mxu1 %v9343_v37  ;;  %v5489_v37 = vld [vmem:[#allocation2 + $0x1a2] sm:$0xff] }
 0x4d8   : > { %9348 = vmatprep.subr.bf16.mxu1 %v9347_v50 }
 0x4da   : > { %8671 = vmatmul.mubr.f32.gmra.mrb[10].mxu1 %v5163_v36  ;;  %v6446_v36 = vld [vmem:[%s9959_s14 + $0x39] sm:$0xff] }
 0x4db   : > { %8673 = vmatprep.mubr.f32.mxu1 %v5164_v45  ;;  %9350 = vmatpush3.bf16.msra.mxu1 %v9347_v50 }
 0x4dc   : > { %9352 = vmatprep.subr.bf16.mxu1 %v9351_v42 }
 0x4de   : > { %8674 = vmatmul.mubr.f32.gmra.mrb[12].mxu1 %v5165_v18 }
 0x4df   : > { %8676 = vmatprep.mubr.f32.mxu1 %v5166_v55  ;;  %9354 = vmatpush3.bf16.msra.mxu1 %v9351_v42 }
 0x4e0   : > { %9356 = vmatprep.subr.bf16.mxu1 %v9355_v7 }
 0x4e2   : > { %8677 = vmatmul.mubr.f32.gmra.mrb[14].mxu1 %v5167_v22 }
 0x4e3   : > { %8679 = vmatprep.mubr.f32.mxu1 %v5168_v6  ;;  %9358 = vmatpush3.bf16.msra.mxu1 %v9355_v7  ;;  %v6445_v7 = vld [vmem:[%s9959_s14 + $0x31] sm:$0xff] }
 0x4e6   : > { %8680 = vmatmul.mubr.f32.gmra.mrb[16].mxu1 %v5169_v46 }
 0x4e7   : > { %8682 = vmatprep.mubr.f32.mxu1 %v5170_v51  ;;  %v6448_v51 = vld [vmem:[%s9959_s14 + $0x51] sm:$0xff] }
 0x4ea   : > { %8683 = vmatmul.mubr.f32.gmra.mrb[18].mxu1 %v5171_v61 }
 0x4eb   : > { %8685 = vmatprep.mubr.f32.mxu1 %v5172_v13 }
 0x4ee   : > { %8686 = vmatmul.mubr.f32.gmra.mrb[20].mxu1 %v5173_v58 }
 0x4ef   : > { %8688 = vmatprep.mubr.f32.mxu1 %v5174_v28  ;;  %v6447_v28 = vld [vmem:[%s9959_s14 + $0x49] sm:$0xff] }
 0x4f2   : > { %8689 = vmatmul.mubr.f32.gmra.mrb[22].mxu1 %v5175_v47 }
 0x4f3   : > { %8691 = vmatprep.mubr.f32.mxu1 %v5176_v25 }
 0x4f6   : > { %8692 = vmatmul.mubr.f32.gmra.mrb[24].mxu1 %v5177_v38 }
 0x4f7   : > { %8694 = vmatprep.mubr.f32.mxu1 %v5178_v40 }
 0x4fa   : > { %8695 = vmatmul.mubr.f32.gmra.mrb[26].mxu1 %v5179_v44 }
 0x4fb   : > { %8697 = vmatprep.mubr.f32.mxu1 %v5180_v63  ;;  %v6450_v63 = vld [vmem:[%s9959_s14 + $0x69] sm:$0xff] }
 0x4fe   : > { %8698 = vmatmul.mubr.f32.gmra.mrb[28].mxu1 %v5181_v9 }
 0x4ff   : > { %8700 = vmatprep.mubr.f32.mxu1 %v5182_v15 }
 0x502   : > { %8701 = vmatmul.mubr.f32.gmra.mrb[30].mxu1 %v5183_v20 }
 0x503   : > { %8735 = vmatprep.mubr.f32.mxu1 %v5458_v8  ;;  %v6449_v8 = vld [vmem:[%s9959_s14 + $0x61] sm:$0xff] }
 0x506   : > { %8736 = vmatmul.mubr.f32.vlgmr.msra.gmra.mrb[0].mxu1 %v5459_v12 }
 0x507   : > { %8738 = vmatprep.mubr.f32.mxu1 %v5460_v27 }
 0x50a   : > { %8739 = vmatmul.mubr.f32.gmra.mrb[2].mxu1 %v5461_v39 }
 0x50b   : > { %8741 = vmatprep.mubr.f32.mxu1 %v5462_v21 }
 0x50e   : > { %8742 = vmatmul.mubr.f32.gmra.mrb[4].mxu1 %v5463_v56 }
 0x50f   : > { %8744 = vmatprep.mubr.f32.mxu1 %v5464_v41  ;;  %v6452_v41 = vld [vmem:[%s9959_s14 + $0x81] sm:$0xff] }
 0x512   : > { %8745 = vmatmul.mubr.f32.gmra.mrb[6].mxu1 %v5465_v1 }
 0x513   : > { %8747 = vmatprep.mubr.f32.mxu1 %v5466_v2 }
 0x516   : > { %8748 = vmatmul.mubr.f32.gmra.mrb[8].mxu1 %v5467_v5 }
 0x517   : > { %8750 = vmatprep.mubr.f32.mxu1 %v5468_v60  ;;  %v6451_v60 = vld [vmem:[%s9959_s14 + $0x79] sm:$0xff] }
 0x51a   : > { %8751 = vmatmul.mubr.f32.gmra.mrb[10].mxu1 %v5469_v33 }
 0x51b   : > { %8753 = vmatprep.mubr.f32.mxu1 %v5470_v34 }
 0x51e   : > { %8754 = vmatmul.mubr.f32.gmra.mrb[12].mxu1 %v5471_v62 }
 0x51f   : > { %8756 = vmatprep.mubr.f32.mxu1 %v5472_v10 }
 0x522   : > { %8757 = vmatmul.mubr.f32.gmra.mrb[14].mxu1 %v5473_v49 }
 0x523   : > { %8759 = vmatprep.mubr.f32.mxu1 %v5474_v59  ;;  %v6454_v59 = vld [vmem:[%s9959_s14 + $0x99] sm:$0xff] }
 0x526   : > { %8760 = vmatmul.mubr.f32.gmra.mrb[16].mxu1 %v5475_v3 }
 0x527   : > { %8762 = vmatprep.mubr.f32.mxu1 %v5476_v24 }
 0x52a   : > { %8763 = vmatmul.mubr.f32.gmra.mrb[18].mxu1 %v5477_v57 }
 0x52b   : > { %8765 = vmatprep.mubr.f32.mxu1 %v5478_v29  ;;  %v6453_v29 = vld [vmem:[%s9959_s14 + $0x91] sm:$0xff] }
 0x52e   : > { %8766 = vmatmul.mubr.f32.gmra.mrb[20].mxu1 %v5479_v30 }
 0x52f   : > { %8768 = vmatprep.mubr.f32.mxu1 %v5480_v54 }
 0x532   : > { %8769 = vmatmul.mubr.f32.gmra.mrb[22].mxu1 %v5481_v35 }
 0x533   : > { %8771 = vmatprep.mubr.f32.mxu1 %v5482_v52 }
 0x536   : > { %8772 = vmatmul.mubr.f32.gmra.mrb[24].mxu1 %v5483_v11 }
 0x537   : > { %8774 = vmatprep.mubr.f32.mxu1 %v5484_v19  ;;  %v6456_v19 = vld [vmem:[%s9959_s14 + $0xb1] sm:$0xff] }
 0x53a   : > { %8775 = vmatmul.mubr.f32.gmra.mrb[26].mxu1 %v5485_v16 }
 0x53b   : > { %8777 = vmatprep.mubr.f32.mxu1 %v11766_v4  ;;  %v6443_v4 = vld [vmem:[%s9959_s14 + $0x19] sm:$0xff] }
 0x53e   : > { %8778 = vmatmul.mubr.f32.gmra.mrb[28].mxu1 %v11769_v14 }
 0x53f   : > { %8780 = vmatprep.mubr.f32.mxu1 %v5488_v32 }
 0x542   : > { %8781 = vmatmul.mubr.f32.gmra.mrb[30].mxu1 %v5489_v37 }
 0x5d9   : > { %v8737_v48 = vpop.f32.mrb[0].mxu1 }
 0x5da   : > { %v5804_v50 = vadd.f32 %v8737_v48, %v11906_v43  ;;  %v5573_v0 = vpop.f32.mrb[1].mxu1  ;;  %v6455_v48 = vld [vmem:[%s9959_s14 + $0xa9] sm:$0xff] }
 0x5db   : > { %v5803_v23 = vadd.f32 %v11906_v43, %v5573_v0 }
 0x5dc   : > { %v5836_v14 = vadd.f32 %v6444_v53, %v5804_v50 }
 0x5dd   : > { %v5835_v31 = vadd.f32 %v6443_v4, %v5803_v23  ;;  %v8740_v42 = vpop.f32.mrb[2].mxu1 }
 0x5de   : > { %v5868_v26 = vmax.f32 %v5836_v14, 0.0  ;;  %v5806_v17 = vadd.f32 %v8740_v42, %v11906_v43  ;;  %v5583_v45 = vpop.f32.mrb[3].mxu1  ;;  %v6458_v14 = vld [vmem:[%s9959_s14 + $0xc9] sm:$0xff] }
 0x5df   : > { %v5867_v18 = vmax.f32 %v5835_v31, 0.0  ;;  %v5805_v55 = vadd.f32 %v11906_v43, %v5583_v45 }
 0x5e0   : > { %5900 = vst [vmem:[%s11916_s9 + $0x8] sm:$0xff] %v5868_v26  ;;  %v5838_v22 = vadd.f32 %v6446_v36, %v5806_v17  ;;  %v6457_v26 = vld [vmem:[%s9959_s14 + $0xc1] sm:$0xff] }
 0x5e1   : > { %5899 = vst [vmem:[%s11916_s9] sm:$0xff] %v5867_v18  ;;  %v5837_v6 = vadd.f32 %v6445_v7, %v5805_v55  ;;  %v8743_v46 = vpop.f32.mrb[4].mxu1 }
 0x5e2   : > { %v5870_v61 = vmax.f32 %v5838_v22, 0.0  ;;  %v5808_v13 = vadd.f32 %v8743_v46, %v11906_v43  ;;  %v5593_v58 = vpop.f32.mrb[5].mxu1  ;;  %v6460_v22 = vld [vmem:[%s9959_s14 + $0xe1] sm:$0xff] }
 0x5e3   : > { %v5869_v47 = vmax.f32 %v5837_v6, 0.0  ;;  %v5807_v25 = vadd.f32 %v11906_v43, %v5593_v58 }
 0x5e4   : > { %5902 = vst [vmem:[%s11916_s9 + $0x18] sm:$0xff] %v5870_v61  ;;  %v5840_v38 = vadd.f32 %v6448_v51, %v5808_v13  ;;  %v6459_v61 = vld [vmem:[%s9959_s14 + $0xd9] sm:$0xff] }
 0x5e5   : > { %5901 = vst [vmem:[%s11916_s9 + $0x10] sm:$0xff] %v5869_v47  ;;  %v5839_v40 = vadd.f32 %v6447_v28, %v5807_v25  ;;  %v8746_v44 = vpop.f32.mrb[6].mxu1 }
 0x5e6   : > { %v5872_v15 = vmax.f32 %v5840_v38, 0.0  ;;  %v5810_v9 = vadd.f32 %v8746_v44, %v11906_v43  ;;  %v5603_v20 = vpop.f32.mrb[7].mxu1  ;;  %v6462_v38 = vld [vmem:[%s9959_s14 + $0xf9] sm:$0xff] }
 0x5e7   : > { %v5871_v12 = vmax.f32 %v5839_v40, 0.0  ;;  %v5809_v27 = vadd.f32 %v11906_v43, %v5603_v20 }
 0x5e8   : > { %5904 = vst [vmem:[%s11916_s9 + $0x28] sm:$0xff] %v5872_v15  ;;  %v5842_v39 = vadd.f32 %v6450_v63, %v5810_v9  ;;  %v6461_v15 = vld [vmem:[%s9959_s14 + $0xf1] sm:$0xff] }
 0x5e9   : > { %5903 = vst [vmem:[%s11916_s9 + $0x20] sm:$0xff] %v5871_v12  ;;  %v5841_v21 = vadd.f32 %v6449_v8, %v5809_v27  ;;  %v8749_v56 = vpop.f32.mrb[8].mxu1 }
 0x5ea   : > { %v5874_v1 = vmax.f32 %v5842_v39, 0.0  ;;  %v5812_v2 = vadd.f32 %v8749_v56, %v11906_v43  ;;  %v5613_v5 = vpop.f32.mrb[9].mxu1  ;;  %v6464_v39 = vld [vmem:[%s9959_s14 + $0x111] sm:$0xff] }
 0x5eb   : > { %v5873_v33 = vmax.f32 %v5841_v21, 0.0  ;;  %v5811_v34 = vadd.f32 %v11906_v43, %v5613_v5 }
 0x5ec   : > { %5906 = vst [vmem:[%s11916_s9 + $0x38] sm:$0xff] %v5874_v1  ;;  %v5844_v62 = vadd.f32 %v6452_v41, %v5812_v2  ;;  %v6463_v1 = vld [vmem:[%s9959_s14 + $0x109] sm:$0xff] }
 0x5ed   : > { %5905 = vst [vmem:[%s11916_s9 + $0x30] sm:$0xff] %v5873_v33  ;;  %v5843_v10 = vadd.f32 %v6451_v60, %v5811_v34  ;;  %v8752_v49 = vpop.f32.mrb[10].mxu1 }
 0x5ee   : > { %v5876_v3 = vmax.f32 %v5844_v62, 0.0  ;;  %v5814_v24 = vadd.f32 %v8752_v49, %v11906_v43  ;;  %v5623_v57 = vpop.f32.mrb[11].mxu1  ;;  %v6466_v62 = vld [vmem:[%s9959_s14 + $0x129] sm:$0xff] }
 0x5ef   : > { %v5875_v30 = vmax.f32 %v5843_v10, 0.0  ;;  %v5813_v54 = vadd.f32 %v11906_v43, %v5623_v57 }
 0x5f0   : > { %5908 = vst [vmem:[%s11916_s9 + $0x48] sm:$0xff] %v5876_v3  ;;  %v5846_v35 = vadd.f32 %v6454_v59, %v5814_v24  ;;  %v6465_v3 = vld [vmem:[%s9959_s14 + $0x121] sm:$0xff] }
 0x5f1   : > { %5907 = vst [vmem:[%s11916_s9 + $0x40] sm:$0xff] %v5875_v30  ;;  %v5845_v52 = vadd.f32 %v6453_v29, %v5813_v54  ;;  %v8755_v11 = vpop.f32.mrb[12].mxu1 }
 0x5f2   : > { %v5878_v16 = vmax.f32 %v5846_v35, 0.0  ;;  %v5816_v32 = vadd.f32 %v8755_v11, %v11906_v43  ;;  %v5633_v37 = vpop.f32.mrb[13].mxu1  ;;  %v6468_v35 = vld [vmem:[%s9959_s14 + $0x141] sm:$0xff] }
 0x5f3   : > { %v5877_v53 = vmax.f32 %v5845_v52, 0.0  ;;  %v5815_v50 = vadd.f32 %v11906_v43, %v5633_v37 }
 0x5f4   : > { %5910 = vst [vmem:[%s11916_s9 + $0x58] sm:$0xff] %v5878_v16  ;;  %v5848_v0 = vadd.f32 %v6456_v19, %v5816_v32  ;;  %v6467_v16 = vld [vmem:[%s9959_s14 + $0x139] sm:$0xff] }
 0x5f5   : > { %5909 = vst [vmem:[%s11916_s9 + $0x50] sm:$0xff] %v5877_v53  ;;  %v5847_v4 = vadd.f32 %v6455_v48, %v5815_v50  ;;  %v8758_v23 = vpop.f32.mrb[14].mxu1 }
 0x5f6   : > { %v5880_v31 = vmax.f32 %v5848_v0, 0.0  ;;  %v5818_v42 = vadd.f32 %v8758_v23, %v11906_v43  ;;  %v5643_v36 = vpop.f32.mrb[15].mxu1  ;;  %v6470_v0 = vld [vmem:[%s9959_s14 + $0x159] sm:$0xff] }
 0x5f7   : > { %v5879_v17 = vmax.f32 %v5847_v4, 0.0  ;;  %v5817_v45 = vadd.f32 %v11906_v43, %v5643_v36 }
 0x5f8   : > { %5912 = vst [vmem:[%s11916_s9 + $0x68] sm:$0xff] %v5880_v31  ;;  %v5850_v7 = vadd.f32 %v6458_v14, %v5818_v42  ;;  %v6469_v31 = vld [vmem:[%s9959_s14 + $0x151] sm:$0xff] }
 0x5f9   : > { %5911 = vst [vmem:[%s11916_s9 + $0x60] sm:$0xff] %v5879_v17  ;;  %v5849_v18 = vadd.f32 %v6457_v26, %v5817_v45  ;;  %v8761_v55 = vpop.f32.mrb[16].mxu1 }
 0x5fa   : > { %v5882_v6 = vmax.f32 %v5850_v7, 0.0  ;;  %v5820_v46 = vadd.f32 %v8761_v55, %v11906_v43  ;;  %v5653_v51 = vpop.f32.mrb[17].mxu1  ;;  %v6472_v7 = vld [vmem:[%s9959_s14 + $0x171] sm:$0xff] }
 0x5fb   : > { %v5881_v13 = vmax.f32 %v5849_v18, 0.0  ;;  %v5819_v58 = vadd.f32 %v11906_v43, %v5653_v51 }
 0x5fc   : > { %5914 = vst [vmem:[%s11916_s9 + $0x78] sm:$0xff] %v5882_v6  ;;  %v5852_v28 = vadd.f32 %v6460_v22, %v5820_v46  ;;  %v6471_v6 = vld [vmem:[%s9959_s14 + $0x169] sm:$0xff] }
 0x5fd   : > { %5913 = vst [vmem:[%s11916_s9 + $0x70] sm:$0xff] %v5881_v13  ;;  %v5851_v47 = vadd.f32 %v6459_v61, %v5819_v58  ;;  %v8764_v25 = vpop.f32.mrb[18].mxu1 }
 0x5fe   : > { %v5884_v40 = vmax.f32 %v5852_v28, 0.0  ;;  %v5822_v44 = vadd.f32 %v8764_v25, %v11906_v43  ;;  %v5663_v63 = vpop.f32.mrb[19].mxu1  ;;  %v6474_v28 = vld [vmem:[%s9959_s14 + $0x189] sm:$0xff] }
 0x5ff   : > { %v5883_v9 = vmax.f32 %v5851_v47, 0.0  ;;  %v5821_v20 = vadd.f32 %v11906_v43, %v5663_v63 }
 0x600   : > { %5916 = vst [vmem:[%s11916_s9 + $0x88] sm:$0xff] %v5884_v40  ;;  %v5854_v8 = vadd.f32 %v6462_v38, %v5822_v44  ;;  %v6473_v40 = vld [vmem:[%s9959_s14 + $0x181] sm:$0xff] }
 0x601   : > { %5915 = vst [vmem:[%s11916_s9 + $0x80] sm:$0xff] %v5883_v9  ;;  %v5853_v12 = vadd.f32 %v6461_v15, %v5821_v20  ;;  %v8767_v27 = vpop.f32.mrb[20].mxu1 }
 0x602   : > { %v5886_v21 = vmax.f32 %v5854_v8, 0.0  ;;  %v5824_v56 = vadd.f32 %v8767_v27, %v11906_v43  ;;  %v5673_v41 = vpop.f32.mrb[21].mxu1 }
 0x603   : > { %v5885_v2 = vmax.f32 %v5853_v12, 0.0  ;;  %v5823_v5 = vadd.f32 %v11906_v43, %v5673_v41 }
 0x604   : > { %5918 = vst [vmem:[%s11916_s9 + $0x98] sm:$0xff] %v5886_v21  ;;  %v5856_v60 = vadd.f32 %v6464_v39, %v5824_v56 }
 0x605   : > { %5917 = vst [vmem:[%s11916_s9 + $0x90] sm:$0xff] %v5885_v2  ;;  %v5855_v33 = vadd.f32 %v6463_v1, %v5823_v5  ;;  %v8770_v34 = vpop.f32.mrb[22].mxu1 }
 0x606   : > { %v5888_v10 = vmax.f32 %v5856_v60, 0.0  ;;  %v5826_v49 = vadd.f32 %v8770_v34, %v11906_v43  ;;  %v5683_v59 = vpop.f32.mrb[23].mxu1 }
 0x607   : > { %v5887_v24 = vmax.f32 %v5855_v33, 0.0  ;;  %v5825_v57 = vadd.f32 %v11906_v43, %v5683_v59 }
 0x608   : > { %5920 = vst [vmem:[%s11916_s9 + $0xa8] sm:$0xff] %v5888_v10  ;;  %v5858_v29 = vadd.f32 %v6466_v62, %v5826_v49 }
 0x609   : > { %5919 = vst [vmem:[%s11916_s9 + $0xa0] sm:$0xff] %v5887_v24  ;;  %v5857_v30 = vadd.f32 %v6465_v3, %v5825_v57  ;;  %v8773_v54 = vpop.f32.mrb[24].mxu1 }
 0x60a   : > { %v5890_v52 = vmax.f32 %v5858_v29, 0.0  ;;  %v5828_v11 = vadd.f32 %v8773_v54, %v11906_v43  ;;  %v5693_v19 = vpop.f32.mrb[25].mxu1 }
 0x60b   : > { %v5889_v32 = vmax.f32 %v5857_v30, 0.0  ;;  %v5827_v37 = vadd.f32 %v11906_v43, %v5693_v19 }
 0x60c   : > { %5922 = vst [vmem:[%s11916_s9 + $0xb8] sm:$0xff] %v5890_v52  ;;  %v5860_v48 = vadd.f32 %v6468_v35, %v5828_v11 }
 0x60d   : > { %5921 = vst [vmem:[%s11916_s9 + $0xb0] sm:$0xff] %v5889_v32  ;;  %v5859_v53 = vadd.f32 %v6467_v16, %v5827_v37  ;;  %v8776_v50 = vpop.f32.mrb[26].mxu1 }
 0x60e   : > { %v5892_v4 = vmax.f32 %v5860_v48, 0.0  ;;  %v5830_v23 = vadd.f32 %v8776_v50, %v11906_v43  ;;  %v5703_v14 = vpop.f32.mrb[27].mxu1 }
 0x60f   : > { %v5891_v42 = vmax.f32 %v5859_v53, 0.0  ;;  %v5829_v36 = vadd.f32 %v11906_v43, %v5703_v14 }
 0x610   : > { %5924 = vst [vmem:[%s11916_s9 + $0xc8] sm:$0xff] %v5892_v4  ;;  %v5862_v26 = vadd.f32 %v6470_v0, %v5830_v23 }
 0x611   : > { %5923 = vst [vmem:[%s11916_s9 + $0xc0] sm:$0xff] %v5891_v42  ;;  %v5861_v17 = vadd.f32 %v6469_v31, %v5829_v36  ;;  %v8779_v45 = vpop.f32.mrb[28].mxu1 }
 0x612   : > { %v5894_v18 = vmax.f32 %v5862_v26, 0.0  ;;  %v5832_v55 = vadd.f32 %v8779_v45, %v11906_v43  ;;  %v5713_v22 = vpop.f32.mrb[29].mxu1 }
 0x613   : > { %v5893_v46 = vmax.f32 %v5861_v17, 0.0  ;;  %v5831_v51 = vadd.f32 %v11906_v43, %v5713_v22 }
 0x614   : > { %5926 = vst [vmem:[%s11916_s9 + $0xd8] sm:$0xff] %v5894_v18  ;;  %v5864_v61 = vadd.f32 %v6472_v7, %v5832_v55 }
 0x615   : > { %5925 = vst [vmem:[%s11916_s9 + $0xd0] sm:$0xff] %v5893_v46  ;;  %v5863_v13 = vadd.f32 %v6471_v6, %v5831_v51  ;;  %v8782_v58 = vpop.f32.mrb[30].mxu1 }
 0x616   : > { %v5896_v47 = vmax.f32 %v5864_v61, 0.0  ;;  %v5834_v25 = vadd.f32 %v8782_v58, %v11906_v43  ;;  %v5723_v38 = vpop.f32.mrb[31].mxu1 }
 0x617   : > { %v5895_v44 = vmax.f32 %v5863_v13, 0.0  ;;  %v5833_v63 = vadd.f32 %v11906_v43, %v5723_v38 }
 0x618   : > { %5928 = vst [vmem:[%s11916_s9 + $0xe8] sm:$0xff] %v5896_v47  ;;  %v5866_v15 = vadd.f32 %v6474_v28, %v5834_v25 }
 0x619   : > { %5927 = vst [vmem:[%s11916_s9 + $0xe0] sm:$0xff] %v5895_v44  ;;  %v5865_v9 = vadd.f32 %v6473_v40, %v5833_v63 }
 0x61a   : > { %v5898_v20 = vmax.f32 %v5866_v15, 0.0 }
 0x61b   : > { %v5897_v8 = vmax.f32 %v5865_v9, 0.0 }
 0x61c   : > { %5930 = vst [vmem:[%s11916_s9 + $0xf8] sm:$0xff] %v5898_v20 }
 0x61d   : > { %5929 = vst [vmem:[%s11916_s9 + $0xf0] sm:$0xff] %v5897_v8 }
 0x61e PF: > { %s15_s18 = sadd.s32 1, %s9888_s18  }
 0x61f   : > { %p12_p4 = scmp.ge.s32.totalorder %s15_s18, 4  }
 0x621   :  { %14 = sbr.rel (!%p12_p4) target bundleno = 1 (0x1), region = 90 }

</bundles_post_ra>
